<compile_context>
chip_gen: v5e
topology: v5e:2x2
jax: 0.10.0
libtpu: 0.0.40
codegen_flags: <defaults>
</compile_context>

<pallas_src>
import functools

import jax
import jax.numpy as jnp
from jax import lax
from jax.experimental import pallas as pl
from jax.experimental.pallas import tpu as pltpu

K = 5          # ConvTranspose2d kernel size
PAD = K - 1    # implicit zero padding of the equivalent VALID correlation


def _tconv_relu_kernel(x_ref, wb_ref, b_ref, o_ref, xw_ref, *, h, w, hout, wout):
    """Per-image transposed conv + (out+out, ReLU) epilogue.

    x_ref  : (1, H, W, C)       channel-last input block (C=96 on the 128 lanes)
    wb_ref : (K*K, Wout, C)     flipped weights, tap-major, pre-broadcast along
                                the sublane (Wout) axis -> no in-kernel broadcasts
    b_ref  : (1,)               bias (SMEM scalar)
    o_ref  : (1, 1, Hout*Wout)  lane-dense output row
    xw_ref : (H, W+2*PAD, C)    W-only zero-padded ReLU(x) scratch (VMEM)
    """
    c = x_ref.shape[-1]

    # Fused ReLU + zero padding (W axis only); relu-then-pad == pad-then-relu.
    xw_ref[...] = jnp.zeros_like(xw_ref)
    xw_ref[:, PAD:PAD + w, :] = jnp.maximum(x_ref[0], 0.0)

    # Scatter-form tap loop:
    #   out[i, j, :] += xw[r, j+kw, :] * wflip[kh, kw, :]   with i = r + PAD - kh
    # Every patch xw[r, kw:kw+Wout, :] is loaded exactly once, H padding is
    # handled statically (i is always in [0, Hout)), and both FMA operands are
    # (Wout, C) so there is zero broadcast traffic.
    accs = [jnp.zeros((wout, c), jnp.float32) for _ in range(hout)]
    for kw in range(K):
        wk = [wb_ref[kh * K + kw] for kh in range(K)]          # 5 x (Wout, C) loads
        for r in range(h):
            patch = xw_ref[r, kw:kw + wout, :]                 # (Wout, C), one load
            for kh in range(K):
                i = r + PAD - kh                               # static, in [0, Hout)
                accs[i] = accs[i] + patch * wk[kh]

    # Epilogue: channel reduce (XLU), bias, out+out, ReLU, lane-dense store.
    two_b = b_ref[0] * 2.0
    for i in range(hout):
        row = jnp.sum(accs[i], axis=-1)                        # (Wout,)
        row = jnp.maximum(row + row + two_b, 0.0)              # relu(2*(conv + b))
        o_ref[0, 0, i * wout:(i + 1) * wout] = row.astype(o_ref.dtype)


def client_model2_test_forward(x, w, b):
    """x: (N, 96, H, W) f32, w: (96, 1, 5, 5) ConvTranspose2d weight, b: (1,)."""
    n, c, h, wd = x.shape
    hout, wout = h + K - 1, wd + K - 1
    wp = wd + 2 * PAD

    # Glue (a real cost, kept explicit): channel-last so C maps to lanes.  At
    # (2,96,8,8) this is a 49 KB relayout; in a real pipeline accept NHWC at the
    # API boundary or fuse it into the producer of x instead.
    x_cl = jnp.transpose(x, (0, 2, 3, 1))                      # (N, H, W, C)

    # Spatially flipped, tap-major weights, pre-broadcast along a Wout sublane
    # axis (25*12*96 f32 ~ 115 KB, DMA'd once) so per-tap weight use inside the
    # kernel is a plain load instead of a broadcast_in_dim.
    wf = jnp.transpose(w[:, 0, ::-1, ::-1], (1, 2, 0))         # (K, K, C) flipped
    wb = jnp.broadcast_to(wf.reshape(K * K, 1, c), (K * K, wout, c))

    kernel = functools.partial(_tconv_relu_kernel, h=h, w=wd,
                               hout=hout, wout=wout)
    out_flat = pl.pallas_call(
        kernel,
        out_shape=jax.ShapeDtypeStruct((n, 1, hout * wout), jnp.float32),
        grid=(n,),
        in_specs=[
            pl.BlockSpec((1, h, wd, c), lambda i: (i, 0, 0, 0)),
            pl.BlockSpec((K * K, wout, c), lambda i: (0, 0, 0)),
            pl.BlockSpec(memory_space=pltpu.MemorySpace.SMEM),
        ],
        out_specs=pl.BlockSpec((1, 1, hout * wout), lambda i: (i, 0, 0)),
        scratch_shapes=[pltpu.VMEM((h, wp, c), jnp.float32)],
        compiler_params=pltpu.CompilerParams(
            dimension_semantics=("parallel",)),
    )(x_cl, wb, b)

    # Lane-dense rows back to NCHW (metadata-only reshape).
    return out_flat.reshape(n, 1, hout, wout)


if __name__ == "__main__":
    key = jax.random.PRNGKey(0)
    kx, kw_key, kb = jax.random.split(key, 3)

    N, C, H, W = 2, 96, 8, 8          # module fixes in_channels = out_ch = 96
    x = jax.random.normal(kx, (N, C, H, W), jnp.float32)

    # Deterministic parameter init (PyTorch-style uniform bound), not a checkpoint.
    fan_in = C * K * K
    bound = 1.0 / (fan_in ** 0.5)
    w = jax.random.uniform(kw_key, (C, 1, K, K), jnp.float32, -bound, bound)
    b = jax.random.uniform(kb, (1,), jnp.float32, -bound, bound)

    out = jax.block_until_ready(client_model2_test_forward(x, w, b))

    # Independent XLA reference for sanity.
    rhs = jnp.transpose(w, (1, 0, 2, 3))[:, :, ::-1, ::-1]      # OIHW, flipped
    ref = lax.conv_general_dilated(
        jnp.maximum(x, 0.0), rhs, (1, 1),
        [(K - 1, K - 1), (K - 1, K - 1)],
        dimension_numbers=("NCHW", "OIHW", "NCHW"))
    ref = jnp.maximum(2.0 * (ref + b.reshape(1, 1, 1, 1)), 0.0)

    assert out.shape == (N, 1, H + K - 1, W + K - 1), out.shape
    assert jnp.allclose(out, ref, atol=1e-4, rtol=1e-4), \
        float(jnp.max(jnp.abs(out - ref)))
    print("KERNEL_OK")
</pallas_src>

<mosaic_0001>
module attributes {stable_mosaic.version = 11 : i64} {
  func.func @_tconv_relu_kernel(%arg0: i32, %arg1: memref<1x8x8x96xf32, #tpu.memory_space<vmem>>, %arg2: memref<25x12x96xf32, #tpu.memory_space<vmem>>, %arg3: memref<1xf32, #tpu.memory_space<smem>>, %arg4: memref<1x1x144xf32, #tpu.memory_space<vmem>>, %arg5: memref<8x16x96xf32, #tpu.memory_space<vmem>>) attributes {dimension_semantics = [#tpu.dimension_semantics<parallel>], iteration_bounds = array<i64: 2>, scalar_prefetch = 0 : i64, scratch_operands = 1 : i64, tpu.core_type = #tpu.core_type<tc>, window_params = [{transform_indices = @transform_0, window_bounds = array<i64: 1, 8, 8, 96>}, {pipeline_mode = #tpu.pipeline_mode<synchronous>, transform_indices = @transform_1, window_bounds = array<i64: 25, 12, 96>}, {transform_indices = @transform_2, window_bounds = array<i64: 1>}, {transform_indices = @transform_3, window_bounds = array<i64: 1, 1, 144>}]} {
    %cst = arith.constant 0.000000e+00 : f32
    %0 = vector.broadcast %cst : f32 to vector<8x16x96xf32>
    %c0 = arith.constant 0 : index
    %c0_0 = arith.constant 0 : index
    %c0_1 = arith.constant 0 : index
    %1 = vector.load %arg5[%c0, %c0_0, %c0_1] : memref<8x16x96xf32, #tpu.memory_space<vmem>>, vector<8x16x96xf32>
    tpu.vector_store %arg5[%c0, %c0_0, %c0_1], %0 {strides = array<i32>} : memref<8x16x96xf32, #tpu.memory_space<vmem>>, vector<8x16x96xf32>,
    %c0_2 = arith.constant 0 : index
    %c0_3 = arith.constant 0 : index
    %c0_4 = arith.constant 0 : index
    %c0_5 = arith.constant 0 : index
    %2 = vector.load %arg1[%c0_2, %c0_3, %c0_4, %c0_5] : memref<1x8x8x96xf32, #tpu.memory_space<vmem>>, vector<1x8x8x96xf32>
    %3 = vector.shape_cast %2 : vector<1x8x8x96xf32> to vector<8x8x96xf32>
    %cst_6 = arith.constant 0.000000e+00 : f32
    %4 = vector.broadcast %cst_6 : f32 to vector<8x8x96xf32>
    %5 = arith.maximumf %3, %4 : vector<8x8x96xf32>
    %c0_7 = arith.constant 0 : index
    %c4 = arith.constant 4 : index
    %c0_8 = arith.constant 0 : index
    %6 = vector.load %arg5[%c0_7, %c4, %c0_8] : memref<8x16x96xf32, #tpu.memory_space<vmem>>, vector<8x8x96xf32>
    tpu.vector_store %arg5[%c0_7, %c4, %c0_8], %5 {strides = array<i32>} : memref<8x16x96xf32, #tpu.memory_space<vmem>>, vector<8x8x96xf32>,
    %cst_9 = arith.constant 0.000000e+00 : f32
    %7 = vector.broadcast %cst_9 : f32 to vector<12x96xf32>
    %cst_10 = arith.constant 0.000000e+00 : f32
    %8 = vector.broadcast %cst_10 : f32 to vector<12x96xf32>
    %cst_11 = arith.constant 0.000000e+00 : f32
    %9 = vector.broadcast %cst_11 : f32 to vector<12x96xf32>
    %cst_12 = arith.constant 0.000000e+00 : f32
    %10 = vector.broadcast %cst_12 : f32 to vector<12x96xf32>
    %cst_13 = arith.constant 0.000000e+00 : f32
    %11 = vector.broadcast %cst_13 : f32 to vector<12x96xf32>
    %cst_14 = arith.constant 0.000000e+00 : f32
    %12 = vector.broadcast %cst_14 : f32 to vector<12x96xf32>
    %cst_15 = arith.constant 0.000000e+00 : f32
    %13 = vector.broadcast %cst_15 : f32 to vector<12x96xf32>
    %cst_16 = arith.constant 0.000000e+00 : f32
    %14 = vector.broadcast %cst_16 : f32 to vector<12x96xf32>
    %cst_17 = arith.constant 0.000000e+00 : f32
    %15 = vector.broadcast %cst_17 : f32 to vector<12x96xf32>
    %cst_18 = arith.constant 0.000000e+00 : f32
    %16 = vector.broadcast %cst_18 : f32 to vector<12x96xf32>
    %cst_19 = arith.constant 0.000000e+00 : f32
    %17 = vector.broadcast %cst_19 : f32 to vector<12x96xf32>
    %cst_20 = arith.constant 0.000000e+00 : f32
    %18 = vector.broadcast %cst_20 : f32 to vector<12x96xf32>
    %c0_21 = arith.constant 0 : index
    %c0_22 = arith.constant 0 : index
    %c0_23 = arith.constant 0 : index
    %19 = vector.load %arg2[%c0_21, %c0_22, %c0_23] : memref<25x12x96xf32, #tpu.memory_space<vmem>>, vector<1x12x96xf32>
    %20 = vector.shape_cast %19 : vector<1x12x96xf32> to vector<12x96xf32>
    %c5 = arith.constant 5 : index
    %c0_24 = arith.constant 0 : index
    %c0_25 = arith.constant 0 : index
    %21 = vector.load %arg2[%c5, %c0_24, %c0_25] : memref<25x12x96xf32, #tpu.memory_space<vmem>>, vector<1x12x96xf32>
    %22 = vector.shape_cast %21 : vector<1x12x96xf32> to vector<12x96xf32>
    %c10 = arith.constant 10 : index
    %c0_26 = arith.constant 0 : index
    %c0_27 = arith.constant 0 : index
    %23 = vector.load %arg2[%c10, %c0_26, %c0_27] : memref<25x12x96xf32, #tpu.memory_space<vmem>>, vector<1x12x96xf32>
    %24 = vector.shape_cast %23 : vector<1x12x96xf32> to vector<12x96xf32>
    %c15 = arith.constant 15 : index
    %c0_28 = arith.constant 0 : index
    %c0_29 = arith.constant 0 : index
    %25 = vector.load %arg2[%c15, %c0_28, %c0_29] : memref<25x12x96xf32, #tpu.memory_space<vmem>>, vector<1x12x96xf32>
    %26 = vector.shape_cast %25 : vector<1x12x96xf32> to vector<12x96xf32>
    %c20 = arith.constant 20 : index
    %c0_30 = arith.constant 0 : index
    %c0_31 = arith.constant 0 : index
    %27 = vector.load %arg2[%c20, %c0_30, %c0_31] : memref<25x12x96xf32, #tpu.memory_space<vmem>>, vector<1x12x96xf32>
    %28 = vector.shape_cast %27 : vector<1x12x96xf32> to vector<12x96xf32>
    %c0_32 = arith.constant 0 : index
    %c0_33 = arith.constant 0 : index
    %c0_34 = arith.constant 0 : index
    %29 = vector.load %arg5[%c0_32, %c0_33, %c0_34] : memref<8x16x96xf32, #tpu.memory_space<vmem>>, vector<1x12x96xf32>
    %30 = vector.shape_cast %29 : vector<1x12x96xf32> to vector<12x96xf32>
    %31 = arith.mulf %30, %20 : vector<12x96xf32>
    %32 = arith.addf %11, %31 : vector<12x96xf32>
    %33 = arith.mulf %30, %22 : vector<12x96xf32>
    %34 = arith.addf %10, %33 : vector<12x96xf32>
    %35 = arith.mulf %30, %24 : vector<12x96xf32>
    %36 = arith.addf %9, %35 : vector<12x96xf32>
    %37 = arith.mulf %30, %26 : vector<12x96xf32>
    %38 = arith.addf %8, %37 : vector<12x96xf32>
    %39 = arith.mulf %30, %28 : vector<12x96xf32>
    %40 = arith.addf %7, %39 : vector<12x96xf32>
    %c1 = arith.constant 1 : index
    %c0_35 = arith.constant 0 : index
    %c0_36 = arith.constant 0 : index
    %41 = vector.load %arg5[%c1, %c0_35, %c0_36] : memref<8x16x96xf32, #tpu.memory_space<vmem>>, vector<1x12x96xf32>
    %42 = vector.shape_cast %41 : vector<1x12x96xf32> to vector<12x96xf32>
    %43 = arith.mulf %42, %20 : vector<12x96xf32>
    %44 = arith.addf %12, %43 : vector<12x96xf32>
    %45 = arith.mulf %42, %22 : vector<12x96xf32>
    %46 = arith.addf %32, %45 : vector<12x96xf32>
    %47 = arith.mulf %42, %24 : vector<12x96xf32>
    %48 = arith.addf %34, %47 : vector<12x96xf32>
    %49 = arith.mulf %42, %26 : vector<12x96xf32>
    %50 = arith.addf %36, %49 : vector<12x96xf32>
    %51 = arith.mulf %42, %28 : vector<12x96xf32>
    %52 = arith.addf %38, %51 : vector<12x96xf32>
    %c2 = arith.constant 2 : index
    %c0_37 = arith.constant 0 : index
    %c0_38 = arith.constant 0 : index
    %53 = vector.load %arg5[%c2, %c0_37, %c0_38] : memref<8x16x96xf32, #tpu.memory_space<vmem>>, vector<1x12x96xf32>
    %54 = vector.shape_cast %53 : vector<1x12x96xf32> to vector<12x96xf32>
    %55 = arith.mulf %54, %20 : vector<12x96xf32>
    %56 = arith.addf %13, %55 : vector<12x96xf32>
    %57 = arith.mulf %54, %22 : vector<12x96xf32>
    %58 = arith.addf %44, %57 : vector<12x96xf32>
    %59 = arith.mulf %54, %24 : vector<12x96xf32>
    %60 = arith.addf %46, %59 : vector<12x96xf32>
    %61 = arith.mulf %54, %26 : vector<12x96xf32>
    %62 = arith.addf %48, %61 : vector<12x96xf32>
    %63 = arith.mulf %54, %28 : vector<12x96xf32>
    %64 = arith.addf %50, %63 : vector<12x96xf32>
    %c3 = arith.constant 3 : index
    %c0_39 = arith.constant 0 : index
    %c0_40 = arith.constant 0 : index
    %65 = vector.load %arg5[%c3, %c0_39, %c0_40] : memref<8x16x96xf32, #tpu.memory_space<vmem>>, vector<1x12x96xf32>
    %66 = vector.shape_cast %65 : vector<1x12x96xf32> to vector<12x96xf32>
    %67 = arith.mulf %66, %20 : vector<12x96xf32>
    %68 = arith.addf %14, %67 : vector<12x96xf32>
    %69 = arith.mulf %66, %22 : vector<12x96xf32>
    %70 = arith.addf %56, %69 : vector<12x96xf32>
    %71 = arith.mulf %66, %24 : vector<12x96xf32>
    %72 = arith.addf %58, %71 : vector<12x96xf32>
    %73 = arith.mulf %66, %26 : vector<12x96xf32>
    %74 = arith.addf %60, %73 : vector<12x96xf32>
    %75 = arith.mulf %66, %28 : vector<12x96xf32>
    %76 = arith.addf %62, %75 : vector<12x96xf32>
    %c4_41 = arith.constant 4 : index
    %c0_42 = arith.constant 0 : index
    %c0_43 = arith.constant 0 : index
    %77 = vector.load %arg5[%c4_41, %c0_42, %c0_43] : memref<8x16x96xf32, #tpu.memory_space<vmem>>, vector<1x12x96xf32>
    %78 = vector.shape_cast %77 : vector<1x12x96xf32> to vector<12x96xf32>
    %79 = arith.mulf %78, %20 : vector<12x96xf32>
    %80 = arith.addf %15, %79 : vector<12x96xf32>
    %81 = arith.mulf %78, %22 : vector<12x96xf32>
    %82 = arith.addf %68, %81 : vector<12x96xf32>
    %83 = arith.mulf %78, %24 : vector<12x96xf32>
    %84 = arith.addf %70, %83 : vector<12x96xf32>
    %85 = arith.mulf %78, %26 : vector<12x96xf32>
    %86 = arith.addf %72, %85 : vector<12x96xf32>
    %87 = arith.mulf %78, %28 : vector<12x96xf32>
    %88 = arith.addf %74, %87 : vector<12x96xf32>
    %c5_44 = arith.constant 5 : index
    %c0_45 = arith.constant 0 : index
    %c0_46 = arith.constant 0 : index
    %89 = vector.load %arg5[%c5_44, %c0_45, %c0_46] : memref<8x16x96xf32, #tpu.memory_space<vmem>>, vector<1x12x96xf32>
    %90 = vector.shape_cast %89 : vector<1x12x96xf32> to vector<12x96xf32>
    %91 = arith.mulf %90, %20 : vector<12x96xf32>
    %92 = arith.addf %16, %91 : vector<12x96xf32>
    %93 = arith.mulf %90, %22 : vector<12x96xf32>
    %94 = arith.addf %80, %93 : vector<12x96xf32>
    %95 = arith.mulf %90, %24 : vector<12x96xf32>
    %96 = arith.addf %82, %95 : vector<12x96xf32>
    %97 = arith.mulf %90, %26 : vector<12x96xf32>
    %98 = arith.addf %84, %97 : vector<12x96xf32>
    %99 = arith.mulf %90, %28 : vector<12x96xf32>
    %100 = arith.addf %86, %99 : vector<12x96xf32>
    %c6 = arith.constant 6 : index
    %c0_47 = arith.constant 0 : index
    %c0_48 = arith.constant 0 : index
    %101 = vector.load %arg5[%c6, %c0_47, %c0_48] : memref<8x16x96xf32, #tpu.memory_space<vmem>>, vector<1x12x96xf32>
    %102 = vector.shape_cast %101 : vector<1x12x96xf32> to vector<12x96xf32>
    %103 = arith.mulf %102, %20 : vector<12x96xf32>
    %104 = arith.addf %17, %103 : vector<12x96xf32>
    %105 = arith.mulf %102, %22 : vector<12x96xf32>
    %106 = arith.addf %92, %105 : vector<12x96xf32>
    %107 = arith.mulf %102, %24 : vector<12x96xf32>
    %108 = arith.addf %94, %107 : vector<12x96xf32>
    %109 = arith.mulf %102, %26 : vector<12x96xf32>
    %110 = arith.addf %96, %109 : vector<12x96xf32>
    %111 = arith.mulf %102, %28 : vector<12x96xf32>
    %112 = arith.addf %98, %111 : vector<12x96xf32>
    %c7 = arith.constant 7 : index
    %c0_49 = arith.constant 0 : index
    %c0_50 = arith.constant 0 : index
    %113 = vector.load %arg5[%c7, %c0_49, %c0_50] : memref<8x16x96xf32, #tpu.memory_space<vmem>>, vector<1x12x96xf32>
    %114 = vector.shape_cast %113 : vector<1x12x96xf32> to vector<12x96xf32>
    %115 = arith.mulf %114, %20 : vector<12x96xf32>
    %116 = arith.addf %18, %115 : vector<12x96xf32>
    %117 = arith.mulf %114, %22 : vector<12x96xf32>
    %118 = arith.addf %104, %117 : vector<12x96xf32>
    %119 = arith.mulf %114, %24 : vector<12x96xf32>
    %120 = arith.addf %106, %119 : vector<12x96xf32>
    %121 = arith.mulf %114, %26 : vector<12x96xf32>
    %122 = arith.addf %108, %121 : vector<12x96xf32>
    %123 = arith.mulf %114, %28 : vector<12x96xf32>
    %124 = arith.addf %110, %123 : vector<12x96xf32>
    %c1_51 = arith.constant 1 : index
    %c0_52 = arith.constant 0 : index
    %c0_53 = arith.constant 0 : index
    %125 = vector.load %arg2[%c1_51, %c0_52, %c0_53] : memref<25x12x96xf32, #tpu.memory_space<vmem>>, vector<1x12x96xf32>
    %126 = vector.shape_cast %125 : vector<1x12x96xf32> to vector<12x96xf32>
    %c6_54 = arith.constant 6 : index
    %c0_55 = arith.constant 0 : index
    %c0_56 = arith.constant 0 : index
    %127 = vector.load %arg2[%c6_54, %c0_55, %c0_56] : memref<25x12x96xf32, #tpu.memory_space<vmem>>, vector<1x12x96xf32>
    %128 = vector.shape_cast %127 : vector<1x12x96xf32> to vector<12x96xf32>
    %c11 = arith.constant 11 : index
    %c0_57 = arith.constant 0 : index
    %c0_58 = arith.constant 0 : index
    %129 = vector.load %arg2[%c11, %c0_57, %c0_58] : memref<25x12x96xf32, #tpu.memory_space<vmem>>, vector<1x12x96xf32>
    %130 = vector.shape_cast %129 : vector<1x12x96xf32> to vector<12x96xf32>
    %c16 = arith.constant 16 : index
    %c0_59 = arith.constant 0 : index
    %c0_60 = arith.constant 0 : index
    %131 = vector.load %arg2[%c16, %c0_59, %c0_60] : memref<25x12x96xf32, #tpu.memory_space<vmem>>, vector<1x12x96xf32>
    %132 = vector.shape_cast %131 : vector<1x12x96xf32> to vector<12x96xf32>
    %c21 = arith.constant 21 : index
    %c0_61 = arith.constant 0 : index
    %c0_62 = arith.constant 0 : index
    %133 = vector.load %arg2[%c21, %c0_61, %c0_62] : memref<25x12x96xf32, #tpu.memory_space<vmem>>, vector<1x12x96xf32>
    %134 = vector.shape_cast %133 : vector<1x12x96xf32> to vector<12x96xf32>
    %c0_63 = arith.constant 0 : index
    %c1_64 = arith.constant 1 : index
    %c0_65 = arith.constant 0 : index
    %135 = vector.load %arg5[%c0_63, %c1_64, %c0_65] : memref<8x16x96xf32, #tpu.memory_space<vmem>>, vector<1x12x96xf32>
    %136 = vector.shape_cast %135 : vector<1x12x96xf32> to vector<12x96xf32>
    %137 = arith.mulf %136, %126 : vector<12x96xf32>
    %138 = arith.addf %88, %137 : vector<12x96xf32>
    %139 = arith.mulf %136, %128 : vector<12x96xf32>
    %140 = arith.addf %76, %139 : vector<12x96xf32>
    %141 = arith.mulf %136, %130 : vector<12x96xf32>
    %142 = arith.addf %64, %141 : vector<12x96xf32>
    %143 = arith.mulf %136, %132 : vector<12x96xf32>
    %144 = arith.addf %52, %143 : vector<12x96xf32>
    %145 = arith.mulf %136, %134 : vector<12x96xf32>
    %146 = arith.addf %40, %145 : vector<12x96xf32>
    %c1_66 = arith.constant 1 : index
    %c1_67 = arith.constant 1 : index
    %c0_68 = arith.constant 0 : index
    %147 = vector.load %arg5[%c1_66, %c1_67, %c0_68] : memref<8x16x96xf32, #tpu.memory_space<vmem>>, vector<1x12x96xf32>
    %148 = vector.shape_cast %147 : vector<1x12x96xf32> to vector<12x96xf32>
    %149 = arith.mulf %148, %126 : vector<12x96xf32>
    %150 = arith.addf %100, %149 : vector<12x96xf32>
    %151 = arith.mulf %148, %128 : vector<12x96xf32>
    %152 = arith.addf %138, %151 : vector<12x96xf32>
    %153 = arith.mulf %148, %130 : vector<12x96xf32>
    %154 = arith.addf %140, %153 : vector<12x96xf32>
    %155 = arith.mulf %148, %132 : vector<12x96xf32>
    %156 = arith.addf %142, %155 : vector<12x96xf32>
    %157 = arith.mulf %148, %134 : vector<12x96xf32>
    %158 = arith.addf %144, %157 : vector<12x96xf32>
    %c2_69 = arith.constant 2 : index
    %c1_70 = arith.constant 1 : index
    %c0_71 = arith.constant 0 : index
    %159 = vector.load %arg5[%c2_69, %c1_70, %c0_71] : memref<8x16x96xf32, #tpu.memory_space<vmem>>, vector<1x12x96xf32>
    %160 = vector.shape_cast %159 : vector<1x12x96xf32> to vector<12x96xf32>
    %161 = arith.mulf %160, %126 : vector<12x96xf32>
    %162 = arith.addf %112, %161 : vector<12x96xf32>
    %163 = arith.mulf %160, %128 : vector<12x96xf32>
    %164 = arith.addf %150, %163 : vector<12x96xf32>
    %165 = arith.mulf %160, %130 : vector<12x96xf32>
    %166 = arith.addf %152, %165 : vector<12x96xf32>
    %167 = arith.mulf %160, %132 : vector<12x96xf32>
    %168 = arith.addf %154, %167 : vector<12x96xf32>
    %169 = arith.mulf %160, %134 : vector<12x96xf32>
    %170 = arith.addf %156, %169 : vector<12x96xf32>
    %c3_72 = arith.constant 3 : index
    %c1_73 = arith.constant 1 : index
    %c0_74 = arith.constant 0 : index
    %171 = vector.load %arg5[%c3_72, %c1_73, %c0_74] : memref<8x16x96xf32, #tpu.memory_space<vmem>>, vector<1x12x96xf32>
    %172 = vector.shape_cast %171 : vector<1x12x96xf32> to vector<12x96xf32>
    %173 = arith.mulf %172, %126 : vector<12x96xf32>
    %174 = arith.addf %124, %173 : vector<12x96xf32>
    %175 = arith.mulf %172, %128 : vector<12x96xf32>
    %176 = arith.addf %162, %175 : vector<12x96xf32>
    %177 = arith.mulf %172, %130 : vector<12x96xf32>
    %178 = arith.addf %164, %177 : vector<12x96xf32>
    %179 = arith.mulf %172, %132 : vector<12x96xf32>
    %180 = arith.addf %166, %179 : vector<12x96xf32>
    %181 = arith.mulf %172, %134 : vector<12x96xf32>
    %182 = arith.addf %168, %181 : vector<12x96xf32>
    %c4_75 = arith.constant 4 : index
    %c1_76 = arith.constant 1 : index
    %c0_77 = arith.constant 0 : index
    %183 = vector.load %arg5[%c4_75, %c1_76, %c0_77] : memref<8x16x96xf32, #tpu.memory_space<vmem>>, vector<1x12x96xf32>
    %184 = vector.shape_cast %183 : vector<1x12x96xf32> to vector<12x96xf32>
    %185 = arith.mulf %184, %126 : vector<12x96xf32>
    %186 = arith.addf %122, %185 : vector<12x96xf32>
    %187 = arith.mulf %184, %128 : vector<12x96xf32>
    %188 = arith.addf %174, %187 : vector<12x96xf32>
    %189 = arith.mulf %184, %130 : vector<12x96xf32>
    %190 = arith.addf %176, %189 : vector<12x96xf32>
    %191 = arith.mulf %184, %132 : vector<12x96xf32>
    %192 = arith.addf %178, %191 : vector<12x96xf32>
    %193 = arith.mulf %184, %134 : vector<12x96xf32>
    %194 = arith.addf %180, %193 : vector<12x96xf32>
    %c5_78 = arith.constant 5 : index
    %c1_79 = arith.constant 1 : index
    %c0_80 = arith.constant 0 : index
    %195 = vector.load %arg5[%c5_78, %c1_79, %c0_80] : memref<8x16x96xf32, #tpu.memory_space<vmem>>, vector<1x12x96xf32>
    %196 = vector.shape_cast %195 : vector<1x12x96xf32> to vector<12x96xf32>
    %197 = arith.mulf %196, %126 : vector<12x96xf32>
    %198 = arith.addf %120, %197 : vector<12x96xf32>
    %199 = arith.mulf %196, %128 : vector<12x96xf32>
    %200 = arith.addf %186, %199 : vector<12x96xf32>
    %201 = arith.mulf %196, %130 : vector<12x96xf32>
    %202 = arith.addf %188, %201 : vector<12x96xf32>
    %203 = arith.mulf %196, %132 : vector<12x96xf32>
    %204 = arith.addf %190, %203 : vector<12x96xf32>
    %205 = arith.mulf %196, %134 : vector<12x96xf32>
    %206 = arith.addf %192, %205 : vector<12x96xf32>
    %c6_81 = arith.constant 6 : index
    %c1_82 = arith.constant 1 : index
    %c0_83 = arith.constant 0 : index
    %207 = vector.load %arg5[%c6_81, %c1_82, %c0_83] : memref<8x16x96xf32, #tpu.memory_space<vmem>>, vector<1x12x96xf32>
    %208 = vector.shape_cast %207 : vector<1x12x96xf32> to vector<12x96xf32>
    %209 = arith.mulf %208, %126 : vector<12x96xf32>
    %210 = arith.addf %118, %209 : vector<12x96xf32>
    %211 = arith.mulf %208, %128 : vector<12x96xf32>
    %212 = arith.addf %198, %211 : vector<12x96xf32>
    %213 = arith.mulf %208, %130 : vector<12x96xf32>
    %214 = arith.addf %200, %213 : vector<12x96xf32>
    %215 = arith.mulf %208, %132 : vector<12x96xf32>
    %216 = arith.addf %202, %215 : vector<12x96xf32>
    %217 = arith.mulf %208, %134 : vector<12x96xf32>
    %218 = arith.addf %204, %217 : vector<12x96xf32>
    %c7_84 = arith.constant 7 : index
    %c1_85 = arith.constant 1 : index
    %c0_86 = arith.constant 0 : index
    %219 = vector.load %arg5[%c7_84, %c1_85, %c0_86] : memref<8x16x96xf32, #tpu.memory_space<vmem>>, vector<1x12x96xf32>
    %220 = vector.shape_cast %219 : vector<1x12x96xf32> to vector<12x96xf32>
    %221 = arith.mulf %220, %126 : vector<12x96xf32>
    %222 = arith.addf %116, %221 : vector<12x96xf32>
    %223 = arith.mulf %220, %128 : vector<12x96xf32>
    %224 = arith.addf %210, %223 : vector<12x96xf32>
    %225 = arith.mulf %220, %130 : vector<12x96xf32>
    %226 = arith.addf %212, %225 : vector<12x96xf32>
    %227 = arith.mulf %220, %132 : vector<12x96xf32>
    %228 = arith.addf %214, %227 : vector<12x96xf32>
    %229 = arith.mulf %220, %134 : vector<12x96xf32>
    %230 = arith.addf %216, %229 : vector<12x96xf32>
    %c2_87 = arith.constant 2 : index
    %c0_88 = arith.constant 0 : index
    %c0_89 = arith.constant 0 : index
    %231 = vector.load %arg2[%c2_87, %c0_88, %c0_89] : memref<25x12x96xf32, #tpu.memory_space<vmem>>, vector<1x12x96xf32>
    %232 = vector.shape_cast %231 : vector<1x12x96xf32> to vector<12x96xf32>
    %c7_90 = arith.constant 7 : index
    %c0_91 = arith.constant 0 : index
    %c0_92 = arith.constant 0 : index
    %233 = vector.load %arg2[%c7_90, %c0_91, %c0_92] : memref<25x12x96xf32, #tpu.memory_space<vmem>>, vector<1x12x96xf32>
    %234 = vector.shape_cast %233 : vector<1x12x96xf32> to vector<12x96xf32>
    %c12 = arith.constant 12 : index
    %c0_93 = arith.constant 0 : index
    %c0_94 = arith.constant 0 : index
    %235 = vector.load %arg2[%c12, %c0_93, %c0_94] : memref<25x12x96xf32, #tpu.memory_space<vmem>>, vector<1x12x96xf32>
    %236 = vector.shape_cast %235 : vector<1x12x96xf32> to vector<12x96xf32>
    %c17 = arith.constant 17 : index
    %c0_95 = arith.constant 0 : index
    %c0_96 = arith.constant 0 : index
    %237 = vector.load %arg2[%c17, %c0_95, %c0_96] : memref<25x12x96xf32, #tpu.memory_space<vmem>>, vector<1x12x96xf32>
    %238 = vector.shape_cast %237 : vector<1x12x96xf32> to vector<12x96xf32>
    %c22 = arith.constant 22 : index
    %c0_97 = arith.constant 0 : index
    %c0_98 = arith.constant 0 : index
    %239 = vector.load %arg2[%c22, %c0_97, %c0_98] : memref<25x12x96xf32, #tpu.memory_space<vmem>>, vector<1x12x96xf32>
    %240 = vector.shape_cast %239 : vector<1x12x96xf32> to vector<12x96xf32>
    %c0_99 = arith.constant 0 : index
    %c2_100 = arith.constant 2 : index
    %c0_101 = arith.constant 0 : index
    %241 = vector.load %arg5[%c0_99, %c2_100, %c0_101] : memref<8x16x96xf32, #tpu.memory_space<vmem>>, vector<1x12x96xf32>
    %242 = vector.shape_cast %241 : vector<1x12x96xf32> to vector<12x96xf32>
    %243 = arith.mulf %242, %232 : vector<12x96xf32>
    %244 = arith.addf %194, %243 : vector<12x96xf32>
    %245 = arith.mulf %242, %234 : vector<12x96xf32>
    %246 = arith.addf %182, %245 : vector<12x96xf32>
    %247 = arith.mulf %242, %236 : vector<12x96xf32>
    %248 = arith.addf %170, %247 : vector<12x96xf32>
    %249 = arith.mulf %242, %238 : vector<12x96xf32>
    %250 = arith.addf %158, %249 : vector<12x96xf32>
    %251 = arith.mulf %242, %240 : vector<12x96xf32>
    %252 = arith.addf %146, %251 : vector<12x96xf32>
    %c1_102 = arith.constant 1 : index
    %c2_103 = arith.constant 2 : index
    %c0_104 = arith.constant 0 : index
    %253 = vector.load %arg5[%c1_102, %c2_103, %c0_104] : memref<8x16x96xf32, #tpu.memory_space<vmem>>, vector<1x12x96xf32>
    %254 = vector.shape_cast %253 : vector<1x12x96xf32> to vector<12x96xf32>
    %255 = arith.mulf %254, %232 : vector<12x96xf32>
    %256 = arith.addf %206, %255 : vector<12x96xf32>
    %257 = arith.mulf %254, %234 : vector<12x96xf32>
    %258 = arith.addf %244, %257 : vector<12x96xf32>
    %259 = arith.mulf %254, %236 : vector<12x96xf32>
    %260 = arith.addf %246, %259 : vector<12x96xf32>
    %261 = arith.mulf %254, %238 : vector<12x96xf32>
    %262 = arith.addf %248, %261 : vector<12x96xf32>
    %263 = arith.mulf %254, %240 : vector<12x96xf32>
    %264 = arith.addf %250, %263 : vector<12x96xf32>
    %c2_105 = arith.constant 2 : index
    %c2_106 = arith.constant 2 : index
    %c0_107 = arith.constant 0 : index
    %265 = vector.load %arg5[%c2_105, %c2_106, %c0_107] : memref<8x16x96xf32, #tpu.memory_space<vmem>>, vector<1x12x96xf32>
    %266 = vector.shape_cast %265 : vector<1x12x96xf32> to vector<12x96xf32>
    %267 = arith.mulf %266, %232 : vector<12x96xf32>
    %268 = arith.addf %218, %267 : vector<12x96xf32>
    %269 = arith.mulf %266, %234 : vector<12x96xf32>
    %270 = arith.addf %256, %269 : vector<12x96xf32>
    %271 = arith.mulf %266, %236 : vector<12x96xf32>
    %272 = arith.addf %258, %271 : vector<12x96xf32>
    %273 = arith.mulf %266, %238 : vector<12x96xf32>
    %274 = arith.addf %260, %273 : vector<12x96xf32>
    %275 = arith.mulf %266, %240 : vector<12x96xf32>
    %276 = arith.addf %262, %275 : vector<12x96xf32>
    %c3_108 = arith.constant 3 : index
    %c2_109 = arith.constant 2 : index
    %c0_110 = arith.constant 0 : index
    %277 = vector.load %arg5[%c3_108, %c2_109, %c0_110] : memref<8x16x96xf32, #tpu.memory_space<vmem>>, vector<1x12x96xf32>
    %278 = vector.shape_cast %277 : vector<1x12x96xf32> to vector<12x96xf32>
    %279 = arith.mulf %278, %232 : vector<12x96xf32>
    %280 = arith.addf %230, %279 : vector<12x96xf32>
    %281 = arith.mulf %278, %234 : vector<12x96xf32>
    %282 = arith.addf %268, %281 : vector<12x96xf32>
    %283 = arith.mulf %278, %236 : vector<12x96xf32>
    %284 = arith.addf %270, %283 : vector<12x96xf32>
    %285 = arith.mulf %278, %238 : vector<12x96xf32>
    %286 = arith.addf %272, %285 : vector<12x96xf32>
    %287 = arith.mulf %278, %240 : vector<12x96xf32>
    %288 = arith.addf %274, %287 : vector<12x96xf32>
    %c4_111 = arith.constant 4 : index
    %c2_112 = arith.constant 2 : index
    %c0_113 = arith.constant 0 : index
    %289 = vector.load %arg5[%c4_111, %c2_112, %c0_113] : memref<8x16x96xf32, #tpu.memory_space<vmem>>, vector<1x12x96xf32>
    %290 = vector.shape_cast %289 : vector<1x12x96xf32> to vector<12x96xf32>
    %291 = arith.mulf %290, %232 : vector<12x96xf32>
    %292 = arith.addf %228, %291 : vector<12x96xf32>
    %293 = arith.mulf %290, %234 : vector<12x96xf32>
    %294 = arith.addf %280, %293 : vector<12x96xf32>
    %295 = arith.mulf %290, %236 : vector<12x96xf32>
    %296 = arith.addf %282, %295 : vector<12x96xf32>
    %297 = arith.mulf %290, %238 : vector<12x96xf32>
    %298 = arith.addf %284, %297 : vector<12x96xf32>
    %299 = arith.mulf %290, %240 : vector<12x96xf32>
    %300 = arith.addf %286, %299 : vector<12x96xf32>
    %c5_114 = arith.constant 5 : index
    %c2_115 = arith.constant 2 : index
    %c0_116 = arith.constant 0 : index
    %301 = vector.load %arg5[%c5_114, %c2_115, %c0_116] : memref<8x16x96xf32, #tpu.memory_space<vmem>>, vector<1x12x96xf32>
    %302 = vector.shape_cast %301 : vector<1x12x96xf32> to vector<12x96xf32>
    %303 = arith.mulf %302, %232 : vector<12x96xf32>
    %304 = arith.addf %226, %303 : vector<12x96xf32>
    %305 = arith.mulf %302, %234 : vector<12x96xf32>
    %306 = arith.addf %292, %305 : vector<12x96xf32>
    %307 = arith.mulf %302, %236 : vector<12x96xf32>
    %308 = arith.addf %294, %307 : vector<12x96xf32>
    %309 = arith.mulf %302, %238 : vector<12x96xf32>
    %310 = arith.addf %296, %309 : vector<12x96xf32>
    %311 = arith.mulf %302, %240 : vector<12x96xf32>
    %312 = arith.addf %298, %311 : vector<12x96xf32>
    %c6_117 = arith.constant 6 : index
    %c2_118 = arith.constant 2 : index
    %c0_119 = arith.constant 0 : index
    %313 = vector.load %arg5[%c6_117, %c2_118, %c0_119] : memref<8x16x96xf32, #tpu.memory_space<vmem>>, vector<1x12x96xf32>
    %314 = vector.shape_cast %313 : vector<1x12x96xf32> to vector<12x96xf32>
    %315 = arith.mulf %314, %232 : vector<12x96xf32>
    %316 = arith.addf %224, %315 : vector<12x96xf32>
    %317 = arith.mulf %314, %234 : vector<12x96xf32>
    %318 = arith.addf %304, %317 : vector<12x96xf32>
    %319 = arith.mulf %314, %236 : vector<12x96xf32>
    %320 = arith.addf %306, %319 : vector<12x96xf32>
    %321 = arith.mulf %314, %238 : vector<12x96xf32>
    %322 = arith.addf %308, %321 : vector<12x96xf32>
    %323 = arith.mulf %314, %240 : vector<12x96xf32>
    %324 = arith.addf %310, %323 : vector<12x96xf32>
    %c7_120 = arith.constant 7 : index
    %c2_121 = arith.constant 2 : index
    %c0_122 = arith.constant 0 : index
    %325 = vector.load %arg5[%c7_120, %c2_121, %c0_122] : memref<8x16x96xf32, #tpu.memory_space<vmem>>, vector<1x12x96xf32>
    %326 = vector.shape_cast %325 : vector<1x12x96xf32> to vector<12x96xf32>
    %327 = arith.mulf %326, %232 : vector<12x96xf32>
    %328 = arith.addf %222, %327 : vector<12x96xf32>
    %329 = arith.mulf %326, %234 : vector<12x96xf32>
    %330 = arith.addf %316, %329 : vector<12x96xf32>
    %331 = arith.mulf %326, %236 : vector<12x96xf32>
    %332 = arith.addf %318, %331 : vector<12x96xf32>
    %333 = arith.mulf %326, %238 : vector<12x96xf32>
    %334 = arith.addf %320, %333 : vector<12x96xf32>
    %335 = arith.mulf %326, %240 : vector<12x96xf32>
    %336 = arith.addf %322, %335 : vector<12x96xf32>
    %c3_123 = arith.constant 3 : index
    %c0_124 = arith.constant 0 : index
    %c0_125 = arith.constant 0 : index
    %337 = vector.load %arg2[%c3_123, %c0_124, %c0_125] : memref<25x12x96xf32, #tpu.memory_space<vmem>>, vector<1x12x96xf32>
    %338 = vector.shape_cast %337 : vector<1x12x96xf32> to vector<12x96xf32>
    %c8 = arith.constant 8 : index
    %c0_126 = arith.constant 0 : index
    %c0_127 = arith.constant 0 : index
    %339 = vector.load %arg2[%c8, %c0_126, %c0_127] : memref<25x12x96xf32, #tpu.memory_space<vmem>>, vector<1x12x96xf32>
    %340 = vector.shape_cast %339 : vector<1x12x96xf32> to vector<12x96xf32>
    %c13 = arith.constant 13 : index
    %c0_128 = arith.constant 0 : index
    %c0_129 = arith.constant 0 : index
    %341 = vector.load %arg2[%c13, %c0_128, %c0_129] : memref<25x12x96xf32, #tpu.memory_space<vmem>>, vector<1x12x96xf32>
    %342 = vector.shape_cast %341 : vector<1x12x96xf32> to vector<12x96xf32>
    %c18 = arith.constant 18 : index
    %c0_130 = arith.constant 0 : index
    %c0_131 = arith.constant 0 : index
    %343 = vector.load %arg2[%c18, %c0_130, %c0_131] : memref<25x12x96xf32, #tpu.memory_space<vmem>>, vector<1x12x96xf32>
    %344 = vector.shape_cast %343 : vector<1x12x96xf32> to vector<12x96xf32>
    %c23 = arith.constant 23 : index
    %c0_132 = arith.constant 0 : index
    %c0_133 = arith.constant 0 : index
    %345 = vector.load %arg2[%c23, %c0_132, %c0_133] : memref<25x12x96xf32, #tpu.memory_space<vmem>>, vector<1x12x96xf32>
    %346 = vector.shape_cast %345 : vector<1x12x96xf32> to vector<12x96xf32>
    %c0_134 = arith.constant 0 : index
    %c3_135 = arith.constant 3 : index
    %c0_136 = arith.constant 0 : index
    %347 = vector.load %arg5[%c0_134, %c3_135, %c0_136] : memref<8x16x96xf32, #tpu.memory_space<vmem>>, vector<1x12x96xf32>
    %348 = vector.shape_cast %347 : vector<1x12x96xf32> to vector<12x96xf32>
    %349 = arith.mulf %348, %338 : vector<12x96xf32>
    %350 = arith.addf %300, %349 : vector<12x96xf32>
    %351 = arith.mulf %348, %340 : vector<12x96xf32>
    %352 = arith.addf %288, %351 : vector<12x96xf32>
    %353 = arith.mulf %348, %342 : vector<12x96xf32>
    %354 = arith.addf %276, %353 : vector<12x96xf32>
    %355 = arith.mulf %348, %344 : vector<12x96xf32>
    %356 = arith.addf %264, %355 : vector<12x96xf32>
    %357 = arith.mulf %348, %346 : vector<12x96xf32>
    %358 = arith.addf %252, %357 : vector<12x96xf32>
    %c1_137 = arith.constant 1 : index
    %c3_138 = arith.constant 3 : index
    %c0_139 = arith.constant 0 : index
    %359 = vector.load %arg5[%c1_137, %c3_138, %c0_139] : memref<8x16x96xf32, #tpu.memory_space<vmem>>, vector<1x12x96xf32>
    %360 = vector.shape_cast %359 : vector<1x12x96xf32> to vector<12x96xf32>
    %361 = arith.mulf %360, %338 : vector<12x96xf32>
    %362 = arith.addf %312, %361 : vector<12x96xf32>
    %363 = arith.mulf %360, %340 : vector<12x96xf32>
    %364 = arith.addf %350, %363 : vector<12x96xf32>
    %365 = arith.mulf %360, %342 : vector<12x96xf32>
    %366 = arith.addf %352, %365 : vector<12x96xf32>
    %367 = arith.mulf %360, %344 : vector<12x96xf32>
    %368 = arith.addf %354, %367 : vector<12x96xf32>
    %369 = arith.mulf %360, %346 : vector<12x96xf32>
    %370 = arith.addf %356, %369 : vector<12x96xf32>
    %c2_140 = arith.constant 2 : index
    %c3_141 = arith.constant 3 : index
    %c0_142 = arith.constant 0 : index
    %371 = vector.load %arg5[%c2_140, %c3_141, %c0_142] : memref<8x16x96xf32, #tpu.memory_space<vmem>>, vector<1x12x96xf32>
    %372 = vector.shape_cast %371 : vector<1x12x96xf32> to vector<12x96xf32>
    %373 = arith.mulf %372, %338 : vector<12x96xf32>
    %374 = arith.addf %324, %373 : vector<12x96xf32>
    %375 = arith.mulf %372, %340 : vector<12x96xf32>
    %376 = arith.addf %362, %375 : vector<12x96xf32>
    %377 = arith.mulf %372, %342 : vector<12x96xf32>
    %378 = arith.addf %364, %377 : vector<12x96xf32>
    %379 = arith.mulf %372, %344 : vector<12x96xf32>
    %380 = arith.addf %366, %379 : vector<12x96xf32>
    %381 = arith.mulf %372, %346 : vector<12x96xf32>
    %382 = arith.addf %368, %381 : vector<12x96xf32>
    %c3_143 = arith.constant 3 : index
    %c3_144 = arith.constant 3 : index
    %c0_145 = arith.constant 0 : index
    %383 = vector.load %arg5[%c3_143, %c3_144, %c0_145] : memref<8x16x96xf32, #tpu.memory_space<vmem>>, vector<1x12x96xf32>
    %384 = vector.shape_cast %383 : vector<1x12x96xf32> to vector<12x96xf32>
    %385 = arith.mulf %384, %338 : vector<12x96xf32>
    %386 = arith.addf %336, %385 : vector<12x96xf32>
    %387 = arith.mulf %384, %340 : vector<12x96xf32>
    %388 = arith.addf %374, %387 : vector<12x96xf32>
    %389 = arith.mulf %384, %342 : vector<12x96xf32>
    %390 = arith.addf %376, %389 : vector<12x96xf32>
    %391 = arith.mulf %384, %344 : vector<12x96xf32>
    %392 = arith.addf %378, %391 : vector<12x96xf32>
    %393 = arith.mulf %384, %346 : vector<12x96xf32>
    %394 = arith.addf %380, %393 : vector<12x96xf32>
    %c4_146 = arith.constant 4 : index
    %c3_147 = arith.constant 3 : index
    %c0_148 = arith.constant 0 : index
    %395 = vector.load %arg5[%c4_146, %c3_147, %c0_148] : memref<8x16x96xf32, #tpu.memory_space<vmem>>, vector<1x12x96xf32>
    %396 = vector.shape_cast %395 : vector<1x12x96xf32> to vector<12x96xf32>
    %397 = arith.mulf %396, %338 : vector<12x96xf32>
    %398 = arith.addf %334, %397 : vector<12x96xf32>
    %399 = arith.mulf %396, %340 : vector<12x96xf32>
    %400 = arith.addf %386, %399 : vector<12x96xf32>
    %401 = arith.mulf %396, %342 : vector<12x96xf32>
    %402 = arith.addf %388, %401 : vector<12x96xf32>
    %403 = arith.mulf %396, %344 : vector<12x96xf32>
    %404 = arith.addf %390, %403 : vector<12x96xf32>
    %405 = arith.mulf %396, %346 : vector<12x96xf32>
    %406 = arith.addf %392, %405 : vector<12x96xf32>
    %c5_149 = arith.constant 5 : index
    %c3_150 = arith.constant 3 : index
    %c0_151 = arith.constant 0 : index
    %407 = vector.load %arg5[%c5_149, %c3_150, %c0_151] : memref<8x16x96xf32, #tpu.memory_space<vmem>>, vector<1x12x96xf32>
    %408 = vector.shape_cast %407 : vector<1x12x96xf32> to vector<12x96xf32>
    %409 = arith.mulf %408, %338 : vector<12x96xf32>
    %410 = arith.addf %332, %409 : vector<12x96xf32>
    %411 = arith.mulf %408, %340 : vector<12x96xf32>
    %412 = arith.addf %398, %411 : vector<12x96xf32>
    %413 = arith.mulf %408, %342 : vector<12x96xf32>
    %414 = arith.addf %400, %413 : vector<12x96xf32>
    %415 = arith.mulf %408, %344 : vector<12x96xf32>
    %416 = arith.addf %402, %415 : vector<12x96xf32>
    %417 = arith.mulf %408, %346 : vector<12x96xf32>
    %418 = arith.addf %404, %417 : vector<12x96xf32>
    %c6_152 = arith.constant 6 : index
    %c3_153 = arith.constant 3 : index
    %c0_154 = arith.constant 0 : index
    %419 = vector.load %arg5[%c6_152, %c3_153, %c0_154] : memref<8x16x96xf32, #tpu.memory_space<vmem>>, vector<1x12x96xf32>
    %420 = vector.shape_cast %419 : vector<1x12x96xf32> to vector<12x96xf32>
    %421 = arith.mulf %420, %338 : vector<12x96xf32>
    %422 = arith.addf %330, %421 : vector<12x96xf32>
    %423 = arith.mulf %420, %340 : vector<12x96xf32>
    %424 = arith.addf %410, %423 : vector<12x96xf32>
    %425 = arith.mulf %420, %342 : vector<12x96xf32>
    %426 = arith.addf %412, %425 : vector<12x96xf32>
    %427 = arith.mulf %420, %344 : vector<12x96xf32>
    %428 = arith.addf %414, %427 : vector<12x96xf32>
    %429 = arith.mulf %420, %346 : vector<12x96xf32>
    %430 = arith.addf %416, %429 : vector<12x96xf32>
    %c7_155 = arith.constant 7 : index
    %c3_156 = arith.constant 3 : index
    %c0_157 = arith.constant 0 : index
    %431 = vector.load %arg5[%c7_155, %c3_156, %c0_157] : memref<8x16x96xf32, #tpu.memory_space<vmem>>, vector<1x12x96xf32>
    %432 = vector.shape_cast %431 : vector<1x12x96xf32> to vector<12x96xf32>
    %433 = arith.mulf %432, %338 : vector<12x96xf32>
    %434 = arith.addf %328, %433 : vector<12x96xf32>
    %435 = arith.mulf %432, %340 : vector<12x96xf32>
    %436 = arith.addf %422, %435 : vector<12x96xf32>
    %437 = arith.mulf %432, %342 : vector<12x96xf32>
    %438 = arith.addf %424, %437 : vector<12x96xf32>
    %439 = arith.mulf %432, %344 : vector<12x96xf32>
    %440 = arith.addf %426, %439 : vector<12x96xf32>
    %441 = arith.mulf %432, %346 : vector<12x96xf32>
    %442 = arith.addf %428, %441 : vector<12x96xf32>
    %c4_158 = arith.constant 4 : index
    %c0_159 = arith.constant 0 : index
    %c0_160 = arith.constant 0 : index
    %443 = vector.load %arg2[%c4_158, %c0_159, %c0_160] : memref<25x12x96xf32, #tpu.memory_space<vmem>>, vector<1x12x96xf32>
    %444 = vector.shape_cast %443 : vector<1x12x96xf32> to vector<12x96xf32>
    %c9 = arith.constant 9 : index
    %c0_161 = arith.constant 0 : index
    %c0_162 = arith.constant 0 : index
    %445 = vector.load %arg2[%c9, %c0_161, %c0_162] : memref<25x12x96xf32, #tpu.memory_space<vmem>>, vector<1x12x96xf32>
    %446 = vector.shape_cast %445 : vector<1x12x96xf32> to vector<12x96xf32>
    %c14 = arith.constant 14 : index
    %c0_163 = arith.constant 0 : index
    %c0_164 = arith.constant 0 : index
    %447 = vector.load %arg2[%c14, %c0_163, %c0_164] : memref<25x12x96xf32, #tpu.memory_space<vmem>>, vector<1x12x96xf32>
    %448 = vector.shape_cast %447 : vector<1x12x96xf32> to vector<12x96xf32>
    %c19 = arith.constant 19 : index
    %c0_165 = arith.constant 0 : index
    %c0_166 = arith.constant 0 : index
    %449 = vector.load %arg2[%c19, %c0_165, %c0_166] : memref<25x12x96xf32, #tpu.memory_space<vmem>>, vector<1x12x96xf32>
    %450 = vector.shape_cast %449 : vector<1x12x96xf32> to vector<12x96xf32>
    %c24 = arith.constant 24 : index
    %c0_167 = arith.constant 0 : index
    %c0_168 = arith.constant 0 : index
    %451 = vector.load %arg2[%c24, %c0_167, %c0_168] : memref<25x12x96xf32, #tpu.memory_space<vmem>>, vector<1x12x96xf32>
    %452 = vector.shape_cast %451 : vector<1x12x96xf32> to vector<12x96xf32>
    %c0_169 = arith.constant 0 : index
    %c4_170 = arith.constant 4 : index
    %c0_171 = arith.constant 0 : index
    %453 = vector.load %arg5[%c0_169, %c4_170, %c0_171] : memref<8x16x96xf32, #tpu.memory_space<vmem>>, vector<1x12x96xf32>
    %454 = vector.shape_cast %453 : vector<1x12x96xf32> to vector<12x96xf32>
    %455 = arith.mulf %454, %444 : vector<12x96xf32>
    %456 = arith.addf %406, %455 : vector<12x96xf32>
    %457 = arith.mulf %454, %446 : vector<12x96xf32>
    %458 = arith.addf %394, %457 : vector<12x96xf32>
    %459 = arith.mulf %454, %448 : vector<12x96xf32>
    %460 = arith.addf %382, %459 : vector<12x96xf32>
    %461 = arith.mulf %454, %450 : vector<12x96xf32>
    %462 = arith.addf %370, %461 : vector<12x96xf32>
    %463 = arith.mulf %454, %452 : vector<12x96xf32>
    %464 = arith.addf %358, %463 : vector<12x96xf32>
    %c1_172 = arith.constant 1 : index
    %c4_173 = arith.constant 4 : index
    %c0_174 = arith.constant 0 : index
    %465 = vector.load %arg5[%c1_172, %c4_173, %c0_174] : memref<8x16x96xf32, #tpu.memory_space<vmem>>, vector<1x12x96xf32>
    %466 = vector.shape_cast %465 : vector<1x12x96xf32> to vector<12x96xf32>
    %467 = arith.mulf %466, %444 : vector<12x96xf32>
    %468 = arith.addf %418, %467 : vector<12x96xf32>
    %469 = arith.mulf %466, %446 : vector<12x96xf32>
    %470 = arith.addf %456, %469 : vector<12x96xf32>
    %471 = arith.mulf %466, %448 : vector<12x96xf32>
    %472 = arith.addf %458, %471 : vector<12x96xf32>
    %473 = arith.mulf %466, %450 : vector<12x96xf32>
    %474 = arith.addf %460, %473 : vector<12x96xf32>
    %475 = arith.mulf %466, %452 : vector<12x96xf32>
    %476 = arith.addf %462, %475 : vector<12x96xf32>
    %c2_175 = arith.constant 2 : index
    %c4_176 = arith.constant 4 : index
    %c0_177 = arith.constant 0 : index
    %477 = vector.load %arg5[%c2_175, %c4_176, %c0_177] : memref<8x16x96xf32, #tpu.memory_space<vmem>>, vector<1x12x96xf32>
    %478 = vector.shape_cast %477 : vector<1x12x96xf32> to vector<12x96xf32>
    %479 = arith.mulf %478, %444 : vector<12x96xf32>
    %480 = arith.addf %430, %479 : vector<12x96xf32>
    %481 = arith.mulf %478, %446 : vector<12x96xf32>
    %482 = arith.addf %468, %481 : vector<12x96xf32>
    %483 = arith.mulf %478, %448 : vector<12x96xf32>
    %484 = arith.addf %470, %483 : vector<12x96xf32>
    %485 = arith.mulf %478, %450 : vector<12x96xf32>
    %486 = arith.addf %472, %485 : vector<12x96xf32>
    %487 = arith.mulf %478, %452 : vector<12x96xf32>
    %488 = arith.addf %474, %487 : vector<12x96xf32>
    %c3_178 = arith.constant 3 : index
    %c4_179 = arith.constant 4 : index
    %c0_180 = arith.constant 0 : index
    %489 = vector.load %arg5[%c3_178, %c4_179, %c0_180] : memref<8x16x96xf32, #tpu.memory_space<vmem>>, vector<1x12x96xf32>
    %490 = vector.shape_cast %489 : vector<1x12x96xf32> to vector<12x96xf32>
    %491 = arith.mulf %490, %444 : vector<12x96xf32>
    %492 = arith.addf %442, %491 : vector<12x96xf32>
    %493 = arith.mulf %490, %446 : vector<12x96xf32>
    %494 = arith.addf %480, %493 : vector<12x96xf32>
    %495 = arith.mulf %490, %448 : vector<12x96xf32>
    %496 = arith.addf %482, %495 : vector<12x96xf32>
    %497 = arith.mulf %490, %450 : vector<12x96xf32>
    %498 = arith.addf %484, %497 : vector<12x96xf32>
    %499 = arith.mulf %490, %452 : vector<12x96xf32>
    %500 = arith.addf %486, %499 : vector<12x96xf32>
    %c4_181 = arith.constant 4 : index
    %c4_182 = arith.constant 4 : index
    %c0_183 = arith.constant 0 : index
    %501 = vector.load %arg5[%c4_181, %c4_182, %c0_183] : memref<8x16x96xf32, #tpu.memory_space<vmem>>, vector<1x12x96xf32>
    %502 = vector.shape_cast %501 : vector<1x12x96xf32> to vector<12x96xf32>
    %503 = arith.mulf %502, %444 : vector<12x96xf32>
    %504 = arith.addf %440, %503 : vector<12x96xf32>
    %505 = arith.mulf %502, %446 : vector<12x96xf32>
    %506 = arith.addf %492, %505 : vector<12x96xf32>
    %507 = arith.mulf %502, %448 : vector<12x96xf32>
    %508 = arith.addf %494, %507 : vector<12x96xf32>
    %509 = arith.mulf %502, %450 : vector<12x96xf32>
    %510 = arith.addf %496, %509 : vector<12x96xf32>
    %511 = arith.mulf %502, %452 : vector<12x96xf32>
    %512 = arith.addf %498, %511 : vector<12x96xf32>
    %c5_184 = arith.constant 5 : index
    %c4_185 = arith.constant 4 : index
    %c0_186 = arith.constant 0 : index
    %513 = vector.load %arg5[%c5_184, %c4_185, %c0_186] : memref<8x16x96xf32, #tpu.memory_space<vmem>>, vector<1x12x96xf32>
    %514 = vector.shape_cast %513 : vector<1x12x96xf32> to vector<12x96xf32>
    %515 = arith.mulf %514, %444 : vector<12x96xf32>
    %516 = arith.addf %438, %515 : vector<12x96xf32>
    %517 = arith.mulf %514, %446 : vector<12x96xf32>
    %518 = arith.addf %504, %517 : vector<12x96xf32>
    %519 = arith.mulf %514, %448 : vector<12x96xf32>
    %520 = arith.addf %506, %519 : vector<12x96xf32>
    %521 = arith.mulf %514, %450 : vector<12x96xf32>
    %522 = arith.addf %508, %521 : vector<12x96xf32>
    %523 = arith.mulf %514, %452 : vector<12x96xf32>
    %524 = arith.addf %510, %523 : vector<12x96xf32>
    %c6_187 = arith.constant 6 : index
    %c4_188 = arith.constant 4 : index
    %c0_189 = arith.constant 0 : index
    %525 = vector.load %arg5[%c6_187, %c4_188, %c0_189] : memref<8x16x96xf32, #tpu.memory_space<vmem>>, vector<1x12x96xf32>
    %526 = vector.shape_cast %525 : vector<1x12x96xf32> to vector<12x96xf32>
    %527 = arith.mulf %526, %444 : vector<12x96xf32>
    %528 = arith.addf %436, %527 : vector<12x96xf32>
    %529 = arith.mulf %526, %446 : vector<12x96xf32>
    %530 = arith.addf %516, %529 : vector<12x96xf32>
    %531 = arith.mulf %526, %448 : vector<12x96xf32>
    %532 = arith.addf %518, %531 : vector<12x96xf32>
    %533 = arith.mulf %526, %450 : vector<12x96xf32>
    %534 = arith.addf %520, %533 : vector<12x96xf32>
    %535 = arith.mulf %526, %452 : vector<12x96xf32>
    %536 = arith.addf %522, %535 : vector<12x96xf32>
    %c7_190 = arith.constant 7 : index
    %c4_191 = arith.constant 4 : index
    %c0_192 = arith.constant 0 : index
    %537 = vector.load %arg5[%c7_190, %c4_191, %c0_192] : memref<8x16x96xf32, #tpu.memory_space<vmem>>, vector<1x12x96xf32>
    %538 = vector.shape_cast %537 : vector<1x12x96xf32> to vector<12x96xf32>
    %539 = arith.mulf %538, %444 : vector<12x96xf32>
    %540 = arith.addf %434, %539 : vector<12x96xf32>
    %541 = arith.mulf %538, %446 : vector<12x96xf32>
    %542 = arith.addf %528, %541 : vector<12x96xf32>
    %543 = arith.mulf %538, %448 : vector<12x96xf32>
    %544 = arith.addf %530, %543 : vector<12x96xf32>
    %545 = arith.mulf %538, %450 : vector<12x96xf32>
    %546 = arith.addf %532, %545 : vector<12x96xf32>
    %547 = arith.mulf %538, %452 : vector<12x96xf32>
    %548 = arith.addf %534, %547 : vector<12x96xf32>
    %c0_193 = arith.constant 0 : index
    %549 = memref.load %arg3[%c0_193] : memref<1xf32, #tpu.memory_space<smem>>
    %cst_194 = arith.constant 2.000000e+00 : f32
    %550 = arith.mulf %549, %cst_194 : f32
    %cst_195 = arith.constant dense<0.000000e+00> : vector<12xf32>
    %551 = vector.multi_reduction <add>, %464, %cst_195 [1] : vector<12x96xf32> to vector<12xf32>
    %552 = arith.addf %551, %551 : vector<12xf32>
    %553 = vector.broadcast %550 : f32 to vector<12xf32>
    %554 = arith.addf %552, %553 : vector<12xf32>
    %cst_196 = arith.constant 0.000000e+00 : f32
    %555 = vector.broadcast %cst_196 : f32 to vector<12xf32>
    %556 = arith.maximumf %554, %555 : vector<12xf32>
    %c0_197 = arith.constant 0 : index
    %c0_198 = arith.constant 0 : index
    %c0_199 = arith.constant 0 : index
    %557 = vector.load %arg4[%c0_197, %c0_198, %c0_199] : memref<1x1x144xf32, #tpu.memory_space<vmem>>, vector<1x1x12xf32>
    %558 = vector.shape_cast %557 : vector<1x1x12xf32> to vector<12xf32>
    %559 = vector.shape_cast %556 : vector<12xf32> to vector<1x1x12xf32>
    tpu.vector_store %arg4[%c0_197, %c0_198, %c0_199], %559 {strides = array<i32>} : memref<1x1x144xf32, #tpu.memory_space<vmem>>, vector<1x1x12xf32>,
    %cst_200 = arith.constant dense<0.000000e+00> : vector<12xf32>
    %560 = vector.multi_reduction <add>, %476, %cst_200 [1] : vector<12x96xf32> to vector<12xf32>
    %561 = arith.addf %560, %560 : vector<12xf32>
    %562 = vector.broadcast %550 : f32 to vector<12xf32>
    %563 = arith.addf %561, %562 : vector<12xf32>
    %cst_201 = arith.constant 0.000000e+00 : f32
    %564 = vector.broadcast %cst_201 : f32 to vector<12xf32>
    %565 = arith.maximumf %563, %564 : vector<12xf32>
    %c0_202 = arith.constant 0 : index
    %c0_203 = arith.constant 0 : index
    %c12_204 = arith.constant 12 : index
    %566 = vector.load %arg4[%c0_202, %c0_203, %c12_204] : memref<1x1x144xf32, #tpu.memory_space<vmem>>, vector<1x1x12xf32>
    %567 = vector.shape_cast %566 : vector<1x1x12xf32> to vector<12xf32>
    %568 = vector.shape_cast %565 : vector<12xf32> to vector<1x1x12xf32>
    tpu.vector_store %arg4[%c0_202, %c0_203, %c12_204], %568 {strides = array<i32>} : memref<1x1x144xf32, #tpu.memory_space<vmem>>, vector<1x1x12xf32>,
    %cst_205 = arith.constant dense<0.000000e+00> : vector<12xf32>
    %569 = vector.multi_reduction <add>, %488, %cst_205 [1] : vector<12x96xf32> to vector<12xf32>
    %570 = arith.addf %569, %569 : vector<12xf32>
    %571 = vector.broadcast %550 : f32 to vector<12xf32>
    %572 = arith.addf %570, %571 : vector<12xf32>
    %cst_206 = arith.constant 0.000000e+00 : f32
    %573 = vector.broadcast %cst_206 : f32 to vector<12xf32>
    %574 = arith.maximumf %572, %573 : vector<12xf32>
    %c0_207 = arith.constant 0 : index
    %c0_208 = arith.constant 0 : index
    %c24_209 = arith.constant 24 : index
    %575 = vector.load %arg4[%c0_207, %c0_208, %c24_209] : memref<1x1x144xf32, #tpu.memory_space<vmem>>, vector<1x1x12xf32>
    %576 = vector.shape_cast %575 : vector<1x1x12xf32> to vector<12xf32>
    %577 = vector.shape_cast %574 : vector<12xf32> to vector<1x1x12xf32>
    tpu.vector_store %arg4[%c0_207, %c0_208, %c24_209], %577 {strides = array<i32>} : memref<1x1x144xf32, #tpu.memory_space<vmem>>, vector<1x1x12xf32>,
    %cst_210 = arith.constant dense<0.000000e+00> : vector<12xf32>
    %578 = vector.multi_reduction <add>, %500, %cst_210 [1] : vector<12x96xf32> to vector<12xf32>
    %579 = arith.addf %578, %578 : vector<12xf32>
    %580 = vector.broadcast %550 : f32 to vector<12xf32>
    %581 = arith.addf %579, %580 : vector<12xf32>
    %cst_211 = arith.constant 0.000000e+00 : f32
    %582 = vector.broadcast %cst_211 : f32 to vector<12xf32>
    %583 = arith.maximumf %581, %582 : vector<12xf32>
    %c0_212 = arith.constant 0 : index
    %c0_213 = arith.constant 0 : index
    %c36 = arith.constant 36 : index
    %584 = vector.load %arg4[%c0_212, %c0_213, %c36] : memref<1x1x144xf32, #tpu.memory_space<vmem>>, vector<1x1x12xf32>
    %585 = vector.shape_cast %584 : vector<1x1x12xf32> to vector<12xf32>
    %586 = vector.shape_cast %583 : vector<12xf32> to vector<1x1x12xf32>
    tpu.vector_store %arg4[%c0_212, %c0_213, %c36], %586 {strides = array<i32>} : memref<1x1x144xf32, #tpu.memory_space<vmem>>, vector<1x1x12xf32>,
    %cst_214 = arith.constant dense<0.000000e+00> : vector<12xf32>
    %587 = vector.multi_reduction <add>, %512, %cst_214 [1] : vector<12x96xf32> to vector<12xf32>
    %588 = arith.addf %587, %587 : vector<12xf32>
    %589 = vector.broadcast %550 : f32 to vector<12xf32>
    %590 = arith.addf %588, %589 : vector<12xf32>
    %cst_215 = arith.constant 0.000000e+00 : f32
    %591 = vector.broadcast %cst_215 : f32 to vector<12xf32>
    %592 = arith.maximumf %590, %591 : vector<12xf32>
    %c0_216 = arith.constant 0 : index
    %c0_217 = arith.constant 0 : index
    %c48 = arith.constant 48 : index
    %593 = vector.load %arg4[%c0_216, %c0_217, %c48] : memref<1x1x144xf32, #tpu.memory_space<vmem>>, vector<1x1x12xf32>
    %594 = vector.shape_cast %593 : vector<1x1x12xf32> to vector<12xf32>
    %595 = vector.shape_cast %592 : vector<12xf32> to vector<1x1x12xf32>
    tpu.vector_store %arg4[%c0_216, %c0_217, %c48], %595 {strides = array<i32>} : memref<1x1x144xf32, #tpu.memory_space<vmem>>, vector<1x1x12xf32>,
    %cst_218 = arith.constant dense<0.000000e+00> : vector<12xf32>
    %596 = vector.multi_reduction <add>, %524, %cst_218 [1] : vector<12x96xf32> to vector<12xf32>
    %597 = arith.addf %596, %596 : vector<12xf32>
    %598 = vector.broadcast %550 : f32 to vector<12xf32>
    %599 = arith.addf %597, %598 : vector<12xf32>
    %cst_219 = arith.constant 0.000000e+00 : f32
    %600 = vector.broadcast %cst_219 : f32 to vector<12xf32>
    %601 = arith.maximumf %599, %600 : vector<12xf32>
    %c0_220 = arith.constant 0 : index
    %c0_221 = arith.constant 0 : index
    %c60 = arith.constant 60 : index
    %602 = vector.load %arg4[%c0_220, %c0_221, %c60] : memref<1x1x144xf32, #tpu.memory_space<vmem>>, vector<1x1x12xf32>
    %603 = vector.shape_cast %602 : vector<1x1x12xf32> to vector<12xf32>
    %604 = vector.shape_cast %601 : vector<12xf32> to vector<1x1x12xf32>
    tpu.vector_store %arg4[%c0_220, %c0_221, %c60], %604 {strides = array<i32>} : memref<1x1x144xf32, #tpu.memory_space<vmem>>, vector<1x1x12xf32>,
    %cst_222 = arith.constant dense<0.000000e+00> : vector<12xf32>
    %605 = vector.multi_reduction <add>, %536, %cst_222 [1] : vector<12x96xf32> to vector<12xf32>
    %606 = arith.addf %605, %605 : vector<12xf32>
    %607 = vector.broadcast %550 : f32 to vector<12xf32>
    %608 = arith.addf %606, %607 : vector<12xf32>
    %cst_223 = arith.constant 0.000000e+00 : f32
    %609 = vector.broadcast %cst_223 : f32 to vector<12xf32>
    %610 = arith.maximumf %608, %609 : vector<12xf32>
    %c0_224 = arith.constant 0 : index
    %c0_225 = arith.constant 0 : index
    %c72 = arith.constant 72 : index
    %611 = vector.load %arg4[%c0_224, %c0_225, %c72] : memref<1x1x144xf32, #tpu.memory_space<vmem>>, vector<1x1x12xf32>
    %612 = vector.shape_cast %611 : vector<1x1x12xf32> to vector<12xf32>
    %613 = vector.shape_cast %610 : vector<12xf32> to vector<1x1x12xf32>
    tpu.vector_store %arg4[%c0_224, %c0_225, %c72], %613 {strides = array<i32>} : memref<1x1x144xf32, #tpu.memory_space<vmem>>, vector<1x1x12xf32>,
    %cst_226 = arith.constant dense<0.000000e+00> : vector<12xf32>
    %614 = vector.multi_reduction <add>, %548, %cst_226 [1] : vector<12x96xf32> to vector<12xf32>
    %615 = arith.addf %614, %614 : vector<12xf32>
    %616 = vector.broadcast %550 : f32 to vector<12xf32>
    %617 = arith.addf %615, %616 : vector<12xf32>
    %cst_227 = arith.constant 0.000000e+00 : f32
    %618 = vector.broadcast %cst_227 : f32 to vector<12xf32>
    %619 = arith.maximumf %617, %618 : vector<12xf32>
    %c0_228 = arith.constant 0 : index
    %c0_229 = arith.constant 0 : index
    %c84 = arith.constant 84 : index
    %620 = vector.load %arg4[%c0_228, %c0_229, %c84] : memref<1x1x144xf32, #tpu.memory_space<vmem>>, vector<1x1x12xf32>
    %621 = vector.shape_cast %620 : vector<1x1x12xf32> to vector<12xf32>
    %622 = vector.shape_cast %619 : vector<12xf32> to vector<1x1x12xf32>
    tpu.vector_store %arg4[%c0_228, %c0_229, %c84], %622 {strides = array<i32>} : memref<1x1x144xf32, #tpu.memory_space<vmem>>, vector<1x1x12xf32>,
    %cst_230 = arith.constant dense<0.000000e+00> : vector<12xf32>
    %623 = vector.multi_reduction <add>, %546, %cst_230 [1] : vector<12x96xf32> to vector<12xf32>
    %624 = arith.addf %623, %623 : vector<12xf32>
    %625 = vector.broadcast %550 : f32 to vector<12xf32>
    %626 = arith.addf %624, %625 : vector<12xf32>
    %cst_231 = arith.constant 0.000000e+00 : f32
    %627 = vector.broadcast %cst_231 : f32 to vector<12xf32>
    %628 = arith.maximumf %626, %627 : vector<12xf32>
    %c0_232 = arith.constant 0 : index
    %c0_233 = arith.constant 0 : index
    %c96 = arith.constant 96 : index
    %629 = vector.load %arg4[%c0_232, %c0_233, %c96] : memref<1x1x144xf32, #tpu.memory_space<vmem>>, vector<1x1x12xf32>
    %630 = vector.shape_cast %629 : vector<1x1x12xf32> to vector<12xf32>
    %631 = vector.shape_cast %628 : vector<12xf32> to vector<1x1x12xf32>
    tpu.vector_store %arg4[%c0_232, %c0_233, %c96], %631 {strides = array<i32>} : memref<1x1x144xf32, #tpu.memory_space<vmem>>, vector<1x1x12xf32>,
    %cst_234 = arith.constant dense<0.000000e+00> : vector<12xf32>
    %632 = vector.multi_reduction <add>, %544, %cst_234 [1] : vector<12x96xf32> to vector<12xf32>
    %633 = arith.addf %632, %632 : vector<12xf32>
    %634 = vector.broadcast %550 : f32 to vector<12xf32>
    %635 = arith.addf %633, %634 : vector<12xf32>
    %cst_235 = arith.constant 0.000000e+00 : f32
    %636 = vector.broadcast %cst_235 : f32 to vector<12xf32>
    %637 = arith.maximumf %635, %636 : vector<12xf32>
    %c0_236 = arith.constant 0 : index
    %c0_237 = arith.constant 0 : index
    %c108 = arith.constant 108 : index
    %638 = vector.load %arg4[%c0_236, %c0_237, %c108] : memref<1x1x144xf32, #tpu.memory_space<vmem>>, vector<1x1x12xf32>
    %639 = vector.shape_cast %638 : vector<1x1x12xf32> to vector<12xf32>
    %640 = vector.shape_cast %637 : vector<12xf32> to vector<1x1x12xf32>
    tpu.vector_store %arg4[%c0_236, %c0_237, %c108], %640 {strides = array<i32>} : memref<1x1x144xf32, #tpu.memory_space<vmem>>, vector<1x1x12xf32>,
    %cst_238 = arith.constant dense<0.000000e+00> : vector<12xf32>
    %641 = vector.multi_reduction <add>, %542, %cst_238 [1] : vector<12x96xf32> to vector<12xf32>
    %642 = arith.addf %641, %641 : vector<12xf32>
    %643 = vector.broadcast %550 : f32 to vector<12xf32>
    %644 = arith.addf %642, %643 : vector<12xf32>
    %cst_239 = arith.constant 0.000000e+00 : f32
    %645 = vector.broadcast %cst_239 : f32 to vector<12xf32>
    %646 = arith.maximumf %644, %645 : vector<12xf32>
    %c0_240 = arith.constant 0 : index
    %c0_241 = arith.constant 0 : index
    %c120 = arith.constant 120 : index
    %647 = vector.load %arg4[%c0_240, %c0_241, %c120] : memref<1x1x144xf32, #tpu.memory_space<vmem>>, vector<1x1x12xf32>
    %648 = vector.shape_cast %647 : vector<1x1x12xf32> to vector<12xf32>
    %649 = vector.shape_cast %646 : vector<12xf32> to vector<1x1x12xf32>
    tpu.vector_store %arg4[%c0_240, %c0_241, %c120], %649 {strides = array<i32>} : memref<1x1x144xf32, #tpu.memory_space<vmem>>, vector<1x1x12xf32>,
    %cst_242 = arith.constant dense<0.000000e+00> : vector<12xf32>
    %650 = vector.multi_reduction <add>, %540, %cst_242 [1] : vector<12x96xf32> to vector<12xf32>
    %651 = arith.addf %650, %650 : vector<12xf32>
    %652 = vector.broadcast %550 : f32 to vector<12xf32>
    %653 = arith.addf %651, %652 : vector<12xf32>
    %cst_243 = arith.constant 0.000000e+00 : f32
    %654 = vector.broadcast %cst_243 : f32 to vector<12xf32>
    %655 = arith.maximumf %653, %654 : vector<12xf32>
    %c0_244 = arith.constant 0 : index
    %c0_245 = arith.constant 0 : index
    %c132 = arith.constant 132 : index
    %656 = vector.load %arg4[%c0_244, %c0_245, %c132] : memref<1x1x144xf32, #tpu.memory_space<vmem>>, vector<1x1x12xf32>
    %657 = vector.shape_cast %656 : vector<1x1x12xf32> to vector<12xf32>
    %658 = vector.shape_cast %655 : vector<12xf32> to vector<1x1x12xf32>
    tpu.vector_store %arg4[%c0_244, %c0_245, %c132], %658 {strides = array<i32>} : memref<1x1x144xf32, #tpu.memory_space<vmem>>, vector<1x1x12xf32>,
    return
  }
  func.func @transform_0(%arg0: i32) -> (i32, i32, i32, i32) {
    %c0_i32 = arith.constant 0 : i32
    %c0_i32_0 = arith.constant 0 : i32
    %c0_i32_1 = arith.constant 0 : i32
    %c0_i32_2 = arith.constant 0 : i32
    return %arg0, %c0_i32, %c0_i32_0, %c0_i32_1 : i32, i32, i32, i32
  }
  func.func @transform_1(%arg0: i32) -> (i32, i32, i32) {
    %c0_i32 = arith.constant 0 : i32
    %c0_i32_0 = arith.constant 0 : i32
    %c0_i32_1 = arith.constant 0 : i32
    %c0_i32_2 = arith.constant 0 : i32
    return %c0_i32, %c0_i32_0, %c0_i32_1 : i32, i32, i32
  }
  func.func @transform_2(%arg0: i32) -> i32 {
    %c0_i32 = arith.constant 0 : i32
    %c0_i32_0 = arith.constant 0 : i32
    return %c0_i32 : i32
  }
  func.func @transform_3(%arg0: i32) -> (i32, i32, i32) {
    %c0_i32 = arith.constant 0 : i32
    %c0_i32_0 = arith.constant 0 : i32
    %c0_i32_1 = arith.constant 0 : i32
    return %arg0, %c0_i32, %c0_i32_0 : i32, i32, i32
  }
}

</mosaic_0001>

<bundles_post_ra>
// kernel: tpu_custom_call.1
= control target key start
LH: loop header
LB: loop body
LE: loop exit
PB: predicated region body
PF: predicated region fallthrough
CT: control target
= control target key end

     0   :  { %s4245_s0 = inlined_call_operand.vmem [shape: f32[2,8,8,96], index: 0, kind: input, shape index: {}]   ;;  %s4246_s1 = inlined_call_operand.vmem [shape: f32[25,12,96], index: 1, kind: input, shape index: {}]   ;;  %s4247_s2 = inlined_call_operand.<no memory space> [shape: f32[1], index: 2, kind: input, shape index: {}]   ;;  %s4248_s3 = inlined_call_operand.hbm [shape: f32[2,1,144], index: 3, kind: output, shape index: {}]  }
   0x1   :  { %8 = sst [smem:[#allocation3]] %s4247_s2 }
   0x2   :  { %9 = vsyncpa [#allocation5], 0 }
   0x3   :  { %11 = vsyncpa [#allocation5 + $0x1], 0  ;;  %s2263_s14 = smov 0   ;;  %s2265_s15 = smov 0  }
   0x4   :  { %s2267_s16 = smov 0   ;;  %s2269_s17 = smov 0  }
   0x5 LB: > { %s2284_s2 = sadd.s32 4294967295, %s2236_s17   ;;  %s2020_s18 = sadd.s32 4294967294, %s2236_s17   ;;  %s2236_s17 = sphi %s2269_s17, %s4738_s17   ;;  %s2232_s16 = sphi %s2267_s16, %s4737_s16   ;;  %s2228_s15 = sphi %s2265_s15, %s4736_s15   ;;  %s2224_s14 = sphi %s2263_s14, %s4735_s14  }
   0x6   : > { %s2288_s19 = sadd.s32 1, %s2236_s17   ;;  %s92_s20 = sadd.s32 1, %s2232_s16 }
   0x7   : > { %s89_s21 = ssub.s32 %s2236_s17, %s2288_s19  ;;  %p102_p0 = scmp.ne.s32.totalorder %s2232_s16, %s2228_s15 }
   0x8   : > { %p90_p1 = scmp.eq.s32.totalorder %s89_s21, 0  ;;  %p103_p2 = scmp.eq.s32.totalorder %s2284_s2, 1 }
   0x9   : > { %p108_p3 = scmp.ne.s32.totalorder %s2228_s15, %s2224_s14  ;;  %p109_p4 = scmp.eq.s32.totalorder %s2020_s18, 1 }
   0xa   : > { %s2299_s22 = scalar_select %p90_p1, %s2232_s16, %s92_s20  }
   0xb   : > { %p2301_p5 = por %p103_p2, %p102_p0  ;;  %p2305_p6 = por %p109_p4, %p108_p3 }
   0xc   : > { %p2023_p7 = scmp.ge.s32.totalorder %s2236_s17, 1  ;;  %p141_p8 = scmp.lt.s32.totalorder %s2236_s17, 3 }
   0xe   : > { %p142_p9 = pnand %p2023_p7, %p141_p8 }
  0x10   : > { %145 = sbr.rel (%p142_p9) target bundleno = 678 (0x2a6), region = 32 }
  0x15   : > { %p165_p10 = scmp.lt.s32.totalorder %s2284_s2, 1  ;;  %vm170_vm0 = vcmask 785408   ;;  %v2238_v0 = vmov 0.0   ;;  %v2346_v14 = vld [vmem:[%s4246_s1 + $0x140] sm:$0xff]  ;;  %v2351_v15 = vld [vmem:[%s4246_s1 + $0x10] sm:$0xff]  ;;  %vm1177_vm1 = vcmask 781312  }
  0x16   : > { %171 = vst.msk [vmem:[#allocation2] sm:$0xff] %vm170_vm0, %v2238_v0  ;;  %v2360_v18 = vld [vmem:[%s4246_s1 + $0x188] sm:$0xf]  ;;  %v211_v20 = vld [vmem:[%s4246_s1] sm:$0xff]  ;;  %v2375_v22 = vld [vmem:[%s4246_s1 + $0xb0] sm:$0xff]  ;;  %s3834_s9 = sld [smem:[#allocation3]] }
  0x17   : > { %s166_s25 = scalar_select %p165_p10, %s2284_s2, 1  ;;  %172 = vst.msk [vmem:[#allocation2 + $0x8] sm:$0xff] %vm170_vm0, %v2238_v0  ;;  %v2370_v21 = vld [vmem:[%s4246_s1 + $0x60] sm:$0xff]  ;;  %v2381_v23 = vld [vmem:[%s4246_s1 + $0x50] sm:$0xff]  ;;  %v2477_v57 = vld [vmem:[%s4246_s1 + $0x8] sm:$0xf] }
  0x18   : > { %173 = vst.msk [vmem:[#allocation2 + $0x10] sm:$0xff] %vm170_vm0, %v2238_v0  ;;  %v2386_v24 = vld [vmem:[%s4246_s1 + $0x150] sm:$0xff]  ;;  %v2394_v26 = vld [vmem:[%s4246_s1 + $0xa0] sm:$0xff]  ;;  %v2490_v62 = vld [vmem:[%s4246_s1 + $0x58] sm:$0xf]  ;;  %s162_s18 = sand.u32 1, %s2228_s15  }
  0x19   : > { %s2079_s26 = sshll.u32 %s166_s25, 6  ;;  %174 = vst.msk [vmem:[#allocation2 + $0x18] sm:$0xff] %vm170_vm0, %v2238_v0  ;;  %v2414_v32 = vld [vmem:[%s4246_s1 + $0xf0] sm:$0xff]  ;;  %v2432_v37 = vld [vmem:[%s4246_s1 + $0x160] sm:$0xff]  ;;  %vm1234_vm2 = vcmask 130112   ;;  %s2024_s20 = sshll.u32 %s162_s18, 1 }
  0x1a   : > { %s2320_s29 = scalar_lea.vmem %s4245_s0, %s2079_s26  ;;  %175 = vst.msk [vmem:[#allocation2 + $0x20] sm:$0xff] %vm170_vm0, %v2238_v0  ;;  %v2448_v44 = vld [vmem:[%s4246_s1 + $0x170] sm:$0xff]  ;;  %v2463_v50 = vld [vmem:[%s4246_s1 + $0x180] sm:$0xff]  ;;  %s4115_s21 = scalar_lea.vmem [#allocation4], %s2024_s20  ;;  %vm1299_vm4 = vcmask 228512   ;;  %vm1363_vm9 = vcmask 326912  }
  0x1b   : > { %176 = vst.msk [vmem:[#allocation2 + $0x28] sm:$0xff] %vm170_vm0, %v2238_v0  ;;  %v187_v1 = vld [vmem:[%s2320_s29] sm:$0xff]  ;;  %v188_v2 = vld [vmem:[%s2320_s29 + $0x8] sm:$0xff]  ;;  %v189_v3 = vld [vmem:[%s2320_s29 + $0x10] sm:$0xff]  ;;  %vm1427_vm12 = vcmask 425312   ;;  %s2076_s25 = sshll.u32 %s2284_s2, 1 }
  0x1c   : > { %177 = vst.msk [vmem:[#allocation2 + $0x30] sm:$0xff] %vm170_vm0, %v2238_v0  ;;  %v190_v4 = vld [vmem:[%s2320_s29 + $0x18] sm:$0xff]  ;;  %v195_v5 = vmax.f32 %v187_v1, 0.0  ;;  %v191_v6 = vld [vmem:[%s2320_s29 + $0x20] sm:$0xff]  ;;  %v196_v7 = vmax.f32 %v188_v2, 0.0  ;;  %v193_v8 = vld [vmem:[%s2320_s29 + $0x30] sm:$0xff]  ;;  %s1956_s28 = scalar_lea.hbm %s4248_s3, %s2076_s25 }
  0x1d   : > { %178 = vst.msk [vmem:[#allocation2 + $0x38] sm:$0xff] %vm170_vm0, %v2238_v0  ;;  %v197_v9 = vmax.f32 %v189_v3, 0.0  ;;  %v198_v10 = vmax.f32 %v190_v4, 0.0  ;;  %v199_v11 = vmax.f32 %v191_v6, 0.0  ;;  %v201_v12 = vmax.f32 %v193_v8, 0.0  ;;  %v194_v13 = vld [vmem:[%s2320_s29 + $0x38] sm:$0xff] }
  0x1e   : > { %179 = vst.msk [vmem:[#allocation2 + $0x40] sm:$0xff] %vm170_vm0, %v2238_v0  ;;  %v202_v16 = vmax.f32 %v194_v13, 0.0  ;;  %v2362_v19 = vld [vmem:[#allocation2 + $0xc] sm:$0xf]  ;;  %s1173_s12 = smul.f32 2.0, %s3834_s9  ;;  %s1960_s30 = sshll.u32 %s1956_s28, 4  ;;  %s1961_s30 = int_to_ptr.hbm [resolvable:$true] %s1960_s30 }
  0x1f   : > { %180 = vst.msk [vmem:[#allocation2 + $0x48] sm:$0xff] %vm170_vm0, %v2238_v0  ;;  %v2409_v31 = vmul.f32 %v2360_v18, %v2362_v19  ;;  %v2509_v8 = vld [vmem:[%s4246_s1 + $0x70] sm:$0xff]  ;;  %s1946_s2 = scalar_lea.sflag [#allocation5], %s162_s18  ;;  %s2188_s4 = sshra.s32 %s1961_s30, 4  ;;  %s2189_s4 = int_to_ptr.hbm [resolvable:$true] %s2188_s4 }
  0x20   : > { %183 = vst.msk [vmem:[#allocation2 + $0x60] sm:$0xff] %vm170_vm0, %v2238_v0  ;;  %s2190_s5 = scalar_lea.hbm %s2189_s4, 2  ;;  %s2194_s8 = scalar_lea.hbm %s4248_s3, 4 }
  0x21   : > { %184 = vst.msk [vmem:[#allocation2 + $0x68] sm:$0xff] %vm170_vm0, %v2238_v0  ;;  %p2191_p11 = scmp.ne.s32.totalorder %s2189_s4, %s2190_s5  ;;  %p2195_p0 = scmp.lt.s32.totalorder %s2189_s4, %s4248_s3 }
  0x22   : > { %203 = vst.msk [vmem:[#allocation2 + $0x4] sm:$0xff] %vm170_vm0, %v195_v5  ;;  %p2196_p1 = scmp.lt.s32.totalorder %s2194_s8, %s2190_s5 }
  0x23   : > { %204 = vst.msk [vmem:[#allocation2 + $0x14] sm:$0xff] %vm170_vm0, %v196_v7  ;;  %v2504_v7 = vld [vmem:[%s4246_s1 + $0x20] sm:$0xff]  ;;  %p2192_p12 = pnand %p2191_p11, %p2301_p5 }
  0x24   : > { %205 = vst.msk [vmem:[#allocation2 + $0x24] sm:$0xff] %vm170_vm0, %v197_v9  ;;  %p2197_p2 = por %p2196_p1, %p2195_p0 }
  0x25   : > { %206 = vst.msk [vmem:[#allocation2 + $0x34] sm:$0xff] %vm170_vm0, %v198_v10  ;;  %p2193_p13 = pneg %p2192_p12 }
  0x26   : > { %207 = vst.msk [vmem:[#allocation2 + $0x44] sm:$0xff] %vm170_vm0, %v199_v11  ;;  %v2518_v11 = vld [vmem:[%s4246_s1 + $0xc0] sm:$0xff] }
  0x27   : > { %209 = vst.msk [vmem:[#allocation2 + $0x64] sm:$0xff] %vm170_vm0, %v201_v12  ;;  %p2198_p3 = pnand %p2197_p2, %p2193_p13 }
  0x28   : > { %181 = vst.msk [vmem:[#allocation2 + $0x50] sm:$0xff] %vm170_vm0, %v2238_v0 }
  0x29   : > { %v2354_v17 = vld [vmem:[#allocation2] sm:$0xff]  ;;  %182 = vst.msk [vmem:[#allocation2 + $0x58] sm:$0xff] %vm170_vm0, %v2238_v0  ;;  %v2497_v4 = vld [vmem:[#allocation2 + $0x8] sm:$0xf] }
  0x2a   : > { %4407 = vst [vmem:[#allocation7_spill] sm:$0xff] %v2360_v18  ;;  %v2388_v25 = vld [vmem:[#allocation2 + $0x1] sm:$0xff]  ;;  %v243_v27 = vmul.f32 %v2346_v14, %v2354_v17  ;;  %v2398_v28 = vld [vmem:[#allocation2 + $0x10] sm:$0xff]  ;;  %v227_v2 = vmul.f32 %v2354_v17, %v211_v20  ;;  %v231_v3 = vmul.f32 %v2381_v23, %v2354_v17  ;;  %v235_v9 = vmul.f32 %v2394_v26, %v2354_v17  ;;  %v2634_v18 = vld [vmem:[#allocation2 + $0xa] sm:$0xf] }
  0x2b   : > { %4408 = vst [vmem:[#allocation8_spill] sm:$0xff] %v2362_v19  ;;  %v2400_v29 = vld [vmem:[#allocation2 + $0x20] sm:$0xff]  ;;  %v2404_v30 = vmul.f32 %v2351_v15, %v2388_v25  ;;  %v2417_v33 = vmul.f32 %v2398_v28, %v211_v20  ;;  %v254_v34 = vmul.f32 %v2381_v23, %v2398_v28  ;;  %v2423_v35 = vmul.f32 %v2370_v21, %v2388_v25 }
  0x2c   : > { %185 = vst.msk [vmem:[#allocation2 + $0x70] sm:$0xff] %vm170_vm0, %v2238_v0  ;;  %v2427_v36 = vmul.f32 %v2375_v22, %v2388_v25  ;;  %v2434_v38 = vld [vmem:[#allocation2 + $0x2] sm:$0xff]  ;;  %v258_v39 = vmul.f32 %v2394_v26, %v2398_v28  ;;  %v262_v40 = vmul.f32 %v2414_v32, %v2398_v28  ;;  %v273_v41 = vmul.f32 %v2400_v29, %v211_v20  ;;  %v2441_v42 = vld [vmem:[#allocation2 + $0x30] sm:$0xff] }
  0x2d   : > { %186 = vst.msk [vmem:[#allocation2 + $0x78] sm:$0xff] %vm170_vm0, %v2238_v0  ;;  %v441_v43 = vmul.f32 %v2386_v24, %v2388_v25  ;;  %v2450_v45 = vld [vmem:[#allocation2 + $0x3] sm:$0xff]  ;;  %v281_v46 = vmul.f32 %v2394_v26, %v2400_v29  ;;  %v285_v47 = vmul.f32 %v2414_v32, %v2400_v29  ;;  %v289_v48 = vmul.f32 %v2346_v14, %v2400_v29 }
  0x2e   : > { %210 = vst.msk [vmem:[#allocation2 + $0x74] sm:$0xff] %vm170_vm0, %v202_v16  ;;  %v300_v49 = vmul.f32 %v2381_v23, %v2441_v42  ;;  %v2465_v51 = vld [vmem:[#allocation2 + $0x4] sm:$0xff]  ;;  %v296_v52 = vmul.f32 %v2441_v42, %v211_v20  ;;  %v308_v53 = vmul.f32 %v2414_v32, %v2441_v42  ;;  %v632_v56 = vmul.f32 %v2432_v37, %v2434_v38  ;;  %v2523_v20 = vld [vmem:[%s4246_s1 + $0xa8] sm:$0xf] }
  0x2f   : > { %4409 = vst [vmem:[#allocation9_spill] sm:$0xff] %v2448_v44  ;;  %v2470_v54 = vld [vmem:[#allocation2 + $0x40] sm:$0xff]  ;;  %v443_v55 = vadd.f32 %v441_v43, %v243_v27  ;;  %v312_v58 = vmul.f32 %v2346_v14, %v2441_v42  ;;  %v823_v61 = vmul.f32 %v2448_v44, %v2450_v45  ;;  %v1014_v1 = vmul.f32 %v2463_v50, %v2465_v51 }
  0x30   : > { %4410 = vst [vmem:[#allocation10_spill] sm:$0xff] %v2450_v45  ;;  %v323_v59 = vmul.f32 %v2381_v23, %v2470_v54  ;;  %v327_v60 = vmul.f32 %v2394_v26, %v2470_v54  ;;  %v363_v63 = vld [vmem:[#allocation2 + $0x60] sm:$0xff]  ;;  %v302_v5 = vadd.f32 %v300_v49, %v273_v41  ;;  %v335_v6 = vmul.f32 %v2346_v14, %v2470_v54  ;;  %v2527_v41 = vld [vmem:[#allocation2 + $0x18] sm:$0xf] }
  0x31   : > { %4411 = vst [vmem:[#allocation11_spill] sm:$0xff] %v2463_v50  ;;  %v634_v0 = vadd.f32 %v632_v56, %v443_v55  ;;  %v228_v10 = vmul.f32 %v2497_v4, %v2477_v57  ;;  %v256_v13 = vadd.f32 %v254_v34, %v227_v2  ;;  %v260_v16 = vadd.f32 %v258_v39, %v231_v3 }
  0x32   : > { %4412 = vst [vmem:[#allocation12_spill] sm:$0xff] %v2504_v7  ;;  %v232_v27 = vmul.f32 %v2490_v62, %v2497_v4  ;;  %v2530_v43 = vmul.f32 %v2346_v14, %v363_v63  ;;  %v264_v49 = vadd.f32 %v262_v40, %v235_v9  ;;  %v255_v55 = vmul.f32 %v2490_v62, %v2527_v41  ;;  %v2553_v9 = vld [vmem:[%s4246_s1 + $0x30] sm:$0xff] }
  0x33   : > { %4413 = vst [vmem:[#allocation13_spill] sm:$0xff] %v2518_v11  ;;  %v825_v12 = vadd.f32 %v823_v61, %v634_v0  ;;  %v259_v34 = vmul.f32 %v2523_v20, %v2527_v41  ;;  %v2538_v39 = vmul.f32 %v2504_v7, %v2434_v38  ;;  %v283_v61 = vadd.f32 %v281_v46, %v256_v13 }
  0x34   : > { %4414 = vst [vmem:[#allocation14_spill] sm:$0xff] %v2530_v43  ;;  %v287_v0 = vadd.f32 %v285_v47, %v260_v16  ;;  %v2540_v2 = vadd.f32 %v323_v59, %v296_v52  ;;  %v2544_v63 = vmul.f32 %v2509_v8, %v2434_v38  ;;  %v2548_v40 = vmul.f32 %v2518_v11, %v2434_v38  ;;  %v2559_v47 = vld [vmem:[%s4246_s1 + $0xf8] sm:$0xf] }
  0x35   : > { %4415 = vst [vmem:[#allocation15_spill] sm:$0xff] %v2538_v39  ;;  %v1016_v56 = vadd.f32 %v1014_v1, %v825_v12  ;;  %v257_v3 = vadd.f32 %v255_v55, %v228_v10  ;;  %v310_v46 = vadd.f32 %v308_v53, %v283_v61  ;;  %v236_v52 = vmul.f32 %v2523_v20, %v2497_v4  ;;  %v2563_v12 = vld [vmem:[#allocation2 + $0x28] sm:$0xf]  ;;  %v2571_v55 = vld [vmem:[#allocation2 + $0x38] sm:$0xf] }
  0x36   : > { %4416 = vst [vmem:[#allocation16_spill] sm:$0xff] %v2540_v2  ;;  %v261_v59 = vadd.f32 %v259_v34, %v232_v27  ;;  %v291_v10 = vadd.f32 %v289_v48, %v264_v49  ;;  %v263_v13 = vmul.f32 %v2559_v47, %v2527_v41  ;;  %v282_v16 = vmul.f32 %v2523_v20, %v2563_v12  ;;  %v2581_v48 = vld [vmem:[%s4246_s1 + $0x148] sm:$0xf] }
  0x37   : > { %4417 = vst [vmem:[#allocation17_spill] sm:$0xff] %v2544_v63  ;;  %v1174_v1 = vsel %vm170_vm0, %v1016_v56, 0.0  ;;  %v286_v53 = vmul.f32 %v2559_v47, %v2563_v12  ;;  %v2576_v56 = vld [vmem:[%s4246_s1 + $0x80] sm:$0xff]  ;;  %v314_v27 = vadd.f32 %v312_v58, %v287_v0  ;;  %v337_v34 = vadd.f32 %v335_v6, %v310_v46  ;;  %v2595_v6 = vld [vmem:[#allocation2 + $0x48] sm:$0xf] }
  0x38   : > { %4418 = vst [vmem:[#allocation18_spill] sm:$0xff] %v2548_v40  ;;  %1175 = vadd.xlane.f32.xlu0 %v1174_v1  ;;  %v274_v49 = vmul.f32 %v2563_v12, %v2477_v57  ;;  %v301_v61 = vmul.f32 %v2490_v62, %v2571_v55  ;;  %v2587_v1 = vadd.f32 %v327_v60, %v302_v5  ;;  %v2606_v5 = vld [vmem:[%s4246_s1 + $0x68] sm:$0xf]  ;;  %v2627_v63 = vld [vmem:[#allocation2 + $0x68] sm:$0xf] }
  0x39   : > { %4419 = vst [vmem:[#allocation19_spill] sm:$0xff] %v2553_v9  ;;  %v2591_v2 = vmul.f32 %v2553_v9, %v2450_v45  ;;  %v284_v43 = vadd.f32 %v282_v16, %v257_v3  ;;  %v309_v58 = vmul.f32 %v2559_v47, %v2571_v55  ;;  %v288_v0 = vadd.f32 %v286_v53, %v261_v59  ;;  %v2611_v3 = vld [vmem:[%s4246_s1 + $0x158] sm:$0xf]  ;;  %v2613_v59 = vld [vmem:[#allocation2 + $0x9] sm:$0xf] }
  0x3a   : > { %4420 = vst [vmem:[#allocation20_spill] sm:$0xff] %v2559_v47  ;;  %v297_v46 = vmul.f32 %v2571_v55, %v2477_v57  ;;  %v313_v39 = vmul.f32 %v2581_v48, %v2571_v55  ;;  %v324_v60 = vmul.f32 %v2490_v62, %v2595_v6  ;;  %v2617_v16 = vmul.f32 %v2576_v56, %v2450_v45  ;;  %v2632_v40 = vld [vmem:[%s4246_s1 + $0x168] sm:$0xf] }
  0x3b   : > { %4421 = vst [vmem:[#allocation21_spill] sm:$0xff] %v2576_v56  ;;  %v244_v53 = vmul.f32 %v2581_v48, %v2497_v4  ;;  %v2640_v19 = vadd.f32 %v2423_v35, %v314_v27  ;;  %v192_v56 = vld [vmem:[%s2320_s29 + $0x28] sm:$0xff]  ;;  %v311_v9 = vadd.f32 %v309_v58, %v284_v43  ;;  %v336_v35 = vmul.f32 %v2581_v48, %v2595_v6  ;;  %v2675_v58 = vld [vmem:[%s4246_s1 + $0x18] sm:$0xf]  ;;  %s1958_s29 = sshll.u32 %s4115_s21, 4  ;;  %s1959_s29 = int_to_ptr.vmem [resolvable:$true] %s1958_s29 }
  0x3c   : > { %4422 = vst [vmem:[#allocation22_spill] sm:$0xff] %v2587_v1  ;;  %v2623_v1 = vmul.f32 %v2527_v41, %v2477_v57  ;;  %v2643_v57 = vadd.f32 %v2427_v36, %v291_v10  ;;  %v442_v36 = vmul.f32 %v2611_v3, %v2613_v59  ;;  %v315_v10 = vadd.f32 %v313_v39, %v288_v0 }
  0x3d   : > { %4423 = vst [vmem:[#allocation23_spill] sm:$0xff] %v2591_v2  ;;  %v2625_v2 = vadd.f32 %v263_v13, %v236_v52  ;;  %v303_v52 = vadd.f32 %v301_v61, %v274_v49  ;;  %v2648_v13 = vld [vmem:[%s4246_s1 + $0x178] sm:$0xf]  ;;  %v2659_v27 = vadd.f32 %v324_v60, %v297_v46  ;;  %v387_v49 = vld [vmem:[#allocation2 + $0x78] sm:$0xf]  ;;  %v633_v43 = vmul.f32 %v2632_v40, %v2634_v18 }
  0x3e   : > { %4424 = vst [vmem:[#allocation24_spill] sm:$0xff] %v2606_v5  ;;  %v2670_v61 = vld [vmem:[%s4246_s1 + $0x100] sm:$0xff]  ;;  %v430_v39 = vmul.f32 %v2606_v5, %v2613_v59  ;;  %v444_v0 = vadd.f32 %v442_v36, %v244_v53  ;;  %v200_v60 = vmax.f32 %v192_v56, 0.0  ;;  %v304_v53 = vmul.f32 %v2394_v26, %v2441_v42  ;;  %v2714_v42 = vld [vmem:[%s4246_s1 + $0x78] sm:$0xf] }
  0x3f   : > { %4425 = vst [vmem:[#allocation25_spill] sm:$0xff] %v2611_v3  ;;  %v2694_v36 = vld [vmem:[#allocation2 + $0x11] sm:$0xff] }
  0x40   : > { %4426 = vst [vmem:[#allocation26_spill] sm:$0xff] %v2617_v16  ;;  %v2637_v16 = vadd.f32 %v2404_v30, %v337_v34  ;;  %v328_v30 = vmul.f32 %v2523_v20, %v2595_v6  ;;  %v2663_v34 = vmul.f32 %v2581_v48, %v2627_v63 }
  0x41   : > { %4427 = vst [vmem:[#allocation27_spill] sm:$0xff] %v2625_v2  ;;  %v2650_v2 = vld [vmem:[#allocation2 + $0xb] sm:$0xf] }
  0x42   : > { %4428 = vst [vmem:[#allocation28_spill] sm:$0xff] %v2627_v63  ;;  %v824_v46 = vmul.f32 %v2648_v13, %v2650_v2  ;;  %v2684_v63 = vld [vmem:[%s4246_s1 + $0xb8] sm:$0xf]  ;;  %v2696_v56 = vadd.f32 %v328_v30, %v303_v52 }
  0x43   : > { %4429 = vst [vmem:[#allocation29_spill] sm:$0xff] %v2632_v40  ;;  %v635_v40 = vadd.f32 %v633_v43, %v444_v0  ;;  %v2719_v52 = vld [vmem:[%s4246_s1 + $0x38] sm:$0xf]  ;;  %v331_v43 = vmul.f32 %v2414_v32, %v2470_v54  ;;  %v463_v0 = vmul.f32 %v2386_v24, %v2694_v36 }
  0x44   : > { %4430 = vst [vmem:[#allocation30_spill] sm:$0xff] %v2643_v57  ;;  %v277_v57 = vmul.f32 %v2381_v23, %v2400_v29  ;;  %v437_v23 = vmul.f32 %v2670_v61, %v2388_v25  ;;  %v426_v29 = vmul.f32 %v2675_v58, %v2613_v59  ;;  %v2725_v25 = vld [vmem:[%s4246_s1 + $0x110] sm:$0xff] }
  0x45   : > { %4431 = vst [vmem:[#allocation31_spill] sm:$0xff] %v2648_v13  ;;  %v2699_v13 = vmul.f32 %v2581_v48, %v387_v49 }
  0x46   : > { %4432 = vst [vmem:[#allocation32_spill] sm:$0xff] %v2659_v27  ;;  %v239_v27 = vmul.f32 %v2414_v32, %v2354_v17  ;;  %v2704_v17 = vld [vmem:[%s4246_s1 + $0x28] sm:$0xf]  ;;  %v279_v49 = vadd.f32 %v277_v57, %v2417_v33  ;;  %v2749_v32 = vmul.f32 %v2719_v52, %v2650_v2 }
  0x47   : > { %4433 = vst [vmem:[#allocation33_spill] sm:$0xff] %v2663_v34  ;;  %v266_v34 = vmul.f32 %v2346_v14, %v2398_v28  ;;  %v338_v28 = vadd.f32 %v336_v35, %v311_v9  ;;  %v2729_v9 = vmul.f32 %v2684_v63, %v2613_v59  ;;  %v826_v35 = vadd.f32 %v824_v46, %v635_v40 }
  0x48   : > { %4434 = vst [vmem:[#allocation34_spill] sm:$0xff] %v2670_v61  ;;  %v2739_v33 = vmul.f32 %v2704_v17, %v2634_v18  ;;  %v306_v57 = vadd.f32 %v304_v53, %v279_v49  ;;  %v628_v40 = vmul.f32 %v2725_v25, %v2434_v38  ;;  %v447_v46 = vmul.f32 %v2351_v15, %v2694_v36  ;;  %v2770_v49 = vld [vmem:[#allocation2 + $0x21] sm:$0xff] }
  0x49   : > { %4435 = vst [vmem:[#allocation35_spill] sm:$0xff] %v2675_v58  ;;  %v268_v30 = vadd.f32 %v266_v34, %v239_v27  ;;  %v2741_v34 = vld [vmem:[#allocation2 + $0x12] sm:$0xff]  ;;  %v1017_v54 = vadd.f32 %v2409_v31, %v826_v35  ;;  %v451_v53 = vmul.f32 %v2370_v21, %v2694_v36  ;;  %v2768_v38 = vmul.f32 %v2375_v22, %v2694_v36 }
  0x4a   : > { %4436 = vst [vmem:[#allocation36_spill] sm:$0xff] %v2684_v63  ;;  %v333_v31 = vadd.f32 %v331_v43, %v306_v57  ;;  %v473_v35 = vmul.f32 %v2370_v21, %v2770_v49  ;;  %v477_v43 = vmul.f32 %v2375_v22, %v2770_v49  ;;  %v2784_v57 = vld [vmem:[#allocation2 + $0x41] sm:$0xff] }
  0x4b   : > { %4437 = vst [vmem:[#allocation37_spill] sm:$0xff] %v2699_v13  ;;  %v439_v27 = vadd.f32 %v437_v23, %v268_v30  ;;  %v2745_v13 = vmul.f32 %v2714_v42, %v2634_v18  ;;  %v1178_v30 = vsel %vm1177_vm1, %v1017_v54, 0.0 }
  0x4c   : > { %4438 = vst [vmem:[#allocation38_spill] sm:$0xff] %v2704_v17  ;;  %1179 = vadd.xlane.f32.xlu0 %v1178_v30 }
  0x4d   : > { %208 = vst.msk [vmem:[#allocation2 + $0x54] sm:$0xff] %vm170_vm0, %v200_v60  ;;  %v2735_v60 = vadd.f32 %v430_v39, %v315_v10  ;;  %v2757_v10 = vld [vmem:[%s4246_s1 + $0x120] sm:$0xff]  ;;  %v2759_v39 = vadd.f32 %v426_v29, %v338_v28  ;;  %v465_v23 = vadd.f32 %v463_v0, %v439_v27  ;;  %v654_v28 = vmul.f32 %v2432_v37, %v2741_v34 }
  0x4e   : > { %4439 = vst [vmem:[#allocation39_spill] sm:$0xff] %v2714_v42  ;;  %v2774_v29 = vld [vmem:[#allocation2 + $0x13] sm:$0xff]  ;;  %v819_v54 = vmul.f32 %v2757_v10, %v2450_v45 }
  0x4f   : > { %4440 = vst [vmem:[#allocation40_spill] sm:$0xff] %v2719_v52  ;;  %v2782_v0 = vld [vmem:[#allocation2 + $0x31] sm:$0xff]  ;;  %v630_v27 = vadd.f32 %v628_v40, %v465_v23  ;;  %v2801_v40 = vld [vmem:[%s4246_s1 + $0x130] sm:$0xff]  ;;  %v2805_v23 = vmul.f32 %v2504_v7, %v2741_v34  ;;  %v2837_v45 = vld [vmem:[#allocation2 + $0x19] sm:$0xf] }
  0x50   : > { %4441 = vst [vmem:[#allocation41_spill] sm:$0xff] %v2725_v25  ;;  %v499_v30 = vmul.f32 %v2375_v22, %v2782_v0  ;;  %v2794_v21 = vmul.f32 %v2670_v61, %v2782_v0  ;;  %v845_v22 = vmul.f32 %v2448_v44, %v2774_v29  ;;  %v332_v44 = vmul.f32 %v2559_v47, %v2595_v6 }
  0x51   : > { %4442 = vst [vmem:[#allocation42_spill] sm:$0xff] %v2729_v9  ;;  %v305_v9 = vmul.f32 %v2523_v20, %v2571_v55 }
  0x52   : > { %4443 = vst [vmem:[#allocation43_spill] sm:$0xff] %v2735_v60 }
  0x53   : > { %4444 = vst [vmem:[#allocation44_spill] sm:$0xff] %v2739_v33  ;;  %v525_v33 = vmul.f32 %v2670_v61, %v2784_v57 }
  0x54   : > { %4445 = vst [vmem:[#allocation45_spill] sm:$0xff] %v2745_v13  ;;  %v2776_v15 = vld [vmem:[#allocation2 + $0x50] sm:$0xff]  ;;  %v240_v13 = vmul.f32 %v2559_v47, %v2497_v4  ;;  %v2826_v4 = vmul.f32 %v2509_v8, %v2741_v34 }
  0x55   : > { %4446 = vst [vmem:[#allocation46_spill] sm:$0xff] %v2749_v32  ;;  %v358_v32 = vmul.f32 %v2346_v14, %v2776_v15  ;;  %v656_v14 = vadd.f32 %v654_v28, %v630_v27  ;;  %v2822_v28 = vld [vmem:[%s4246_s1 + $0x108] sm:$0xf] }
  0x56   : > { %4447 = vst [vmem:[#allocation47_spill] sm:$0xff] %v2757_v10  ;;  %v278_v10 = vmul.f32 %v2490_v62, %v2563_v12  ;;  %v1010_v62 = vmul.f32 %v2801_v40, %v2465_v51 }
  0x57   : > { %4448 = vst [vmem:[#allocation48_spill] sm:$0xff] %v2770_v49  ;;  %v360_v60 = vadd.f32 %v358_v32, %v333_v31  ;;  %v2830_v32 = vmul.f32 %v2518_v11, %v2741_v34  ;;  %v453_v11 = vadd.f32 %v451_v53, %v2637_v16  ;;  %v452_v16 = vmul.f32 %v2606_v5, %v2837_v45 }
  0x58   : > { %4449 = vst [vmem:[#allocation49_spill] sm:$0xff] %v2776_v15  ;;  %v280_v55 = vadd.f32 %v278_v10, %v2623_v1  ;;  %v464_v53 = vmul.f32 %v2611_v3, %v2837_v45 }
  0x59   : > { %4450 = vst [vmem:[#allocation50_spill] sm:$0xff] %v2782_v0  ;;  %v2811_v0 = vld [vmem:[#allocation2 + $0x14] sm:$0xff]  ;;  %v449_v31 = vadd.f32 %v447_v46, %v360_v60 }
  0x5a   : > { %4451 = vst [vmem:[#allocation51_spill] sm:$0xff] %v2784_v57  ;;  %v267_v57 = vmul.f32 %v2581_v48, %v2527_v41  ;;  %v821_v41 = vadd.f32 %v819_v54, %v656_v14  ;;  %v438_v54 = vmul.f32 %v2822_v28, %v2613_v59  ;;  %v307_v10 = vadd.f32 %v305_v9, %v280_v55  ;;  %v2852_v46 = vld [vmem:[#allocation2 + $0x51] sm:$0xff]  ;;  %v2873_v55 = vld [vmem:[#allocation2 + $0x29] sm:$0xf] }
  0x5b   : > { %4452 = vst [vmem:[#allocation52_spill] sm:$0xff] %v2801_v40  ;;  %v475_v60 = vadd.f32 %v473_v35, %v449_v31  ;;  %v4460_v35 = vld [vmem:[#allocation21_spill] sm:$0xff]  ;;  %v448_v9 = vmul.f32 %v2675_v58, %v2837_v45 }
  0x5c   : > { %4453 = vst [vmem:[#allocation53_spill] sm:$0xff] %v2822_v28  ;;  %v269_v27 = vadd.f32 %v267_v57, %v240_v13  ;;  %v847_v7 = vadd.f32 %v845_v22, %v821_v41  ;;  %v4457_v13 = vld [vmem:[#allocation19_spill] sm:$0xff]  ;;  %v2860_v22 = vmul.f32 %v4460_v35, %v2774_v29  ;;  %v334_v41 = vadd.f32 %v332_v44, %v307_v10 }
  0x5d   : > { %4454 = vst [vmem:[#allocation54_spill] sm:$0xff] %v2826_v4  ;;  %v1036_v4 = vmul.f32 %v2463_v50, %v2811_v0  ;;  %v2848_v1 = vmul.f32 %v4457_v13, %v2774_v29  ;;  %v501_v59 = vadd.f32 %v499_v30, %v475_v60  ;;  %v551_v60 = vmul.f32 %v2386_v24, %v2852_v46 }
  0x5e   : > { %4455 = vst [vmem:[#allocation55_spill] sm:$0xff] %v2830_v32  ;;  %v2842_v32 = vld [vmem:[#allocation2 + $0x58] sm:$0xf]  ;;  %v1012_v57 = vadd.f32 %v1010_v62, %v847_v7  ;;  %v440_v14 = vadd.f32 %v438_v54, %v269_v27  ;;  %v2867_v7 = vld [vmem:[%s4246_s1 + $0x118] sm:$0xf]  ;;  %v2871_v62 = vmul.f32 %v2394_v26, %v2776_v15  ;;  %v479_v27 = vadd.f32 %v477_v43, %v453_v11 }
  0x5f   : > { %4456 = vst [vmem:[#allocation56_spill] sm:$0xff] %v2842_v32  ;;  %v359_v6 = vmul.f32 %v2581_v48, %v2842_v32  ;;  %v2875_v54 = vld [vmem:[#allocation2 + $0x1a] sm:$0xf]  ;;  %v527_v44 = vadd.f32 %v525_v33, %v501_v59  ;;  %v474_v10 = vmul.f32 %v2606_v5, %v2873_v55  ;;  %v2884_v26 = vld [vmem:[%s4246_s1 + $0x128] sm:$0xf]  ;;  %v2889_v43 = vadd.f32 %v2768_v38, %v2640_v19 }
  0x60   : > { %4458 = vst [vmem:[#allocation19_spill] sm:$0xff] %v2848_v1  ;;  %v1038_v31 = vadd.f32 %v1036_v4, %v1012_v57  ;;  %v466_v30 = vadd.f32 %v464_v53, %v440_v14  ;;  %v454_v33 = vadd.f32 %v452_v16, %v2759_v39  ;;  %v2892_v4 = vld [vmem:[#allocation2 + $0x39] sm:$0xf]  ;;  %v478_v14 = vmul.f32 %v2684_v63, %v2873_v55 }
  0x61   : > { %4459 = vst [vmem:[#allocation57_spill] sm:$0xff] %v2852_v46  ;;  %v361_v13 = vadd.f32 %v359_v6, %v334_v41  ;;  %v629_v6 = vmul.f32 %v2867_v7, %v2634_v18  ;;  %v500_v53 = vmul.f32 %v2684_v63, %v2892_v4  ;;  %v4464_v59 = vld [vmem:[#allocation29_spill] sm:$0xff]  ;;  %v2905_v39 = vadd.f32 %v2794_v21, %v479_v27  ;;  %v2922_v21 = vld [vmem:[%s4246_s1 + $0x138] sm:$0xf] }
  0x62   : > { %4461 = vst [vmem:[#allocation58_spill] sm:$0xff] %v2860_v22  ;;  %v1242_v11 = vsel %vm170_vm0, %v1038_v31, 0.0  ;;  %v655_v41 = vmul.f32 %v4464_v59, %v2875_v54  ;;  %v2902_v19 = vld [vmem:[#allocation2 + $0x1b] sm:$0xf]  ;;  %v2909_v38 = vmul.f32 %v2523_v20, %v2842_v32  ;;  %v553_v31 = vadd.f32 %v551_v60, %v527_v44  ;;  %v4471_v60 = vld [vmem:[#allocation31_spill] sm:$0xff]  ;;  %v4475_v22 = vld [vmem:[#allocation8_spill] sm:$0xff] }
  0x63   : > { %4462 = vst [vmem:[#allocation59_spill] sm:$0xff] %v2871_v62  ;;  %1243 = vadd.xlane.f32.xlu2 %v1242_v11  ;;  %v450_v57 = vadd.f32 %v448_v9, %v361_v13  ;;  %v631_v16 = vadd.f32 %v629_v6, %v466_v30  ;;  %v820_v9 = vmul.f32 %v2884_v26, %v2650_v2  ;;  %v2917_v62 = vld [vmem:[#allocation2 + $0x49] sm:$0xf]  ;;  %v2928_v30 = vld [vmem:[#allocation2 + $0x59] sm:$0xf] }
  0x64   : > { %4463 = vst [vmem:[#allocation60_spill] sm:$0xff] %v2892_v4  ;;  %v2915_v13 = vmul.f32 %v2684_v63, %v2837_v45  ;;  %v459_v20 = vmul.f32 %v2670_v61, %v2694_v36  ;;  %v526_v27 = vmul.f32 %v2822_v28, %v2917_v62  ;;  %v846_v6 = vmul.f32 %v4471_v60, %v2902_v19  ;;  %v4473_v36 = vld [vmem:[#allocation30_spill] sm:$0xff] }
  0x65   : > { %4465 = vst [vmem:[#allocation29_spill] sm:$0xff] %v2905_v39  ;;  %v476_v11 = vadd.f32 %v474_v10, %v450_v57  ;;  %v657_v44 = vadd.f32 %v655_v41, %v631_v16  ;;  %v485_v10 = vmul.f32 %v2386_v24, %v2770_v49  ;;  %v2934_v57 = vadd.f32 %v478_v14, %v454_v33  ;;  %v2949_v14 = vld [vmem:[#allocation2 + $0x22] sm:$0xff] }
  0x66   : > { %4466 = vst [vmem:[#allocation61_spill] sm:$0xff] %v2909_v38  ;;  %v552_v15 = vmul.f32 %v2611_v3, %v2928_v30  ;;  %v2938_v38 = vld [vmem:[#allocation2 + $0x1c] sm:$0xf]  ;;  %v461_v1 = vadd.f32 %v459_v20, %v4473_v36  ;;  %v639_v35 = vmul.f32 %v2704_v17, %v2875_v54  ;;  %v2945_v41 = vmul.f32 %v2714_v42, %v2875_v54 }
  0x67   : > { %4467 = vst [vmem:[#allocation62_spill] sm:$0xff] %v2915_v13  ;;  %v502_v46 = vadd.f32 %v500_v53, %v476_v11  ;;  %v822_v16 = vadd.f32 %v820_v9, %v657_v44  ;;  %v1011_v33 = vmul.f32 %v2922_v21, %v4475_v22  ;;  %v2952_v53 = vadd.f32 %v2805_v23, %v553_v31  ;;  %v2965_v44 = vld [vmem:[%s4246_s1 + $0xd0] sm:$0xff] }
  0x68   : > { %4468 = vst [vmem:[#allocation63_spill] sm:$0xff] %v2917_v62  ;;  %v2956_v11 = vmul.f32 %v2719_v52, %v2902_v19  ;;  %v487_v20 = vadd.f32 %v485_v10, %v461_v1  ;;  %v650_v36 = vmul.f32 %v2725_v25, %v2741_v34  ;;  %v290_v23 = vmul.f32 %v2581_v48, %v2563_v12  ;;  %v4480_v1 = vld [vmem:[#allocation18_spill] sm:$0xff] }
  0x69   : > { %4469 = vst [vmem:[#allocation64_spill] sm:$0xff] %v2922_v21  ;;  %v355_v31 = vmul.f32 %v2559_v47, %v2842_v32  ;;  %v676_v34 = vmul.f32 %v2432_v37, %v2949_v14  ;;  %v470_v12 = vmul.f32 %v2675_v58, %v2873_v55  ;;  %v4482_v32 = vld [vmem:[#allocation12_spill] sm:$0xff]  ;;  %v3011_v47 = vld [vmem:[#allocation2 + $0x24] sm:$0xff] }
  0x6a   : > { %4470 = vst [vmem:[#allocation65_spill] sm:$0xff] %v2928_v30  ;;  %v626_v10 = vadd.f32 %v4480_v1, %v487_v20  ;;  %v486_v1 = vmul.f32 %v2611_v3, %v2873_v55 }
  0x6b   : > { %4472 = vst [vmem:[#allocation31_spill] sm:$0xff] %v2934_v57  ;;  %v848_v57 = vadd.f32 %v846_v6, %v822_v16  ;;  %v460_v6 = vmul.f32 %v2822_v28, %v2837_v45  ;;  %v357_v13 = vadd.f32 %v355_v31, %v2696_v56  ;;  %v2991_v45 = vld [vmem:[%s4246_s1 + $0xc8] sm:$0xf]  ;;  %v496_v31 = vmul.f32 %v2606_v5, %v2892_v4 }
  0x6c   : > { %4474 = vst [vmem:[#allocation30_spill] sm:$0xff] %v2945_v41  ;;  %v4478_v41 = vld [vmem:[#allocation7_spill] sm:$0xff]  ;;  %v652_v48 = vadd.f32 %v650_v36, %v626_v10  ;;  %v4489_v36 = vld [vmem:[#allocation42_spill] sm:$0xff]  ;;  %v1033_v5 = vmul.f32 %v2922_v21, %v2938_v38 }
  0x6d   : > { %4476 = vst [vmem:[#allocation8_spill] sm:$0xff] %v2952_v53  ;;  %v1037_v9 = vmul.f32 %v4478_v41, %v2938_v38  ;;  %v1013_v16 = vadd.f32 %v1011_v33, %v848_v57  ;;  %v4481_v53 = vld [vmem:[#allocation27_spill] sm:$0xff]  ;;  %v2998_v33 = vld [vmem:[%s4246_s1 + $0xe0] sm:$0xff] }
  0x6e   : > { %4477 = vst [vmem:[#allocation66_spill] sm:$0xff] %v2956_v11  ;;  %v528_v11 = vadd.f32 %v526_v27, %v502_v46  ;;  %v292_v39 = vadd.f32 %v290_v23, %v4481_v53  ;;  %v2982_v46 = vmul.f32 %v4482_v32, %v2949_v14  ;;  %v4484_v27 = vld [vmem:[#allocation10_spill] sm:$0xff]  ;;  %v4488_v32 = vld [vmem:[#allocation33_spill] sm:$0xff] }
  0x6f   : > { %4479 = vst [vmem:[#allocation67_spill] sm:$0xff] %v2965_v44  ;;  %v815_v20 = vmul.f32 %v2965_v44, %v4484_v27  ;;  %v1039_v56 = vadd.f32 %v1037_v9, %v1013_v16  ;;  %v2993_v57 = vld [vmem:[#allocation2 + $0x23] sm:$0xff]  ;;  %v384_v53 = vadd.f32 %v4488_v32, %v357_v13  ;;  %v3006_v27 = vmul.f32 %v2509_v8, %v2949_v14 }
  0x70   : > { %4483 = vst [vmem:[#allocation18_spill] sm:$0xff] %v2982_v46  ;;  %v436_v23 = vadd.f32 %v4489_v36, %v292_v39  ;;  %v554_v10 = vadd.f32 %v552_v15, %v528_v11  ;;  %v678_v9 = vadd.f32 %v676_v34, %v652_v48  ;;  %v4491_v16 = vld [vmem:[#allocation47_spill] sm:$0xff]  ;;  %v625_v39 = vmul.f32 %v2991_v45, %v2634_v18  ;;  %v4492_v15 = vld [vmem:[#allocation9_spill] sm:$0xff] }
  0x71   : > { %4485 = vst [vmem:[#allocation27_spill] sm:$0xff] %v2991_v45  ;;  %v841_v46 = vmul.f32 %v4491_v16, %v2774_v29  ;;  %v1245_v58 = vsel %vm1177_vm1, %v1039_v56, 0.0  ;;  %v472_v13 = vadd.f32 %v470_v12, %v384_v53  ;;  %v867_v11 = vmul.f32 %v4492_v15, %v2993_v57  ;;  %v3021_v48 = vld [vmem:[#allocation2 + $0x69] sm:$0xf] }
  0x72   : > { %4486 = vst [vmem:[#allocation12_spill] sm:$0xff] %v2993_v57  ;;  %v462_v44 = vadd.f32 %v460_v6, %v436_v23  ;;  %1246 = vadd.xlane.f32.xlu2 %v1245_v58  ;;  %v817_v32 = vadd.f32 %v815_v20, %v678_v9  ;;  %v1006_v8 = vmul.f32 %v2998_v33, %v2465_v51  ;;  %v3023_v56 = vld [vmem:[#allocation2 + $0x2a] sm:$0xf]  ;;  %v3038_v9 = vld [vmem:[%s4246_s1 + $0xd8] sm:$0xf] }
  0x73   : > { %4487 = vst [vmem:[#allocation10_spill] sm:$0xff] %v2998_v33  ;;  %v522_v34 = vmul.f32 %v2684_v63, %v2917_v62  ;;  %v1032_v6 = vmul.f32 %v2801_v40, %v2811_v0  ;;  %v498_v18 = vadd.f32 %v496_v31, %v472_v13  ;;  %v651_v58 = vmul.f32 %v2867_v7, %v2875_v54  ;;  %v3046_v13 = vld [vmem:[#allocation2 + $0x2b] sm:$0xf]  ;;  %v4505_v62 = vld [vmem:[#allocation17_spill] sm:$0xff] }
  0x74   : > { %4490 = vst [vmem:[#allocation33_spill] sm:$0xff] %v3006_v27  ;;  %v488_v12 = vadd.f32 %v486_v1, %v462_v44  ;;  %v3029_v20 = vadd.f32 %v639_v35, %v554_v10  ;;  %v843_v53 = vadd.f32 %v841_v46, %v817_v32  ;;  %v1058_v36 = vmul.f32 %v2463_v50, %v3011_v47  ;;  %v3051_v32 = vld [vmem:[%s4246_s1 + $0xe8] sm:$0xf] }
  0x75   : > { %4493 = vst [vmem:[#allocation42_spill] sm:$0xff] %v3021_v48  ;;  %v548_v23 = vmul.f32 %v2822_v28, %v2928_v30  ;;  %v574_v44 = vmul.f32 %v2611_v3, %v3021_v48  ;;  %v661_v35 = vmul.f32 %v2704_v17, %v3023_v56  ;;  %v677_v46 = vmul.f32 %v4464_v59, %v3023_v56  ;;  %v4497_v48 = vld [vmem:[#allocation50_spill] sm:$0xff] }
  0x76   : > { %4494 = vst [vmem:[#allocation9_spill] sm:$0xff] %v3029_v20  ;;  %v627_v1 = vadd.f32 %v625_v39, %v488_v12  ;;  %v869_v31 = vadd.f32 %v867_v11, %v843_v53  ;;  %v524_v10 = vadd.f32 %v522_v34, %v498_v18  ;;  %v481_v63 = vmul.f32 %v2670_v61, %v2770_v49  ;;  %v3067_v18 = vld [vmem:[#allocation2 + $0x2c] sm:$0xf] }
  0x77   : > { %4495 = vst [vmem:[#allocation68_spill] sm:$0xff] %v3038_v9  ;;  %v507_v39 = vmul.f32 %v2386_v24, %v4497_v48  ;;  %v3059_v17 = vmul.f32 %v2714_v42, %v3023_v56  ;;  %v3063_v11 = vmul.f32 %v2991_v45, %v3023_v56  ;;  %v816_v34 = vmul.f32 %v3038_v9, %v2650_v2 }
  0x78   : > { %4496 = vst [vmem:[#allocation69_spill] sm:$0xff] %v3051_v32  ;;  %v653_v12 = vadd.f32 %v651_v58, %v627_v1  ;;  %v1008_v53 = vadd.f32 %v1006_v8, %v869_v31  ;;  %v842_v61 = vmul.f32 %v2884_v26, %v2902_v19  ;;  %v3073_v58 = vmul.f32 %v2719_v52, %v3046_v13  ;;  %v3082_v8 = vld [vmem:[#allocation2 + $0x32] sm:$0xff] }
  0x79   : > { %4498 = vst [vmem:[#allocation70_spill] sm:$0xff] %v3059_v17  ;;  %v483_v1 = vadd.f32 %v481_v63, %v2889_v43  ;;  %v868_v49 = vmul.f32 %v4471_v60, %v3046_v13  ;;  %v1007_v30 = vmul.f32 %v3051_v32, %v4475_v22  ;;  %v550_v17 = vadd.f32 %v548_v23, %v524_v10  ;;  %v3088_v43 = vld [vmem:[#allocation2 + $0x33] sm:$0xff] }
  0x7a   : > { %4499 = vst [vmem:[#allocation71_spill] sm:$0xff] %v3063_v11  ;;  %v679_v48 = vadd.f32 %v677_v46, %v653_v12  ;;  %v1034_v31 = vadd.f32 %v1032_v6, %v1008_v53  ;;  %v1059_v52 = vmul.f32 %v4478_v41, %v3067_v18  ;;  %v672_v63 = vmul.f32 %v2725_v25, %v2949_v14  ;;  %v4503_v46 = vld [vmem:[#allocation43_spill] sm:$0xff]  ;;  %v4504_v12 = vld [vmem:[#allocation62_spill] sm:$0xff] }
  0x7b   : > { %4500 = vst [vmem:[#allocation72_spill] sm:$0xff] %v3073_v58  ;;  %v509_v58 = vadd.f32 %v507_v39, %v483_v1  ;;  %v458_v42 = vadd.f32 %v4504_v12, %v4503_v46  ;;  %v482_v11 = vmul.f32 %v2822_v28, %v2873_v55  ;;  %v698_v23 = vmul.f32 %v2432_v37, %v3082_v8 }
  0x7c   : > { %4501 = vst [vmem:[#allocation73_spill] sm:$0xff] %v3082_v8  ;;  %v818_v20 = vadd.f32 %v816_v34, %v679_v48  ;;  %v1060_v27 = vadd.f32 %v1058_v36, %v1034_v31  ;;  %v3100_v48 = vld [vmem:[%s4246_s1 + $0x90] sm:$0xff]  ;;  %v508_v10 = vmul.f32 %v2611_v3, %v2892_v4  ;;  %v863_v55 = vmul.f32 %v4491_v16, %v2993_v57  ;;  %v3108_v36 = vld [vmem:[#allocation2 + $0x34] sm:$0xff] }
  0x7d   : > { %4502 = vst [vmem:[#allocation74_spill] sm:$0xff] %v3088_v43  ;;  %v622_v6 = vadd.f32 %v4505_v62, %v509_v58  ;;  %v4507_v34 = vld [vmem:[#allocation67_spill] sm:$0xff]  ;;  %v484_v62 = vadd.f32 %v482_v11, %v458_v42  ;;  %v576_v1 = vadd.f32 %v574_v44, %v550_v17  ;;  %v889_v12 = vmul.f32 %v4492_v15, %v3088_v43  ;;  %v3118_v16 = vld [vmem:[#allocation2 + $0x3a] sm:$0xf]  ;;  %v3123_v17 = vld [vmem:[%s4246_s1 + $0x88] sm:$0xf] }
  0x7e   : > { %4506 = vst [vmem:[#allocation43_spill] sm:$0xff] %v3100_v48  ;;  %v844_v39 = vadd.f32 %v842_v61, %v818_v20  ;;  %v837_v53 = vmul.f32 %v4507_v34, %v2774_v29  ;;  %v1306_v58 = vsel %vm170_vm0, %v1060_v27, 0.0  ;;  %v4509_v31 = vld [vmem:[#allocation55_spill] sm:$0xff]  ;;  %v1002_v61 = vmul.f32 %v3100_v48, %v2465_v51  ;;  %v4514_v11 = vld [vmem:[#allocation45_spill] sm:$0xff] }
  0x7f   : > { %4508 = vst [vmem:[#allocation62_spill] sm:$0xff] %v3108_v36  ;;  %v648_v46 = vadd.f32 %v4509_v31, %v622_v6  ;;  %1307 = vadd.xlane.f32.xlu2 %v1306_v58  ;;  %v510_v29 = vadd.f32 %v508_v10, %v484_v62  ;;  %v647_v20 = vmul.f32 %v2991_v45, %v2875_v54  ;;  %v4516_v62 = vld [vmem:[#allocation51_spill] sm:$0xff]  ;;  %v4518_v45 = vld [vmem:[#allocation29_spill] sm:$0xff] }
  0x80   : > { %v870_v3 = vadd.f32 %v868_v49, %v844_v39  ;;  %4510 = vst [vmem:[#allocation17_spill] sm:$0xff] %v3123_v17  ;;  %v3127_v27 = vmul.f32 %v2998_v33, %v2811_v0  ;;  %v3131_v49 = vmul.f32 %v2801_v40, %v3011_v47  ;;  %v3135_v44 = vmul.f32 %v2463_v50, %v3108_v36  ;;  %v3140_v39 = vld [vmem:[#allocation2 + $0x3b] sm:$0xf] }
  0x81   : > { %v674_v42 = vadd.f32 %v672_v63, %v648_v46  ;;  %v623_v6 = vadd.f32 %v4514_v11, %v510_v29  ;;  %v673_v10 = vmul.f32 %v2867_v7, %v3023_v56  ;;  %v3145_v63 = vld [vmem:[%s4246_s1 + $0x98] sm:$0xf]  ;;  %v529_v58 = vmul.f32 %v2386_v24, %v4516_v62 }
  0x82   : > { %4511 = vst [vmem:[#allocation55_spill] sm:$0xff] %v3127_v27  ;;  %v1009_v54 = vadd.f32 %v1007_v30, %v870_v3  ;;  %v3149_v31 = vadd.f32 %v661_v35, %v576_v1  ;;  %v699_v3 = vmul.f32 %v4464_v59, %v3118_v16  ;;  %v812_v30 = vmul.f32 %v3123_v17, %v2650_v2 }
  0x83   : > { %4512 = vst [vmem:[#allocation75_spill] sm:$0xff] %v3131_v49  ;;  %v700_v46 = vadd.f32 %v698_v23, %v674_v42  ;;  %v649_v29 = vadd.f32 %v647_v20, %v623_v6  ;;  %v838_v11 = vmul.f32 %v3038_v9, %v2902_v19  ;;  %v4519_v49 = vld [vmem:[#allocation26_spill] sm:$0xff]  ;;  %v864_v24 = vmul.f32 %v2884_v26, %v3046_v13  ;;  %v4521_v20 = vld [vmem:[#allocation15_spill] sm:$0xff] }
  0x84   : > { %4513 = vst [vmem:[#allocation76_spill] sm:$0xff] %v3135_v44  ;;  %v1035_v56 = vadd.f32 %v1033_v5, %v1009_v54  ;;  %v531_v44 = vadd.f32 %v529_v58, %v4518_v45  ;;  %v890_v35 = vmul.f32 %v4471_v60, %v3140_v39  ;;  %v1003_v23 = vmul.f32 %v3145_v63, %v4475_v22  ;;  %v3165_v5 = vld [vmem:[#allocation2 + $0x3c] sm:$0xf]  ;;  %v4522_v54 = vld [vmem:[#allocation13_spill] sm:$0xff]  ;;  %v3170_v6 = vld [vmem:[#allocation2 + $0x42] sm:$0xff] }
  0x85   : > { %4515 = vst [vmem:[#allocation45_spill] sm:$0xff] %v3145_v63  ;;  %v813_v27 = vadd.f32 %v4519_v49, %v700_v46  ;;  %v675_v2 = vadd.f32 %v673_v10, %v649_v29  ;;  %v668_v45 = vmul.f32 %v4522_v54, %v2949_v14  ;;  %v1029_v58 = vmul.f32 %v3051_v32, %v2938_v38  ;;  %v3187_v14 = vld [vmem:[%s4246_s1 + $0x40] sm:$0xff]  ;;  %v3201_v32 = vld [vmem:[#allocation2 + $0x44] sm:$0xff] }
  0x86   : > { %4517 = vst [vmem:[#allocation77_spill] sm:$0xff] %v3149_v31  ;;  %v1061_v1 = vadd.f32 %v1059_v52, %v1035_v56  ;;  %v618_v42 = vadd.f32 %v4521_v20, %v531_v44  ;;  %v3176_v46 = vmul.f32 %v2922_v21, %v3067_v18  ;;  %v694_v52 = vmul.f32 %v2725_v25, %v3082_v8  ;;  %v4524_v44 = vld [vmem:[#allocation54_spill] sm:$0xff] }
  0x87   : > { %4520 = vst [vmem:[#allocation29_spill] sm:$0xff] %v3165_v5  ;;  %v839_v49 = vadd.f32 %v837_v53, %v813_v27  ;;  %v701_v56 = vadd.f32 %v699_v3, %v675_v2  ;;  %v3182_v20 = vld [vmem:[#allocation2 + $0x43] sm:$0xff]  ;;  %v504_v53 = vmul.f32 %v2822_v28, %v2892_v4  ;;  %v3193_v62 = vmul.f32 %v4478_v41, %v3165_v5  ;;  %v4528_v2 = vld [vmem:[#allocation25_spill] sm:$0xff] }
  0x88   : > { %4523 = vst [vmem:[#allocation26_spill] sm:$0xff] %v3170_v6  ;;  %v1309_v10 = vsel %vm1177_vm1, %v1061_v1, 0.0  ;;  %v644_v29 = vadd.f32 %v4524_v44, %v618_v42  ;;  %v720_v3 = vmul.f32 %v2432_v37, %v3170_v6  ;;  %v4527_v1 = vld [vmem:[#allocation63_spill] sm:$0xff]  ;;  %v859_v21 = vmul.f32 %v4507_v34, %v2993_v57 }
  0x89   : > { %4525 = vst [vmem:[#allocation15_spill] sm:$0xff] %v3182_v20  ;;  %1310 = vadd.xlane.f32.xlu1 %v1309_v10  ;;  %v865_v27 = vadd.f32 %v863_v55, %v839_v49  ;;  %v530_v42 = vmul.f32 %v4528_v2, %v4527_v1  ;;  %v814_v44 = vadd.f32 %v812_v30, %v701_v56  ;;  %v4530_v28 = vld [vmem:[#allocation31_spill] sm:$0xff]  ;;  %v4539_v1 = vld [vmem:[#allocation33_spill] sm:$0xff] }
  0x8a   : > { %4526 = vst [vmem:[#allocation13_spill] sm:$0xff] %v3187_v14  ;;  %v670_v31 = vadd.f32 %v668_v45, %v644_v29  ;;  %v506_v10 = vadd.f32 %v504_v53, %v4530_v28  ;;  %v4531_v49 = vld [vmem:[#allocation47_spill] sm:$0xff]  ;;  %v911_v41 = vmul.f32 %v4492_v15, %v3182_v20  ;;  %v3210_v5 = vmul.f32 %v3187_v14, %v2465_v51  ;;  %v4535_v53 = vld [vmem:[#allocation44_spill] sm:$0xff] }
  0x8b   : > { %4529 = vst [vmem:[#allocation54_spill] sm:$0xff] %v3201_v32  ;;  %v891_v55 = vadd.f32 %v889_v12, %v865_v27  ;;  %v885_v4 = vmul.f32 %v4531_v49, %v3088_v43  ;;  %v840_v30 = vadd.f32 %v838_v11, %v814_v44  ;;  %v3214_v56 = vmul.f32 %v3100_v48, %v2811_v0  ;;  %v3228_v11 = vld [vmem:[#allocation2 + $0x4a] sm:$0xf] }
  0x8c   : > { %v696_v45 = vadd.f32 %v694_v52, %v670_v31  ;;  %v532_v29 = vadd.f32 %v530_v42, %v506_v10  ;;  %v3218_v28 = vmul.f32 %v2998_v33, %v3011_v47  ;;  %v3222_v12 = vmul.f32 %v2801_v40, %v3108_v36  ;;  %v3233_v42 = vld [vmem:[#allocation2 + $0x52] sm:$0xff]  ;;  %v4537_v44 = vld [vmem:[#allocation55_spill] sm:$0xff] }
  0x8d   : > { %v1004_v2 = vadd.f32 %v1002_v61, %v891_v55  ;;  %v3226_v51 = vmul.f32 %v2463_v50, %v3201_v32  ;;  %v866_v31 = vadd.f32 %v864_v24, %v840_v30  ;;  %v695_v61 = vmul.f32 %v2867_v7, %v3118_v16  ;;  %4536 = vst [vmem:[#allocation44_spill] sm:$0xff] %v3233_v42  ;;  %v4538_v55 = vld [vmem:[#allocation8_spill] sm:$0xff] }
  0x8e   : > { %4532 = vst [vmem:[#allocation31_spill] sm:$0xff] %v3218_v28  ;;  %v722_v52 = vadd.f32 %v720_v3, %v696_v45  ;;  %v619_v27 = vadd.f32 %v4535_v53, %v532_v29  ;;  %v690_v50 = vmul.f32 %v4522_v54, %v3082_v8  ;;  %v4540_v3 = vld [vmem:[#allocation23_spill] sm:$0xff]  ;;  %v4541_v45 = vld [vmem:[#allocation30_spill] sm:$0xff]  ;;  %v721_v53 = vmul.f32 %v4464_v59, %v3228_v11 }
  0x8f   : > { %4533 = vst [vmem:[#allocation78_spill] sm:$0xff] %v3222_v12  ;;  %v1030_v10 = vadd.f32 %v4537_v44, %v1004_v2  ;;  %v666_v12 = vadd.f32 %v4539_v1, %v4538_v55  ;;  %v892_v24 = vadd.f32 %v890_v35, %v866_v31  ;;  %v3246_v28 = vld [vmem:[#allocation2 + $0x4b] sm:$0xf]  ;;  %v834_v1 = vmul.f32 %v3123_v17, %v2902_v19  ;;  %v3254_v54 = vld [vmem:[%s4246_s1 + $0x48] sm:$0xf] }
  0x90   : > { %4534 = vst [vmem:[#allocation79_spill] sm:$0xff] %v3226_v51  ;;  %v716_v51 = vmul.f32 %v2725_v25, %v3170_v6  ;;  %v809_v30 = vadd.f32 %v4540_v3, %v722_v52  ;;  %v645_v29 = vadd.f32 %v4541_v45, %v619_v27  ;;  %v4542_v2 = vld [vmem:[#allocation75_spill] sm:$0xff]  ;;  %v742_v31 = vmul.f32 %v2432_v37, %v3233_v42  ;;  %v4544_v27 = vld [vmem:[#allocation58_spill] sm:$0xff] }
  0x91   : > { %v1056_v44 = vadd.f32 %v4542_v2, %v1030_v10  ;;  %4543 = vst [vmem:[#allocation55_spill] sm:$0xff] %v3254_v54  ;;  %v692_v35 = vadd.f32 %v690_v50, %v666_v12  ;;  %v1005_v52 = vadd.f32 %v1003_v23, %v892_v24  ;;  %v4545_v3 = vld [vmem:[#allocation71_spill] sm:$0xff]  ;;  %v860_v10 = vmul.f32 %v3038_v9, %v3046_v13  ;;  %v4546_v2 = vld [vmem:[#allocation76_spill] sm:$0xff] }
  0x92   : > { %v835_v55 = vadd.f32 %v4544_v27, %v809_v30  ;;  %v671_v45 = vadd.f32 %v4545_v3, %v645_v29  ;;  %v886_v19 = vmul.f32 %v2884_v26, %v3140_v39  ;;  %v912_v6 = vmul.f32 %v4471_v60, %v3246_v28  ;;  %v4550_v3 = vld [vmem:[#allocation39_spill] sm:$0xff] }
  0x93   : > { %v1082_v25 = vadd.f32 %v4546_v2, %v1056_v44  ;;  %v718_v50 = vadd.f32 %v716_v51, %v692_v35  ;;  %v1031_v12 = vadd.f32 %v1029_v58, %v1005_v52  ;;  %v3269_v23 = vmul.f32 %v3254_v54, %v4475_v22  ;;  %v4547_v44 = vld [vmem:[#allocation21_spill] sm:$0xff]  ;;  %v4549_v52 = vld [vmem:[#allocation19_spill] sm:$0xff]  ;;  %v4552_v2 = vld [vmem:[#allocation46_spill] sm:$0xff] }
  0x94   : > { %v861_v8 = vadd.f32 %v859_v21, %v835_v55  ;;  %v697_v37 = vadd.f32 %v695_v61, %v671_v45  ;;  %v3274_v30 = vmul.f32 %v3145_v63, %v2938_v38  ;;  %v855_v27 = vmul.f32 %v4547_v44, %v2993_v57  ;;  %v4548_v61 = vld [vmem:[#allocation69_spill] sm:$0xff] }
  0x95   : > { %v1370_v24 = vsel %vm170_vm0, %v1082_v25, 0.0  ;;  %v744_v29 = vadd.f32 %v742_v31, %v718_v50  ;;  %v1057_v51 = vadd.f32 %v3176_v46, %v1031_v12  ;;  %v3281_v35 = vmul.f32 %v4548_v61, %v3067_v18  ;;  %v3283_v22 = vld [vmem:[#allocation2 + $0x5a] sm:$0xf]  ;;  %v3285_v25 = vld [vmem:[#allocation2 + $0x4c] sm:$0xf]  ;;  %v4551_v46 = vld [vmem:[#allocation27_spill] sm:$0xff] }
  0x96   : > { %1371 = vadd.xlane.f32.xlu0 %v1370_v24  ;;  %v887_v58 = vadd.f32 %v885_v4, %v861_v8  ;;  %v723_v21 = vadd.f32 %v721_v53, %v697_v37  ;;  %v881_v31 = vmul.f32 %v4507_v34, %v3088_v43  ;;  %v687_v45 = vmul.f32 %v4550_v3, %v3118_v16  ;;  %v4553_v12 = vld [vmem:[#allocation29_spill] sm:$0xff]  ;;  %v4554_v37 = vld [vmem:[#allocation64_spill] sm:$0xff] }
  0x97   : > { %v831_v55 = vadd.f32 %v4549_v52, %v744_v29  ;;  %v713_v4 = vmul.f32 %v4551_v46, %v3228_v11  ;;  %v1083_v8 = vadd.f32 %v3193_v62, %v1057_v51  ;;  %v3298_v24 = vmul.f32 %v4554_v37, %v4553_v12  ;;  %v3300_v44 = vld [vmem:[#allocation2 + $0x53] sm:$0xff]  ;;  %v3302_v29 = vld [vmem:[#allocation2 + $0x6a] sm:$0xf] }
  0x98   : > { %v913_v53 = vadd.f32 %v911_v41, %v887_v58  ;;  %v810_v50 = vadd.f32 %v4552_v2, %v723_v21  ;;  %v907_v34 = vmul.f32 %v4531_v49, %v3182_v20  ;;  %v4555_v43 = vld [vmem:[#allocation77_spill] sm:$0xff]  ;;  %v739_v62 = vmul.f32 %v2867_v7, %v3283_v22  ;;  %v4556_v21 = vld [vmem:[#allocation7_spill] sm:$0xff] }
  0x99   : > { %v857_v52 = vadd.f32 %v855_v27, %v831_v55  ;;  %v689_v57 = vadd.f32 %v687_v45, %v4555_v43  ;;  %v1373_v41 = vsel %vm1177_vm1, %v1083_v8, 0.0  ;;  %v3313_v2 = vmul.f32 %v4556_v21, %v3285_v25  ;;  %v4561_v21 = vld [vmem:[#allocation78_spill] sm:$0xff] }
  0x9a   : > { %v1000_v51 = vadd.f32 %v3210_v5, %v913_v53  ;;  %v836_v58 = vadd.f32 %v834_v1, %v810_v50  ;;  %1374 = vadd.xlane.f32.xlu2 %v1373_v41  ;;  %v933_v27 = vmul.f32 %v4492_v15, %v3300_v44  ;;  %v765_v43 = vmul.f32 %v4464_v59, %v3302_v29 }
  0x9b   : > { %v883_v42 = vadd.f32 %v881_v31, %v857_v52  ;;  %v715_v55 = vadd.f32 %v713_v4, %v689_v57  ;;  %v1020_v5 = vmul.f32 %v3187_v14, %v2811_v0  ;;  %v1046_v1 = vmul.f32 %v3100_v48, %v3011_v47  ;;  %v4557_v4 = vld [vmem:[#allocation31_spill] sm:$0xff]  ;;  %v3329_v52 = vld [vmem:[#allocation2 + $0x54] sm:$0xff] }
  0x9c   : > { %v1026_v45 = vadd.f32 %v3214_v56, %v1000_v51  ;;  %v862_v49 = vadd.f32 %v860_v10, %v836_v58  ;;  %v1072_v31 = vmul.f32 %v2998_v33, %v3108_v36  ;;  %v1098_v15 = vmul.f32 %v2801_v40, %v3201_v32  ;;  %4558 = vst [vmem:[#allocation8_spill] sm:$0xff] %v3329_v52  ;;  %v4559_v56 = vld [vmem:[#allocation9_spill] sm:$0xff]  ;;  %v4560_v10 = vld [vmem:[#allocation70_spill] sm:$0xff]  ;;  %v4565_v40 = vld [vmem:[#allocation79_spill] sm:$0xff] }
  0x9d   : > { %v909_v8 = vadd.f32 %v907_v34, %v883_v42  ;;  %v741_v57 = vadd.f32 %v739_v62, %v715_v55  ;;  %v667_v41 = vadd.f32 %v4560_v10, %v4559_v56  ;;  %v691_v0 = vmul.f32 %v4551_v46, %v3118_v16  ;;  %v3337_v58 = vld [vmem:[#allocation2 + $0x5b] sm:$0xf]  ;;  %v3342_v55 = vld [vmem:[#allocation2 + $0x6b] sm:$0xf] }
  0x9e   : > { %v1052_v53 = vadd.f32 %v4557_v4, %v1026_v45  ;;  %v888_v50 = vadd.f32 %v886_v19, %v862_v49  ;;  %v878_v42 = vmul.f32 %v3123_v17, %v3140_v39  ;;  %v717_v62 = vmul.f32 %v2867_v7, %v3228_v11  ;;  %4562 = vst [vmem:[#allocation33_spill] sm:$0xff] %v3342_v55 }
  0x9f   : > { %v935_v51 = vadd.f32 %v933_v27, %v909_v8  ;;  %v767_v34 = vadd.f32 %v765_v43, %v741_v57  ;;  %v693_v45 = vadd.f32 %v691_v0, %v667_v41  ;;  %v743_v4 = vmul.f32 %v4464_v59, %v3283_v22  ;;  %v4563_v27 = vld [vmem:[#allocation11_spill] sm:$0xff]  ;;  %v4564_v8 = vld [vmem:[#allocation72_spill] sm:$0xff] }
  0xa0   : > { %v1078_v49 = vadd.f32 %v4561_v21, %v1052_v53  ;;  %v914_v19 = vadd.f32 %v912_v6, %v888_v50  ;;  %v1124_v43 = vmul.f32 %v4563_v27, %v3329_v52  ;;  %v904_v10 = vmul.f32 %v3038_v9, %v3246_v28 }
  0xa1   : > { %v1022_v56 = vadd.f32 %v1020_v5, %v935_v51  ;;  %v854_v57 = vadd.f32 %v4564_v8, %v767_v34  ;;  %v930_v6 = vmul.f32 %v2884_v26, %v3337_v58  ;;  %v719_v50 = vadd.f32 %v717_v62, %v693_v45  ;;  %v4571_v8 = vld [vmem:[#allocation28_spill] sm:$0xff] }
  0xa2   : > { %v1104_v33 = vadd.f32 %v4565_v40, %v1078_v49  ;;  %v1001_v53 = vadd.f32 %v3269_v23, %v914_v19  ;;  %v956_v5 = vmul.f32 %v4471_v60, %v3342_v55  ;;  %v1043_v51 = vmul.f32 %v3254_v54, %v3067_v18  ;;  %v3368_v19 = vld [vmem:[#allocation2 + $0x5c] sm:$0xf] }
  0xa3   : > { %v1048_v41 = vadd.f32 %v1046_v1, %v1022_v56  ;;  %v880_v0 = vadd.f32 %v878_v42, %v854_v57  ;;  %v745_v27 = vadd.f32 %v743_v4, %v719_v50  ;;  %v856_v40 = vmul.f32 %v3123_v17, %v3046_v13  ;;  %4566 = vst [vmem:[#allocation23_spill] sm:$0xff] %v3368_v19  ;;  %v4569_v4 = vld [vmem:[#allocation32_spill] sm:$0xff]  ;;  %v4570_v56 = vld [vmem:[#allocation61_spill] sm:$0xff] }
  0xa4   : > { %v1434_v34 = vsel %vm170_vm0, %v1104_v33, 0.0  ;;  %v1027_v21 = vadd.f32 %v3274_v30, %v1001_v53  ;;  %v1069_v1 = vmul.f32 %v3145_v63, %v4553_v12  ;;  %v882_v42 = vmul.f32 %v3038_v9, %v3140_v39  ;;  %v3370_v33 = vld [vmem:[#allocation2 + $0x6c] sm:$0xf]  ;;  %v4568_v30 = vld [vmem:[#allocation66_spill] sm:$0xff] }
  0xa5   : > { %1435 = vadd.xlane.f32.xlu2 %v1434_v34  ;;  %v1074_v23 = vadd.f32 %v1072_v31, %v1048_v41  ;;  %v906_v49 = vadd.f32 %v904_v10, %v880_v0  ;;  %4567 = vst [vmem:[#allocation30_spill] sm:$0xff] %v3370_v33  ;;  %v832_v45 = vadd.f32 %v4568_v30, %v745_v27  ;;  %v4572_v31 = vld [vmem:[#allocation20_spill] sm:$0xff]  ;;  %v4574_v27 = vld [vmem:[#allocation35_spill] sm:$0xff] }
  0xa6   : > { %v1053_v62 = vadd.f32 %v3281_v35, %v1027_v21  ;;  %v353_v13 = vadd.f32 %v4570_v56, %v4569_v4  ;;  %v378_v57 = vmul.f32 %v4572_v31, %v4571_v8  ;;  %v1095_v50 = vmul.f32 %v4548_v61, %v3285_v25  ;;  %v4573_v21 = vld [vmem:[#allocation60_spill] sm:$0xff] }
  0xa7   : > { %v1100_v10 = vadd.f32 %v1098_v15, %v1074_v23  ;;  %v932_v53 = vadd.f32 %v930_v6, %v906_v49  ;;  %v908_v35 = vmul.f32 %v2884_v26, %v3246_v28  ;;  %v858_v0 = vadd.f32 %v856_v40, %v832_v45  ;;  %v3389_v15 = vld [vmem:[%s4246_s1 + $0x188] sm:$0xf]  ;;  %v4575_v49 = vld [vmem:[#allocation37_spill] sm:$0xff]  ;;  %v4577_v45 = vld [vmem:[#allocation24_spill] sm:$0xff] }
  0xa8   : > { %v1079_v41 = vadd.f32 %v3298_v24, %v1053_v62  ;;  %v380_v34 = vadd.f32 %v378_v57, %v353_v13  ;;  %v492_v30 = vmul.f32 %v4574_v27, %v4573_v21  ;;  %v1121_v4 = vmul.f32 %v4554_v37, %v3368_v19 }
  0xa9   : > { %v958_v52 = vadd.f32 %v956_v5, %v932_v53  ;;  %v1147_v6 = vmul.f32 %v3389_v15, %v3370_v33  ;;  %v934_v24 = vmul.f32 %v4471_v60, %v3337_v58  ;;  %v884_v23 = vadd.f32 %v882_v42, %v858_v0  ;;  %v4576_v5 = vld [vmem:[#allocation63_spill] sm:$0xff]  ;;  %v3403_v53 = vld [vmem:[#allocation2 + $0x79] sm:$0xf] }
  0xaa   : > { %v1105_v40 = vadd.f32 %v3313_v2, %v1079_v41  ;;  %v407_v62 = vadd.f32 %v4575_v49, %v380_v34  ;;  %v518_v56 = vmul.f32 %v4577_v45, %v4576_v5  ;;  %v1126_v13 = vadd.f32 %v1124_v43, %v1100_v10  ;;  %v4578_v42 = vld [vmem:[#allocation65_spill] sm:$0xff]  ;;  %v4579_v41 = vld [vmem:[#allocation36_spill] sm:$0xff]  ;;  %v4580_v10 = vld [vmem:[#allocation42_spill] sm:$0xff] }
  0xab   : > { %v1045_v8 = vadd.f32 %v1043_v51, %v958_v52  ;;  %v1021_v31 = vmul.f32 %v3254_v54, %v2938_v38  ;;  %v1047_v57 = vmul.f32 %v3145_v63, %v3067_v18  ;;  %v910_v27 = vadd.f32 %v908_v35, %v884_v23  ;;  %v3418_v49 = vld [vmem:[#allocation2 + $0x7a] sm:$0xf] }
  0xac   : > { %v1437_v21 = vsel %vm1177_vm1, %v1105_v40, 0.0  ;;  %v494_v2 = vadd.f32 %v492_v30, %v407_v62  ;;  %v544_v0 = vmul.f32 %v4579_v41, %v4578_v42  ;;  %v1073_v52 = vmul.f32 %v4548_v61, %v4553_v12  ;;  %v4581_v40 = vld [vmem:[#allocation53_spill] sm:$0xff]  ;;  %4583 = vst [vmem:[#allocation75_spill] sm:$0xff] %v3418_v49  ;;  %v4584_v45 = vld [vmem:[#allocation38_spill] sm:$0xff] }
  0xad   : > { %1438 = vadd.xlane.f32.xlu0 %v1437_v21  ;;  %v1071_v34 = vadd.f32 %v1069_v1, %v1045_v8  ;;  %v1099_v38 = vmul.f32 %v4554_v37, %v3285_v25  ;;  %v1125_v18 = vmul.f32 %v3389_v15, %v3368_v19  ;;  %v936_v43 = vadd.f32 %v934_v24, %v910_v27  ;;  %v4582_v30 = vld [vmem:[#allocation25_spill] sm:$0xff] }
  0xae   : > { %v520_v51 = vadd.f32 %v518_v56, %v494_v2  ;;  %v570_v35 = vmul.f32 %v4581_v40, %v4580_v10  ;;  %v596_v23 = vmul.f32 %v4582_v30, %v3403_v53  ;;  %v1498_v1 = vsel %vm170_vm0, %v1126_v13, 0.0 }
  0xaf   : > { %v1097_v62 = vadd.f32 %v1095_v50, %v1071_v34  ;;  %v683_v8 = vmul.f32 %v4584_v45, %v3118_v16  ;;  %v709_v21 = vmul.f32 %v4550_v3, %v3228_v11  ;;  %v1023_v41 = vadd.f32 %v1021_v31, %v936_v43  ;;  %v4585_v50 = vld [vmem:[#allocation40_spill] sm:$0xff]  ;;  %v3439_v34 = vld [vmem:[#allocation2 + $0x7b] sm:$0xf] }
  0xb0   : > { %v546_v24 = vadd.f32 %v544_v0, %v520_v51  ;;  %v735_v56 = vmul.f32 %v4551_v46, %v3283_v22  ;;  %v3429_v27 = vmul.f32 %v2867_v7, %v3302_v29  ;;  %v3433_v13 = vmul.f32 %v4464_v59, %v3418_v49  ;;  %4586 = vst [vmem:[#allocation58_spill] sm:$0xff] %v3439_v34  ;;  %v3444_v3 = vld [vmem:[%s4246_s1 + $0xf0] sm:$0xff]  ;;  %v4588_v31 = vld [vmem:[#allocation49_spill] sm:$0xff] }
  0xb1   : > { %v1123_v2 = vadd.f32 %v1121_v4, %v1097_v62  ;;  %v3437_v16 = vmul.f32 %v4585_v50, %v3140_v39  ;;  %4587 = vst [vmem:[#allocation71_spill] sm:$0xff] %v3444_v3  ;;  %v354_v0 = vmul.f32 %v3444_v3, %v4588_v31  ;;  %v1049_v43 = vadd.f32 %v1047_v57, %v1023_v41  ;;  %v4589_v62 = vld [vmem:[#allocation22_spill] sm:$0xff]  ;;  %v3464_v57 = vld [vmem:[%s4246_s1 + $0x10] sm:$0xff] }
  0xb2   : > { %v572_v4 = vadd.f32 %v570_v35, %v546_v24  ;;  %v3450_v59 = vmul.f32 %v3123_v17, %v3246_v28  ;;  %v3454_v39 = vmul.f32 %v3038_v9, %v3337_v58  ;;  %v3458_v30 = vmul.f32 %v2884_v26, %v3342_v55  ;;  %v4590_v35 = vld [vmem:[#allocation48_spill] sm:$0xff] }
  0xb3   : > { %v1149_v51 = vadd.f32 %v1147_v6, %v1123_v2  ;;  %v356_v45 = vadd.f32 %v354_v0, %v4589_v62  ;;  %v469_v41 = vmul.f32 %v3464_v57, %v4590_v35  ;;  %v1075_v24 = vadd.f32 %v1073_v52, %v1049_v43  ;;  %v3476_v2 = vld [vmem:[#allocation2 + $0x7c] sm:$0xf]  ;;  %v3491_v43 = vld [vmem:[#allocation2 + $0x61] sm:$0xff] }
  0xb4   : > { %v598_v50 = vadd.f32 %v596_v23, %v572_v4  ;;  %v3470_v3 = vmul.f32 %v4471_v60, %v3439_v34  ;;  %v3474_v6 = vmul.f32 %v3254_v54, %v4553_v12  ;;  %4592 = vst [vmem:[#allocation21_spill] sm:$0xff] %v3476_v2  ;;  %v3481_v62 = vmul.f32 %v3145_v63, %v3285_v25  ;;  %v4594_v35 = vld [vmem:[#allocation14_spill] sm:$0xff] }
  0xb5   : > { %1499 = vadd.xlane.f32.xlu0 %v1498_v1  ;;  %v1565_v0 = vsel %vm1177_vm1, %v1149_v51, 0.0  ;;  %v383_v52 = vadd.f32 %v4594_v35, %v356_v45  ;;  %v3487_v60 = vld [vmem:[%s4246_s1 + $0x60] sm:$0xff]  ;;  %4596 = vst [vmem:[#allocation39_spill] sm:$0xff] %v3491_v43  ;;  %v1101_v1 = vadd.f32 %v1099_v38, %v1075_v24  ;;  %v3495_v51 = vmul.f32 %v4548_v61, %v3368_v19  ;;  %v4601_v38 = vld [vmem:[#allocation51_spill] sm:$0xff] }
  0xb6   : > { %4591 = vst [vmem:[#allocation76_spill] sm:$0xff] %v3474_v6  ;;  %v4595_v23 = vld [vmem:[#allocation50_spill] sm:$0xff]  ;;  %1566 = vadd.xlane.f32.xlu2 %v1565_v0  ;;  %v685_v4 = vadd.f32 %v683_v8, %v598_v50  ;;  %v3499_v45 = vmul.f32 %v4554_v37, %v3370_v33  ;;  %v3503_v35 = vmul.f32 %v3389_v15, %v3476_v2  ;;  %v4602_v24 = vld [vmem:[#allocation57_spill] sm:$0xff]  ;;  %v2133_v2 = vld [vmem:[#allocation2 + $0x48] sm:$0xf] }
  0xb7   : > { %4593 = vst [vmem:[#allocation19_spill] sm:$0xff] %v3481_v62  ;;  %v495_v12 = vmul.f32 %v3487_v60, %v4595_v23  ;;  %v471_v62 = vadd.f32 %v469_v41, %v383_v52  ;;  %v3508_v23 = vld [vmem:[%s4246_s1 + $0xb0] sm:$0xff]  ;;  %v4603_v50 = vld [vmem:[#allocation34_spill] sm:$0xff]  ;;  %v4606_v52 = vld [vmem:[#allocation73_spill] sm:$0xff] }
  0xb8   : > { %4597 = vst [vmem:[#allocation46_spill] sm:$0xff] %v3495_v51  ;;  %v521_v8 = vmul.f32 %v3508_v23, %v4601_v38  ;;  %v547_v0 = vmul.f32 %v4603_v50, %v4602_v24  ;;  %v1127_v51 = vadd.f32 %v1125_v18, %v1101_v1  ;;  %v711_v6 = vadd.f32 %v709_v21, %v685_v4  ;;  %v3524_v41 = vld [vmem:[%s4246_s1 + $0x70] sm:$0xff]  ;;  %v3535_v21 = vld [vmem:[%s4246_s1 + $0xc0] sm:$0xff] }
  0xb9   : > { %4598 = vst [vmem:[#allocation29_spill] sm:$0xff] %v3499_v45  ;;  %v3517_v45 = vld [vmem:[%s4246_s1 + $0x150] sm:$0xff]  ;;  %v3528_v38 = vmul.f32 %v3524_v41, %v4606_v52  ;;  %v497_v18 = vadd.f32 %v495_v12, %v471_v62  ;;  %v4609_v1 = vld [vmem:[#allocation26_spill] sm:$0xff] }
  0xba   : > { %4599 = vst [vmem:[#allocation77_spill] sm:$0xff] %v3503_v35  ;;  %v573_v15 = vmul.f32 %v3517_v45, %v3491_v43  ;;  %v3530_v50 = vld [vmem:[#allocation2 + $0x62] sm:$0xff]  ;;  %v3539_v4 = vmul.f32 %v3535_v21, %v4609_v1  ;;  %v4611_v35 = vld [vmem:[#allocation41_spill] sm:$0xff]  ;;  %v1501_v12 = vsel %vm1177_vm1, %v1127_v51, 0.0  ;;  %v3557_v1 = vld [vmem:[%s4246_s1 + $0x58] sm:$0xf] }
  0xbb   : > { %4600 = vst [vmem:[#allocation7_spill] sm:$0xff] %v3508_v23  ;;  %v3548_v52 = vld [vmem:[%s4246_s1 + $0x8] sm:$0xf]  ;;  %v3566_v33 = vld [vmem:[#allocation2 + $0x68] sm:$0xf]  ;;  %1502 = vadd.xlane.f32.xlu1 %v1501_v12 }
  0xbc   : > { %4604 = vst [vmem:[#allocation31_spill] sm:$0xff] %v3517_v45  ;;  %v4610_v45 = vld [vmem:[#allocation44_spill] sm:$0xff]  ;;  %v320_v62 = vmul.f32 %v2133_v2, %v3548_v52  ;;  %v3552_v61 = vld [vmem:[#allocation2 + $0x63] sm:$0xff]  ;;  %v3573_v2 = vld [vmem:[%s4246_s1 + $0x160] sm:$0xff] }
  0xbd   : > { %4605 = vst [vmem:[#allocation9_spill] sm:$0xff] %v3524_v41  ;;  %v3543_v37 = vmul.f32 %v4611_v35, %v4610_v45  ;;  %v737_v41 = vadd.f32 %v735_v56, %v711_v6  ;;  %v4615_v35 = vld [vmem:[#allocation56_spill] sm:$0xff]  ;;  %v3564_v45 = vld [vmem:[%s4246_s1 + $0xa8] sm:$0xf]  ;;  %v523_v6 = vadd.f32 %v521_v8, %v497_v18  ;;  %v3577_v51 = vmul.f32 %v3573_v2, %v3530_v50  ;;  %v3591_v8 = vld [vmem:[%s4246_s1 + $0x80] sm:$0xff] }
  0xbe   : > { %4607 = vst [vmem:[#allocation70_spill] sm:$0xff] %v3530_v50  ;;  %v374_v56 = vmul.f32 %v3566_v33, %v3564_v45  ;;  %v4624_v18 = vld [vmem:[#allocation74_spill] sm:$0xff] }
  0xbf   : > { %4608 = vst [vmem:[#allocation78_spill] sm:$0xff] %v3535_v21  ;;  %v347_v21 = vmul.f32 %v3557_v1, %v4615_v35  ;;  %v3595_v12 = vmul.f32 %v3591_v8, %v4624_v18  ;;  %v549_v23 = vadd.f32 %v547_v0, %v523_v6  ;;  %v4627_v18 = vld [vmem:[#allocation47_spill] sm:$0xff]  ;;  %v3630_v0 = vmul.f32 %v3100_v48, %v3108_v36  ;;  %v4639_v36 = vld [vmem:[#allocation18_spill] sm:$0xff] }
  0xc0   : > { %4612 = vst [vmem:[#allocation11_spill] sm:$0xff] %v3548_v52  ;;  %v4621_v52 = vld [vmem:[#allocation12_spill] sm:$0xff] }
  0xc1   : > { %4613 = vst [vmem:[#allocation72_spill] sm:$0xff] %v3552_v61 }
  0xc2   : > { %4614 = vst [vmem:[#allocation79_spill] sm:$0xff] %v3557_v1  ;;  %v3582_v1 = vld [vmem:[%s4246_s1 + $0x30] sm:$0xff] }
  0xc3   : > { %4616 = vst [vmem:[#allocation66_spill] sm:$0xff] %v3564_v45  ;;  %v3586_v35 = vmul.f32 %v3582_v1, %v4621_v52  ;;  %v4625_v45 = vld [vmem:[#allocation67_spill] sm:$0xff]  ;;  %v2140_v52 = vld [vmem:[%s4246_s1 + $0xf8] sm:$0xf] }
  0xc4   : > { %4617 = vst [vmem:[#allocation32_spill] sm:$0xff] %v3566_v33  ;;  %v3600_v50 = vmul.f32 %v4625_v45, %v3182_v20  ;;  %v3602_v33 = vld [vmem:[#allocation2 + $0x64] sm:$0xff]  ;;  %v4631_v20 = vld [vmem:[#allocation10_spill] sm:$0xff] }
  0xc5   : > { %4618 = vst [vmem:[#allocation61_spill] sm:$0xff] %v3573_v2  ;;  %v763_v2 = vadd.f32 %v3429_v27, %v737_v41  ;;  %v3617_v27 = vld [vmem:[%s4246_s1 + $0x170] sm:$0xff] }
  0xc6   : > { %4619 = vst [vmem:[#allocation28_spill] sm:$0xff] %v3577_v51  ;;  %v349_v51 = vadd.f32 %v347_v21, %v320_v62  ;;  %v3621_v41 = vmul.f32 %v3617_v27, %v3552_v61  ;;  %v3625_v21 = vmul.f32 %v3187_v14, %v3011_v47  ;;  %v3641_v47 = vmul.f32 %v4631_v20, %v3201_v32  ;;  %v4633_v14 = vld [vmem:[#allocation8_spill] sm:$0xff] }
  0xc7   : > { %4620 = vst [vmem:[#allocation20_spill] sm:$0xff] %v3582_v1  ;;  %v3607_v1 = vld [vmem:[#allocation2 + $0x78] sm:$0xf]  ;;  %v789_v62 = vadd.f32 %v3433_v13, %v763_v2  ;;  %v4634_v13 = vld [vmem:[#allocation52_spill] sm:$0xff] }
  0xc8   : > { %4622 = vst [vmem:[#allocation60_spill] sm:$0xff] %v3586_v35  ;;  %v401_v35 = vmul.f32 %v3607_v1, %v2140_v52  ;;  %v376_v6 = vadd.f32 %v374_v56, %v349_v51  ;;  %v3645_v2 = vmul.f32 %v4634_v13, %v4633_v14  ;;  %v3650_v56 = vld [vmem:[%s4246_s1 + $0x180] sm:$0xff]  ;;  %v3667_v32 = vld [vmem:[%s4246_s1 + $0xb8] sm:$0xf] }
  0xc9   : > { %4623 = vst [vmem:[#allocation35_spill] sm:$0xff] %v3591_v8  ;;  %v3612_v8 = vmul.f32 %v4627_v18, %v3300_v44  ;;  %v3635_v18 = vld [vmem:[%s4246_s1 + $0x18] sm:$0xf]  ;;  %v3654_v51 = vmul.f32 %v3650_v56, %v3602_v33 }
  0xca   : > { %4626 = vst [vmem:[#allocation37_spill] sm:$0xff] %v3602_v33  ;;  %v514_v52 = vmul.f32 %v3635_v18, %v4576_v5  ;;  %v876_v5 = vadd.f32 %v3437_v16, %v789_v62  ;;  %v592_v16 = vmul.f32 %v4581_v40, %v3403_v53  ;;  %v3692_v40 = vld [vmem:[%s4246_s1] sm:$0xff] }
  0xcb   : > { %4628 = vst [vmem:[#allocation63_spill] sm:$0xff] %v3617_v27  ;;  %v575_v27 = vadd.f32 %v573_v15, %v549_v23  ;;  %v403_v23 = vadd.f32 %v401_v35, %v376_v6  ;;  %v3660_v15 = vld [vmem:[%s4246_s1 + $0x68] sm:$0xf]  ;;  %v3684_v6 = vld [vmem:[%s4246_s1 + $0x78] sm:$0xf]  ;;  %v342_v20 = vmul.f32 %v3692_v40, %v4588_v31  ;;  %v783_v31 = vmul.f32 %v2867_v7, %v3418_v49 }
  0xcc   : > { %4629 = vst [vmem:[#allocation24_spill] sm:$0xff] %v3630_v0  ;;  %v540_v13 = vmul.f32 %v3660_v15, %v4578_v42  ;;  %v3677_v35 = vld [vmem:[%s4246_s1 + $0x28] sm:$0xf]  ;;  %v3726_v7 = vld [vmem:[%s4246_s1 + $0x38] sm:$0xf] }
  0xcd   : > { %4630 = vst [vmem:[#allocation65_spill] sm:$0xff] %v3635_v18  ;;  %v705_v62 = vmul.f32 %v3677_v35, %v3228_v11  ;;  %v3699_v11 = vld [vmem:[%s4246_s1 + $0x50] sm:$0xff] }
  0xce   : > { %4632 = vst [vmem:[#allocation36_spill] sm:$0xff] %v3641_v47  ;;  %v3701_v47 = vld [vmem:[#allocation2 + $0x60] sm:$0xff] }
  0xcf   : > { %4635 = vst [vmem:[#allocation42_spill] sm:$0xff] %v3645_v2  ;;  %v731_v2 = vmul.f32 %v3684_v6, %v3283_v22  ;;  %v369_v48 = vmul.f32 %v3701_v47, %v3699_v11 }
  0xd0   : > { %4636 = vst [vmem:[#allocation53_spill] sm:$0xff] %v3650_v56  ;;  %v566_v56 = vmul.f32 %v3667_v32, %v4580_v10 }
  0xd1   : > { %4637 = vst [vmem:[#allocation25_spill] sm:$0xff] %v3654_v51  ;;  %v662_v51 = vadd.f32 %v4639_v36, %v575_v27  ;;  %v902_v36 = vadd.f32 %v3450_v59, %v876_v5  ;;  %v516_v27 = vadd.f32 %v514_v52, %v403_v23  ;;  %v3705_v59 = vld [vmem:[#allocation2 + $0x70] sm:$0xff]  ;;  %v757_v5 = vmul.f32 %v4551_v46, %v3302_v29  ;;  %v3715_v23 = vld [vmem:[%s4246_s1 + $0xa0] sm:$0xff] }
  0xd2   : > { %4638 = vst [vmem:[#allocation38_spill] sm:$0xff] %v3660_v15  ;;  %v371_v0 = vadd.f32 %v369_v48, %v342_v20  ;;  %v896_v46 = vmul.f32 %v3726_v7, %v3246_v28  ;;  %v3736_v48 = vmul.f32 %v3038_v9, %v3342_v55  ;;  %v3744_v28 = vmul.f32 %v2884_v26, %v3439_v34  ;;  %v4662_v34 = vld [vmem:[#allocation66_spill] sm:$0xff] }
  0xd3   : > { %4640 = vst [vmem:[#allocation40_spill] sm:$0xff] %v3684_v6  ;;  %v688_v52 = vadd.f32 %v3528_v38, %v662_v51  ;;  %v542_v33 = vadd.f32 %v540_v13, %v516_v27  ;;  %v535_v38 = vmul.f32 %v3464_v57, %v4602_v24  ;;  %v3752_v27 = vmul.f32 %v3145_v63, %v3368_v19  ;;  %v4653_v63 = vld [vmem:[#allocation44_spill] sm:$0xff] }
  0xd4   : > { %4641 = vst [vmem:[#allocation49_spill] sm:$0xff] %v3692_v40  ;;  %v396_v40 = vmul.f32 %v3715_v23, %v3705_v59 }
  0xd5   : > { %4642 = vst [vmem:[#allocation22_spill] sm:$0xff] %v3699_v11  ;;  %v928_v11 = vadd.f32 %v3454_v39, %v902_v36  ;;  %v714_v51 = vadd.f32 %v3539_v4, %v688_v52  ;;  %v568_v39 = vadd.f32 %v566_v56, %v542_v33  ;;  %v561_v4 = vmul.f32 %v3487_v60, %v3491_v43  ;;  %v4649_v52 = vld [vmem:[#allocation30_spill] sm:$0xff] }
  0xd6   : > { %4643 = vst [vmem:[#allocation48_spill] sm:$0xff] %v3715_v23  ;;  %v3732_v23 = vmul.f32 %v3123_v17, %v3337_v58  ;;  %v398_v24 = vadd.f32 %v396_v40, %v371_v0  ;;  %v3748_v36 = vmul.f32 %v3254_v54, %v3285_v25  ;;  %v3767_v25 = vld [vmem:[%s4246_s1 + $0x20] sm:$0xff]  ;;  %v397_v17 = vmul.f32 %v3607_v1, %v4662_v34 }
  0xd7   : > { %4644 = vst [vmem:[#allocation14_spill] sm:$0xff] %v3726_v7  ;;  %v954_v20 = vadd.f32 %v3458_v30, %v928_v11  ;;  %v740_v13 = vadd.f32 %v3543_v37, %v714_v51  ;;  %v3754_v30 = vld [vmem:[#allocation2 + $0x71] sm:$0xff]  ;;  %v594_v0 = vadd.f32 %v592_v16, %v568_v39  ;;  %v4647_v37 = vld [vmem:[#allocation7_spill] sm:$0xff]  ;;  %v726_v54 = vmul.f32 %v3767_v25, %v4653_v63 }
  0xd8   : > { %4645 = vst [vmem:[#allocation50_spill] sm:$0xff] %v3752_v27  ;;  %v537_v56 = vadd.f32 %v535_v38, %v398_v24  ;;  %v587_v40 = vmul.f32 %v4647_v37, %v3754_v30  ;;  %v4648_v11 = vld [vmem:[#allocation28_spill] sm:$0xff]  ;;  %v4650_v51 = vld [vmem:[#allocation69_spill] sm:$0xff]  ;;  %v4655_v16 = vld [vmem:[#allocation11_spill] sm:$0xff]  ;;  %v536_v63 = vmul.f32 %v3635_v18, %v4578_v42  ;;  %v562_v34 = vmul.f32 %v3660_v15, %v4580_v10 }
  0xd9   : > { %4646 = vst [vmem:[#allocation51_spill] sm:$0xff] %v3754_v30  ;;  %v980_v33 = vadd.f32 %v3470_v3, %v954_v20  ;;  %v766_v26 = vadd.f32 %v4648_v11, %v740_v13  ;;  %v3762_v43 = vmul.f32 %v4650_v51, %v4649_v52  ;;  %v4654_v3 = vld [vmem:[#allocation56_spill] sm:$0xff]  ;;  %v707_v24 = vadd.f32 %v705_v62, %v594_v0  ;;  %v4657_v13 = vld [vmem:[#allocation79_spill] sm:$0xff]  ;;  %v4660_v52 = vld [vmem:[#allocation70_spill] sm:$0xff] }
  0xda   : > { %4652 = vst [vmem:[#allocation34_spill] sm:$0xff] %v3767_v25  ;;  %v343_v38 = vmul.f32 %v4655_v16, %v4654_v3  ;;  %v4656_v20 = vld [vmem:[#allocation76_spill] sm:$0xff]  ;;  %v563_v30 = vadd.f32 %v561_v4, %v537_v56  ;;  %v4661_v27 = vld [vmem:[#allocation9_spill] sm:$0xff]  ;;  %v4663_v25 = vld [vmem:[#allocation19_spill] sm:$0xff]  ;;  %v588_v10 = vmul.f32 %v3667_v32, %v3403_v53 }
  0xdb   : > { %4651 = vst [vmem:[#allocation57_spill] sm:$0xff] %v3762_v43  ;;  %v1067_v39 = vadd.f32 %v4656_v20, %v980_v33  ;;  %v4658_v11 = vld [vmem:[#allocation32_spill] sm:$0xff]  ;;  %v752_v9 = vmul.f32 %v4661_v27, %v4660_v52  ;;  %v733_v16 = vadd.f32 %v731_v2, %v707_v24  ;;  %v4664_v56 = vld [vmem:[#allocation21_spill] sm:$0xff]  ;;  %v4666_v20 = vld [vmem:[#allocation78_spill] sm:$0xff] }
  0xdc   : > { %v370_v19 = vmul.f32 %v4658_v11, %v4657_v13  ;;  %v4659_v51 = vld [vmem:[#allocation60_spill] sm:$0xff]  ;;  %v589_v33 = vadd.f32 %v587_v40, %v563_v30  ;;  %v4667_v42 = vld [vmem:[#allocation46_spill] sm:$0xff]  ;;  %v4669_v24 = vld [vmem:[#allocation29_spill] sm:$0xff] }
  0xdd   : > { %v853_v43 = vadd.f32 %v4659_v51, %v766_v26  ;;  %v1093_v3 = vadd.f32 %v4663_v25, %v1067_v39  ;;  %v3784_v62 = vld [vmem:[#allocation2 + $0x72] sm:$0xff]  ;;  %v759_v25 = vadd.f32 %v757_v5, %v733_v16 }
  0xde   : > { %v372_v4 = vadd.f32 %v370_v19, %v343_v38  ;;  %v4665_v26 = vld [vmem:[#allocation64_spill] sm:$0xff]  ;;  %v778_v13 = vmul.f32 %v4666_v20, %v3784_v62  ;;  %v728_v2 = vadd.f32 %v726_v54, %v589_v33 }
  0xdf   : > { %v879_v0 = vadd.f32 %v3595_v12, %v853_v43  ;;  %v3789_v51 = vmul.f32 %v4665_v26, %v4664_v56  ;;  %v1119_v18 = vadd.f32 %v4667_v42, %v1093_v3  ;;  %v3796_v30 = vld [vmem:[#allocation2 + $0x73] sm:$0xff]  ;;  %v785_v54 = vadd.f32 %v783_v31, %v759_v25  ;;  %v4674_v25 = vld [vmem:[#allocation71_spill] sm:$0xff] }
  0xe0   : > { %v399_v40 = vadd.f32 %v397_v17, %v372_v4  ;;  %v2155_v43 = vld [vmem:[%s4246_s1 + $0x140] sm:$0xff]  ;;  %v4668_v38 = vld [vmem:[#allocation20_spill] sm:$0xff]  ;;  %v754_v16 = vadd.f32 %v752_v9, %v728_v2  ;;  %v969_v4 = vmul.f32 %v4625_v45, %v3796_v30  ;;  %v753_v9 = vmul.f32 %v3684_v6, %v3302_v29 }
  0xe1   : > { %v905_v19 = vadd.f32 %v3600_v50, %v879_v0  ;;  %v404_v12 = vmul.f32 %v2155_v43, %v3705_v59  ;;  %v917_v39 = vmul.f32 %v4668_v38, %v3300_v44  ;;  %v1145_v5 = vadd.f32 %v4669_v24, %v1119_v18  ;;  %v4670_v50 = vld [vmem:[#allocation35_spill] sm:$0xff]  ;;  %v4671_v26 = vld [vmem:[#allocation77_spill] sm:$0xff] }
  0xe2   : > { %v538_v3 = vadd.f32 %v536_v63, %v399_v40  ;;  %v943_v33 = vmul.f32 %v4670_v50, %v3552_v61  ;;  %v727_v0 = vmul.f32 %v3677_v35, %v3283_v22  ;;  %v898_v43 = vadd.f32 %v896_v46, %v785_v54  ;;  %v4672_v63 = vld [vmem:[#allocation16_spill] sm:$0xff] }
  0xe3   : > { %v931_v17 = vadd.f32 %v3612_v8, %v905_v19  ;;  %v1171_v42 = vadd.f32 %v4671_v26, %v1145_v5  ;;  %v780_v32 = vadd.f32 %v778_v13, %v754_v16  ;;  %v4673_v8 = vld [vmem:[#allocation59_spill] sm:$0xff]  ;;  %v377_v2 = vmul.f32 %v3701_v47, %v4674_v25  ;;  %v2156_v24 = vld [vmem:[#allocation2 + $0x31] sm:$0xff] }
  0xe4   : > { %v564_v15 = vadd.f32 %v562_v34, %v538_v3  ;;  %v352_v31 = vadd.f32 %v4673_v8, %v4672_v63  ;;  %v924_v22 = vadd.f32 %v3732_v23, %v898_v43  ;;  %v491_v5 = vmul.f32 %v2156_v24, %v3464_v57  ;;  %v3830_v3 = vld [vmem:[#allocation2 + $0x74] sm:$0xff]  ;;  %v4676_v23 = vld [vmem:[#allocation27_spill] sm:$0xff]  ;;  %v4680_v8 = vld [vmem:[#allocation36_spill] sm:$0xff] }
  0xe5   : > { %v957_v18 = vadd.f32 %v3621_v41, %v931_v17  ;;  %v1629_v45 = vsel %vm1177_vm1, %v1171_v42, 0.0  ;;  %v919_v40 = vadd.f32 %v917_v39, %v780_v32  ;;  %v4675_v41 = vld [vmem:[#allocation13_spill] sm:$0xff]  ;;  %v779_v39 = vmul.f32 %v4676_v23, %v3418_v49  ;;  %v4679_v26 = vld [vmem:[#allocation43_spill] sm:$0xff]  ;;  %v4684_v24 = vld [vmem:[#allocation58_spill] sm:$0xff] }
  0xe6   : > { %v590_v19 = vadd.f32 %v588_v10, %v564_v15  ;;  %1630 = vadd.xlane.f32.xlu2 %v1629_v45  ;;  %v1108_v13 = vmul.f32 %v4675_v41, %v4633_v14  ;;  %v379_v34 = vadd.f32 %v377_v2, %v352_v31  ;;  %v950_v54 = vadd.f32 %v3736_v48, %v924_v22  ;;  %v4677_v15 = vld [vmem:[#allocation24_spill] sm:$0xff]  ;;  %v4678_v10 = vld [vmem:[#allocation37_spill] sm:$0xff]  ;;  %v3839_v32 = vld [vmem:[#allocation2 + $0x41] sm:$0xff] }
  0xe7   : > { %v1044_v46 = vadd.f32 %v3625_v21, %v957_v18  ;;  %v945_v16 = vadd.f32 %v943_v33, %v919_v40  ;;  %v1134_v42 = vmul.f32 %v4679_v26, %v4678_v10  ;;  %v517_v48 = vmul.f32 %v3839_v32, %v3487_v60  ;;  %v4681_v2 = vld [vmem:[#allocation10_spill] sm:$0xff]  ;;  %v3849_v40 = vld [vmem:[#allocation2 + $0x51] sm:$0xff]  ;;  %v4686_v23 = vld [vmem:[#allocation39_spill] sm:$0xff] }
  0xe8   : > { %v729_v17 = vadd.f32 %v727_v0, %v590_v19  ;;  %v406_v43 = vadd.f32 %v404_v12, %v379_v34  ;;  %v976_v33 = vadd.f32 %v3744_v28, %v950_v54  ;;  %v918_v63 = vmul.f32 %v3726_v7, %v3337_v58  ;;  %v4683_v34 = vld [vmem:[#allocation42_spill] sm:$0xff]  ;;  %v4685_v54 = vld [vmem:[#allocation68_spill] sm:$0xff] }
  0xe9   : > { %v1070_v21 = vadd.f32 %v4677_v15, %v1044_v46  ;;  %v971_v18 = vadd.f32 %v969_v4, %v945_v16  ;;  %v1160_v45 = vmul.f32 %v4681_v2, %v3830_v3  ;;  %v543_v12 = vmul.f32 %v3849_v40, %v4647_v37  ;;  %v4682_v4 = vld [vmem:[#allocation17_spill] sm:$0xff] }
  0xea   : > { %v755_v0 = vadd.f32 %v753_v9, %v729_v17  ;;  %v493_v22 = vadd.f32 %v491_v5, %v406_v43  ;;  %v1089_v19 = vadd.f32 %v3748_v36, %v976_v33  ;;  %v944_v9 = vmul.f32 %v4682_v4, %v3342_v55  ;;  %v3862_v5 = vld [vmem:[%s4246_s1 + $0x100] sm:$0xff]  ;;  %v4688_v43 = vld [vmem:[#allocation23_spill] sm:$0xff] }
  0xeb   : > { %v1096_v31 = vadd.f32 %v4680_v8, %v1070_v21  ;;  %v1110_v46 = vadd.f32 %v1108_v13, %v971_v18  ;;  %v970_v16 = vmul.f32 %v4685_v54, %v4684_v24  ;;  %v569_v36 = vmul.f32 %v3862_v5, %v4686_v23  ;;  %v4687_v13 = vld [vmem:[#allocation50_spill] sm:$0xff]  ;;  %v4689_v33 = vld [vmem:[#allocation55_spill] sm:$0xff]  ;;  %v4692_v2 = vld [vmem:[#allocation45_spill] sm:$0xff] }
  0xec   : > { %v781_v28 = vadd.f32 %v779_v39, %v755_v0  ;;  %v519_v17 = vadd.f32 %v517_v48, %v493_v22  ;;  %v1115_v39 = vadd.f32 %v4687_v13, %v1089_v19  ;;  %v1109_v18 = vmul.f32 %v4689_v33, %v4688_v43  ;;  %v4690_v0 = vld [vmem:[#allocation25_spill] sm:$0xff]  ;;  %v4693_v4 = vld [vmem:[#allocation51_spill] sm:$0xff]  ;;  %v4699_v43 = vld [vmem:[#allocation26_spill] sm:$0xff] }
  0xed   : > { %v1122_v58 = vadd.f32 %v4683_v34, %v1096_v31  ;;  %v1136_v15 = vadd.f32 %v1134_v42, %v1110_v46  ;;  %v4691_v31 = vld [vmem:[#allocation30_spill] sm:$0xff]  ;;  %v4694_v34 = vld [vmem:[#allocation31_spill] sm:$0xff]  ;;  %v4695_v24 = vld [vmem:[#allocation57_spill] sm:$0xff] }
  0xee   : > { %v920_v21 = vadd.f32 %v918_v63, %v781_v28  ;;  %v1135_v48 = vmul.f32 %v4692_v2, %v4691_v31  ;;  %v545_v22 = vadd.f32 %v543_v12, %v519_v17  ;;  %v595_v54 = vmul.f32 %v4694_v34, %v4693_v4  ;;  %v4696_v19 = vld [vmem:[#allocation69_spill] sm:$0xff]  ;;  %v1176_v2 = vpop.xlane.xlu0 %1175  ;;  %v2163_v33 = vld [vmem:[#allocation2 + $0x40] sm:$0xff] }
  0xef   : > { %v1148_v8 = vadd.f32 %v4690_v0, %v1122_v58  ;;  %v1141_v7 = vadd.f32 %v4695_v24, %v1115_v39  ;;  %v1162_v55 = vadd.f32 %v1160_v45, %v1136_v15  ;;  %v1161_v42 = vmul.f32 %v4696_v19, %v4664_v56  ;;  %v4697_v28 = vld [vmem:[#allocation73_spill] sm:$0xff]  ;;  %v4698_v58 = vld [vmem:[#allocation34_spill] sm:$0xff] }
  0xf0   : > { %v946_v6 = vadd.f32 %v944_v9, %v920_v21  ;;  %v571_v46 = vadd.f32 %v569_v36, %v545_v22  ;;  %v682_v13 = vmul.f32 %v4698_v58, %v4697_v28  ;;  %v708_v12 = vmul.f32 %v4661_v27, %v4699_v43  ;;  %v4700_v9 = vld [vmem:[#allocation44_spill] sm:$0xff]  ;;  %v4701_v0 = vld [vmem:[#allocation61_spill] sm:$0xff]  ;;  %v4703_v22 = vld [vmem:[#allocation22_spill] sm:$0xff] }
  0xf1   : > { %v1562_v63 = vsel %vm170_vm0, %v1148_v8, 0.0  ;;  %v1167_v17 = vadd.f32 %v3789_v51, %v1141_v7  ;;  %v1754_v24 = vsel %vm170_vm0, %v1162_v55, 0.0  ;;  %v734_v39 = vmul.f32 %v4666_v20, %v4700_v9  ;;  %v3890_v36 = vld [vmem:[%s4246_s1 + $0x110] sm:$0xff]  ;;  %v4702_v7 = vld [vmem:[#allocation49_spill] sm:$0xff]  ;;  %v4704_v19 = vld [vmem:[#allocation74_spill] sm:$0xff] }
  0xf2   : > { %1563 = vadd.xlane.f32.xlu0 %v1562_v63  ;;  %v972_v45 = vadd.f32 %v970_v16, %v946_v6  ;;  %1755 = vadd.xlane.f32.xlu1 %v1754_v24  ;;  %v597_v15 = vadd.f32 %v595_v54, %v571_v46  ;;  %v760_v21 = vmul.f32 %v3890_v36, %v4660_v52  ;;  %v3899_v16 = vstv %s1173_s12 }
  0xf3   : > { %v786_v8 = vmul.f32 %v4701_v0, %v3784_v62  ;;  %v365_v55 = vmul.f32 %v3701_v47, %v4702_v7  ;;  %v1693_v6 = vsel %vm1177_vm1, %v1167_v17, 0.0  ;;  %v392_v34 = vmul.f32 %v4703_v22, %v3705_v59  ;;  %v4705_v0 = vld [vmem:[#allocation15_spill] sm:$0xff] }
  0xf4   : > { %v1111_v51 = vadd.f32 %v1109_v18, %v972_v45  ;;  %1694 = vadd.xlane.f32.xlu2 %v1693_v6  ;;  %v684_v54 = vadd.f32 %v682_v13, %v597_v15  ;;  %v873_v63 = vmul.f32 %v4668_v38, %v4704_v19  ;;  %v1181_v46 = vadd.f32 %v1176_v2, %v1176_v2  ;;  %v3914_v13 = vld [vmem:[%s4246_s1 + $0xd0] sm:$0xff] }
  0xf5   : > { %v557_v28 = vmul.f32 %v3464_v57, %v4686_v23  ;;  %v899_v17 = vmul.f32 %v4670_v50, %v4705_v0  ;;  %v394_v18 = vadd.f32 %v392_v34, %v365_v55  ;;  %v583_v45 = vmul.f32 %v3487_v60, %v4693_v4  ;;  %4706 = vst [vmem:[#allocation41_spill] sm:$0xff] %v3914_v13 }
  0xf6   : > { %v1137_v24 = vadd.f32 %v1135_v48, %v1111_v51  ;;  %v710_v56 = vadd.f32 %v708_v12, %v684_v54  ;;  %v925_v15 = vmul.f32 %v3914_v13, %v3300_v44  ;;  %v3921_v48 = vld [vmem:[%s4246_s1 + $0x120] sm:$0xff]  ;;  %v1184_v6 = vadd.f32 %v3899_v16, %v1181_v46  ;;  %v2164_v13 = vld [vmem:[#allocation2 + $0x50] sm:$0xff] }
  0xf7   : > { %4707 = vst [vmem:[#allocation12_spill] sm:$0xff] %v3921_v48  ;;  %v3925_v55 = vmul.f32 %v3921_v48, %v3552_v61  ;;  %v559_v51 = vadd.f32 %v557_v28, %v394_v18  ;;  %v748_v2 = vmul.f32 %v4698_v58, %v4660_v52  ;;  %v774_v34 = vmul.f32 %v4661_v27, %v3784_v62  ;;  %v4708_v28 = vld [vmem:[#allocation48_spill] sm:$0xff] }
  0xf8   : > { %v1163_v12 = vadd.f32 %v1161_v42, %v1137_v24  ;;  %v736_v54 = vadd.f32 %v734_v39, %v710_v56  ;;  %v3932_v19 = vmax.f32 %v1184_v6, 0.0  ;;  %v319_v31 = vmul.f32 %v2163_v33, %v4702_v7 }
  0xf9   : > { %v346_v48 = vmul.f32 %v2164_v13, %v4703_v22  ;;  %v585_v46 = vadd.f32 %v583_v45, %v559_v51  ;;  %v939_v42 = vmul.f32 %v4668_v38, %v3552_v61  ;;  %v373_v24 = vmul.f32 %v4708_v28, %v3701_v47  ;;  %v4710_v47 = vld [vmem:[#allocation62_spill] sm:$0xff] }
  0xfa   : > { %v1757_v49 = vsel %vm1177_vm1, %v1163_v12, 0.0  ;;  %v762_v18 = vadd.f32 %v760_v21, %v736_v54  ;;  %v1194_v56 = vperm.slane %v3932_v19, 4  ;;  %v1195_v39 = vperm.slane %v3932_v19, 5  ;;  %v4709_v12 = vld [vmem:[#allocation63_spill] sm:$0xff] }
  0xfb   : > { %v1196_v6 = vperm.slane %v3932_v19, 6  ;;  %v1197_v33 = vperm.slane %v3932_v19, 7  ;;  %v750_v7 = vadd.f32 %v748_v2, %v585_v46  ;;  %v348_v22 = vadd.f32 %v346_v48, %v319_v31 }
  0xfc   : > { %v400_v45 = vmul.f32 %v4674_v25, %v3705_v59  ;;  %1758 = vadd.xlane.f32.xlu2 %v1757_v49  ;;  %v788_v13 = vadd.f32 %v786_v8, %v762_v18  ;;  %v977_v51 = vmul.f32 %v4709_v12, %v3796_v30  ;;  %v1064_v21 = vmul.f32 %v4675_v41, %v4710_v47  ;;  %v4711_v25 = vld [vmem:[#allocation54_spill] sm:$0xff]  ;;  %v4712_v18 = vld [vmem:[#allocation53_spill] sm:$0xff] }
  0xfd   : > { %1210 = vst [vmem:[#allocation1 + $0x4] ss:$9 sm:$0xff] %v1194_v56  ;;  %v776_v54 = vadd.f32 %v774_v34, %v750_v7  ;;  %v965_v28 = vmul.f32 %v4670_v50, %v3796_v30  ;;  %v375_v61 = vadd.f32 %v373_v24, %v348_v22  ;;  %v513_v31 = vmul.f32 %v3839_v32, %v3464_v57  ;;  %v3960_v8 = vld [vmem:[%s4246_s1 + $0xe0] sm:$0xff]  ;;  %v3969_v7 = vld [vmem:[%s4246_s1 + $0x130] sm:$0xff] }
  0xfe   : > { %1212 = vst [vmem:[#allocation1 + $0x5] ss:$9 sm:$0xff] %v1195_v39  ;;  %v875_v48 = vadd.f32 %v873_v63, %v788_v13  ;;  %v1090_v49 = vmul.f32 %v4679_v26, %v4711_v25  ;;  %v3964_v2 = vmul.f32 %v3960_v8, %v4633_v14  ;;  %v3973_v32 = vmul.f32 %v3969_v7, %v4678_v10  ;;  %v3986_v39 = vld [vmem:[%s4246_s1 + $0x90] sm:$0xff]  ;;  %v1180_v13 = vpop.xlane.xlu0 %1179 }
  0xff   : > { %1214 = vst [vmem:[#allocation1 + $0x6] ss:$9 sm:$0xff] %v1196_v6  ;;  %v941_v26 = vadd.f32 %v939_v42, %v776_v54  ;;  %v1130_v63 = vmul.f32 %v4675_v41, %v4678_v10  ;;  %v402_v34 = vadd.f32 %v400_v45, %v375_v61  ;;  %v539_v46 = vmul.f32 %v3849_v40, %v3487_v60  ;;  %v2168_v25 = vld [vmem:[#allocation2 + $0x69] sm:$0xf] }
 0x100   : > { %1216 = vst [vmem:[#allocation1 + $0x7] ss:$9 sm:$0xff] %v1197_v33  ;;  %v901_v24 = vadd.f32 %v899_v17, %v875_v48  ;;  %v3981_v56 = vmul.f32 %v4712_v18, %v3830_v3  ;;  %v1156_v42 = vmul.f32 %v3986_v39, %v3830_v3  ;;  %v565_v41 = vmul.f32 %v4647_v37, %v4686_v23 }
 0x101   : > { %v967_v61 = vadd.f32 %v965_v28, %v941_v26  ;;  %v515_v6 = vadd.f32 %v513_v31, %v402_v34  ;;  %v591_v60 = vmul.f32 %v3862_v5, %v4693_v4  ;;  %v704_v40 = vmul.f32 %v4698_v58, %v4699_v43  ;;  %v4713_v43 = vld [vmem:[#allocation11_spill] sm:$0xff]  ;;  %v4715_v26 = vld [vmem:[#allocation65_spill] sm:$0xff] }
 0x102   : > { %v927_v17 = vadd.f32 %v925_v15, %v901_v24  ;;  %v730_v33 = vmul.f32 %v4661_v27, %v4700_v9  ;;  %v1190_v22 = vperm.slane %v3932_v19, 0  ;;  %v1191_v45 = vperm.slane %v3932_v19, 1  ;;  %v4714_v28 = vld [vmem:[#allocation79_spill] sm:$0xff] }
 0x103   : > { %v1132_v12 = vadd.f32 %v1130_v63, %v967_v61  ;;  %v541_v47 = vadd.f32 %v539_v46, %v515_v6  ;;  %v1192_v37 = vperm.slane %v3932_v19, 2  ;;  %v1193_v23 = vperm.slane %v3932_v19, 3 }
 0x104   : > { %v953_v5 = vadd.f32 %v3925_v55, %v927_v17  ;;  %1202 = vst [vmem:[#allocation1] ss:$9 sm:$0xff] %v1190_v22  ;;  %v1182_v54 = vadd.f32 %v1180_v13, %v1180_v13  ;;  %v366_v15 = vmul.f32 %v4658_v11, %v4713_v43  ;;  %v393_v27 = vmul.f32 %v3607_v1, %v4714_v28  ;;  %v4717_v17 = vld [vmem:[#allocation75_spill] sm:$0xff] }
 0x105   : > { %v1158_v9 = vadd.f32 %v1156_v42, %v1132_v12  ;;  %v567_v31 = vadd.f32 %v565_v41, %v541_v47  ;;  %v756_v48 = vmul.f32 %v4666_v20, %v4660_v52  ;;  %1204 = vst [vmem:[#allocation1 + $0x1] ss:$9 sm:$0xff] %v1191_v45  ;;  %v558_v63 = vmul.f32 %v2168_v25, %v4715_v26  ;;  %v4716_v52 = vld [vmem:[#allocation38_spill] sm:$0xff]  ;;  %v4720_v47 = vld [vmem:[#allocation33_spill] sm:$0xff] }
 0x106   : > { %v979_v19 = vadd.f32 %v977_v51, %v953_v5  ;;  %v782_v55 = vmul.f32 %v3890_v36, %v3784_v62  ;;  %1206 = vst [vmem:[#allocation1 + $0x2] ss:$9 sm:$0xff] %v1192_v37  ;;  %v1185_v34 = vadd.f32 %v3899_v16, %v1182_v54  ;;  %v395_v11 = vadd.f32 %v393_v27, %v366_v15  ;;  %v1244_v15 = vpop.xlane.xlu2 %1243 }
 0x107   : > { %v1818_v46 = vsel %vm170_vm0, %v1158_v9, 0.0  ;;  %v593_v24 = vadd.f32 %v591_v60, %v567_v31  ;;  %v895_v18 = vmul.f32 %v4668_v38, %v4705_v0  ;;  %1208 = vst [vmem:[#allocation1 + $0x3] ss:$9 sm:$0xff] %v1193_v23  ;;  %v584_v20 = vmul.f32 %v4716_v52, %v3403_v53  ;;  %v4718_v60 = vld [vmem:[#allocation40_spill] sm:$0xff]  ;;  %v4719_v0 = vld [vmem:[#allocation49_spill] sm:$0xff] }
 0x108   : > { %v1066_v42 = vadd.f32 %v1064_v21, %v979_v19  ;;  %1819 = vadd.xlane.f32.xlu2 %v1818_v46  ;;  %v921_v51 = vmul.f32 %v4670_v50, %v3300_v44  ;;  %v1187_v36 = vmax.f32 %v1185_v34, 0.0  ;;  %v560_v41 = vadd.f32 %v558_v63, %v395_v11  ;;  %v4721_v21 = vld [vmem:[#allocation14_spill] sm:$0xff]  ;;  %v4723_v52 = vld [vmem:[#allocation72_spill] sm:$0xff] }
 0x109   : > { %v706_v61 = vadd.f32 %v704_v40, %v593_v24  ;;  %v749_v6 = vmul.f32 %v3677_v35, %v3302_v29  ;;  %v775_v22 = vmul.f32 %v4718_v60, %v4717_v17  ;;  %v388_v45 = vmul.f32 %v4719_v0, %v3705_v59  ;;  %v2169_v44 = vld [vmem:[%s4246_s1 + $0x88] sm:$0xf] }
 0x10a   : > { %v1092_v13 = vadd.f32 %v1090_v49, %v1066_v42  ;;  %v1198_v12 = vperm.slane %v1187_v36, 0  ;;  %v940_v37 = vmul.f32 %v4721_v21, %v4720_v47  ;;  %v4722_v50 = vld [vmem:[#allocation58_spill] sm:$0xff]  ;;  %v1199_v5 = vperm.slane %v1187_v36, 1 }
 0x10b   : > { %v966_v40 = vmul.f32 %v2169_v44, %v4722_v50  ;;  %v732_v23 = vadd.f32 %v730_v33, %v706_v61  ;;  %v586_v29 = vadd.f32 %v584_v20, %v560_v41  ;;  %v579_v54 = vmul.f32 %v3464_v57, %v4693_v4  ;;  %v4728_v41 = vld [vmem:[#allocation21_spill] sm:$0xff] }
 0x10c   : > { %v1118_v59 = vadd.f32 %v3964_v2, %v1092_v13  ;;  %v1200_v49 = vperm.slane %v1187_v36, 2  ;;  %v1201_v28 = vperm.slane %v1187_v36, 3  ;;  %v770_v27 = vmul.f32 %v4698_v58, %v3784_v62  ;;  %v4727_v36 = vld [vmem:[#allocation12_spill] sm:$0xff]  ;;  %v2172_v13 = vld [vmem:[#allocation2 + $0x44] sm:$0xff] }
 0x10d   : > { %v758_v9 = vadd.f32 %v756_v48, %v732_v23  ;;  %v751_v31 = vadd.f32 %v749_v6, %v586_v29  ;;  %v581_v25 = vadd.f32 %v579_v54, %v388_v45  ;;  %v2239_v33 = vmov 0   ;;  %v2171_v45 = vld [vmem:[%s4246_s1 + $0x40] sm:$0xff] }
 0x10e   : > { %v1144_v63 = vadd.f32 %v3973_v32, %v1118_v59  ;;  %v1217_v19 = vld [vmem:[#allocation1] sm:$0xff]  ;;  %2121 = vset.pattern.permute.xlu1 %v2239_v33  ;;  %v1248_v34 = vadd.f32 %v1244_v15, %v1244_v15  ;;  %v389_v57 = vmul.f32 %v3607_v1, %v4713_v43  ;;  %v580_v4 = vmul.f32 %v4715_v26, %v3403_v53 }
 0x10f   : > { %v784_v2 = vadd.f32 %v782_v55, %v758_v9  ;;  %1218 = vst [vmem:[#allocation1] ss:$9 sm:$0xff] %v1198_v12  ;;  %v777_v11 = vadd.f32 %v775_v22, %v751_v31  ;;  %v4042_v46 = vadd.f32 %v770_v27, %v581_v25  ;;  %v771_v62 = vmul.f32 %v3677_v35, %v4717_v17  ;;  %v4724_v1 = vld [vmem:[#allocation41_spill] sm:$0xff]  ;;  %v4725_v26 = vld [vmem:[#allocation30_spill] sm:$0xff]  ;;  %v4726_v55 = vld [vmem:[#allocation55_spill] sm:$0xff] }
 0x110   : > { %v1170_v58 = vadd.f32 %v3981_v56, %v1144_v63  ;;  %1219 = vst [vmem:[#allocation1 + $0x1] ss:$9 sm:$0xff] %v1199_v5  ;;  %v1250_v32 = vadd.f32 %v1248_v34, %v3899_v16  ;;  %v582_v48 = vadd.f32 %v580_v4, %v389_v57  ;;  %v947_v43 = vmul.f32 %v4724_v1, %v4723_v52  ;;  %v2170_v56 = vld [vmem:[%s4246_s1 + $0x98] sm:$0xf] }
 0x111   : > { %v897_v24 = vadd.f32 %v895_v18, %v784_v2  ;;  %1220 = vst [vmem:[#allocation1 + $0x2] ss:$9 sm:$0xff] %v1200_v49  ;;  %v942_v53 = vadd.f32 %v940_v37, %v777_v11  ;;  %v1131_v20 = vmul.f32 %v4726_v55, %v4725_v26  ;;  %v973_v35 = vmul.f32 %v4727_v36, %v3796_v30  ;;  %v1311_v26 = vpop.xlane.xlu1 %1310 }
 0x112   : > { %v1626_v42 = vsel %vm170_vm0, %v1170_v58, 0.0  ;;  %1221 = vst [vmem:[#allocation1 + $0x3] ss:$9 sm:$0xff] %v1201_v28  ;;  %v1157_v18 = vmul.f32 %v2170_v56, %v4728_v41  ;;  %v1252_v61 = vmax.f32 %v1250_v32, 0.0  ;;  %1224 = vperm.xlu1 %2121, %v1217_v19   ;;  %2122 = vset.pattern.permute.xlu0 %v2239_v33  ;;  %v773_v60 = vadd.f32 %v771_v62, %v582_v48 }
 0x113   : > { %1627 = vadd.xlane.f32.xlu0 %v1626_v42  ;;  %v923_v6 = vadd.f32 %v921_v51, %v897_v24  ;;  %v968_v17 = vadd.f32 %v966_v40, %v942_v53  ;;  %v962_v22 = vmul.f32 %v4721_v21, %v4722_v50  ;;  %2123 = vset.pattern.permute.xlu2 %v2239_v33  ;;  %v2173_v51 = vld [vmem:[%s4246_s1 + $0x48] sm:$0xf]  ;;  %v1247_v21 = vpop.xlane.xlu2 %1246 }
 0x114   : > { %v1086_v12 = vmul.f32 %v2172_v13, %v2171_v45  ;;  %v1112_v37 = vmul.f32 %v3986_v39, %v4633_v14  ;;  %v1260_v44 = vperm.slane %v1252_v61, 4  ;;  %v1153_v40 = vmul.f32 %v2173_v51, %v4728_v41 }
 0x115   : > { %v949_v0 = vadd.f32 %v947_v43, %v923_v6  ;;  %v1133_v47 = vadd.f32 %v1131_v20, %v968_v17  ;;  %v1261_v5 = vperm.slane %v1252_v61, 5  ;;  %v964_v29 = vadd.f32 %v962_v22, %v773_v60  ;;  %v1372_v60 = vpop.xlane.xlu0 %1371 }
 0x116   : > { %v1138_v54 = vmul.f32 %v3960_v8, %v4678_v10  ;;  %v1262_v15 = vperm.slane %v1252_v61, 6  ;;  %v1263_v39 = vperm.slane %v1252_v61, 7  ;;  %v1249_v28 = vadd.f32 %v1247_v21, %v1247_v21 }
 0x117   : > { %v975_v50 = vadd.f32 %v973_v35, %v949_v0  ;;  %v1159_v23 = vadd.f32 %v1157_v18, %v1133_v47  ;;  %v1164_v27 = vmul.f32 %v3969_v7, %v3830_v3  ;;  %v1256_v9 = vperm.slane %v1252_v61, 0 }
 0x118   : > { %v961_v25 = vmul.f32 %v4668_v38, %v3796_v30  ;;  %v1257_v63 = vperm.slane %v1252_v61, 1  ;;  %v1155_v10 = vadd.f32 %v1153_v40, %v964_v29  ;;  %v1258_v8 = vperm.slane %v1252_v61, 2 }
 0x119   : > { %v1088_v59 = vadd.f32 %v1086_v12, %v975_v50  ;;  %v1222_v49 = vld [vmem:[#allocation1] sm:$0xff]  ;;  %v1821_v14 = vsel %vm1177_vm1, %v1159_v23, 0.0  ;;  %v1259_v33 = vperm.slane %v1252_v61, 3  ;;  %v1251_v34 = vadd.f32 %v1249_v28, %v3899_v16 }
 0x11a   : > { %1822 = vadd.xlane.f32.xlu2 %v1821_v14  ;;  %1276 = vst [vmem:[#allocation1 + $0x4] ss:$9 sm:$0xff] %v1260_v44  ;;  %1227 = vperm.xlu1 %2121, %v1222_v49   ;;  %v963_v57 = vadd.f32 %v961_v25, %v4042_v46  ;;  %v1152_v4 = vmul.f32 %v2171_v45, %v3830_v3  ;;  %v1885_v2 = vsel %vm1177_vm1, %v1155_v10, 0.0 }
 0x11b   : > { %v1114_v31 = vadd.f32 %v1112_v37, %v1088_v59  ;;  %1278 = vst [vmem:[#allocation1 + $0x5] ss:$9 sm:$0xff] %v1261_v5  ;;  %v1253_v38 = vmax.f32 %v1251_v34, 0.0  ;;  %v1308_v11 = vpop.xlane.xlu2 %1307  ;;  %v1313_v35 = vadd.f32 %v1311_v26, %v1311_v26  ;;  %v1376_v22 = vadd.f32 %v1372_v60, %v1372_v60 }
 0x11c   : > { %1280 = vst [vmem:[#allocation1 + $0x6] ss:$9 sm:$0xff] %v1262_v15  ;;  %v1154_v62 = vadd.f32 %v1152_v4, %v963_v57  ;;  %v1312_v58 = vadd.f32 %v1308_v11, %v1308_v11 }
 0x11d   : > { %v1140_v19 = vadd.f32 %v1138_v54, %v1114_v31  ;;  %1282 = vst [vmem:[#allocation1 + $0x7] ss:$9 sm:$0xff] %v1263_v39  ;;  %v1264_v32 = vperm.slane %v1253_v38, 0  ;;  %v1265_v48 = vperm.slane %v1253_v38, 1  ;;  %v1266_v46 = vperm.slane %v1253_v38, 2 }
 0x11e   : > { %1268 = vst [vmem:[#allocation1] ss:$9 sm:$0xff] %v1256_v9  ;;  %v1882_v24 = vsel %vm170_vm0, %v1154_v62, 0.0  ;;  %v1267_v3 = vperm.slane %v1253_v38, 3  ;;  %v1314_v1 = vadd.f32 %v1312_v58, %v3899_v16  ;;  %v1315_v6 = vadd.f32 %v1313_v35, %v3899_v16 }
 0x11f   : > { %v1166_v7 = vadd.f32 %v1164_v27, %v1140_v19  ;;  %1270 = vst [vmem:[#allocation1 + $0x1] ss:$9 sm:$0xff] %v1257_v63  ;;  %v1378_v37 = vadd.f32 %v1376_v22, %v3899_v16 }
 0x120   : > { %1272 = vst [vmem:[#allocation1 + $0x2] ss:$9 sm:$0xff] %v1258_v8  ;;  %v1316_v43 = vmax.f32 %v1314_v1, 0.0  ;;  %v1317_v17 = vmax.f32 %v1315_v6, 0.0  ;;  %v1439_v34 = vpop.xlane.xlu0 %1438 }
 0x121   : > { %v1690_v30 = vsel %vm170_vm0, %v1166_v7, 0.0  ;;  %1274 = vst [vmem:[#allocation1 + $0x3] ss:$9 sm:$0xff] %v1259_v33  ;;  %v1380_v44 = vmax.f32 %v1378_v37, 0.0  ;;  %vm1491_vm0 = vcmask 523712  }
 0x122   : > { %1691 = vadd.xlane.f32.xlu0 %v1690_v30  ;;  %1886 = vadd.xlane.f32.xlu2 %v1885_v2  ;;  %v1324_v53 = vperm.slane %v1316_v43, 4  ;;  %v1325_v55 = vperm.slane %v1316_v43, 5  ;;  %v1326_v20 = vperm.slane %v1316_v43, 6  ;;  %v1327_v36 = vperm.slane %v1316_v43, 7 }
 0x123   : > { %v1320_v56 = vperm.slane %v1316_v43, 0  ;;  %v1321_v41 = vperm.slane %v1316_v43, 1  ;;  %v1322_v18 = vperm.slane %v1316_v43, 2  ;;  %v1323_v61 = vperm.slane %v1316_v43, 3  ;;  %v1375_v40 = vpop.xlane.xlu2 %1374 }
 0x124   : > { %v1328_v0 = vperm.slane %v1317_v17, 0  ;;  %v1329_v45 = vperm.slane %v1317_v17, 1  ;;  %v1330_v13 = vperm.slane %v1317_v17, 2  ;;  %v1331_v12 = vperm.slane %v1317_v17, 3 }
 0x125   : > { %v1384_v51 = vperm.slane %v1380_v44, 0  ;;  %v1385_v21 = vperm.slane %v1380_v44, 1  ;;  %v1386_v50 = vperm.slane %v1380_v44, 2  ;;  %v1387_v5 = vperm.slane %v1380_v44, 3 }
 0x126   : > { %v1377_v29 = vadd.f32 %v1375_v40, %v1375_v40  ;;  %v1388_v54 = vperm.slane %v1380_v44, 4  ;;  %v1389_v15 = vperm.slane %v1380_v44, 5  ;;  %v1390_v59 = vperm.slane %v1380_v44, 6 }
 0x127   : > { %v1391_v49 = vperm.slane %v1380_v44, 7  ;;  %v1441_v30 = vadd.f32 %v1439_v34, %v1439_v34 }
 0x128   : > { %v1283_v52 = vld [vmem:[#allocation1] sm:$0xff]  ;;  %v1379_v14 = vadd.f32 %v1377_v29, %v3899_v16 }
 0x129   : > { %1284 = vst [vmem:[#allocation1] ss:$9 sm:$0xff] %v1264_v32  ;;  %v1443_v32 = vadd.f32 %v1441_v30, %v3899_v16 }
 0x12a   : > { %1883 = vadd.xlane.f32.xlu0 %v1882_v24  ;;  %1285 = vst [vmem:[#allocation1 + $0x1] ss:$9 sm:$0xff] %v1265_v48  ;;  %v1381_v39 = vmax.f32 %v1379_v14, 0.0  ;;  %v1500_v24 = vpop.xlane.xlu0 %1499 }
 0x12b   : > { %1286 = vst [vmem:[#allocation1 + $0x2] ss:$9 sm:$0xff] %v1266_v46  ;;  %v1436_v28 = vpop.xlane.xlu2 %1435  ;;  %v1445_v48 = vmax.f32 %v1443_v32, 0.0  ;;  %v1504_v46 = vadd.f32 %v1500_v24, %v1500_v24 }
 0x12c   : > { %1287 = vst [vmem:[#allocation1 + $0x3] ss:$9 sm:$0xff] %v1267_v3  ;;  %v1440_v27 = vadd.f32 %v1436_v28, %v1436_v28  ;;  %v1392_v9 = vperm.slane %v1381_v39, 0  ;;  %v1393_v31 = vperm.slane %v1381_v39, 1  ;;  %v1394_v25 = vperm.slane %v1381_v39, 2 }
 0x12d   : > { %v1395_v10 = vperm.slane %v1381_v39, 3  ;;  %v1457_v3 = vperm.slane %v1445_v48, 1  ;;  %v1458_v1 = vperm.slane %v1445_v48, 2  ;;  %v1506_v26 = vadd.f32 %v1504_v46, %v3899_v16 }
 0x12e   : > { %v1442_v8 = vadd.f32 %v1440_v27, %v3899_v16 }
 0x130   : > { %v1444_v19 = vmax.f32 %v1442_v8, 0.0 }
 0x132   : > { %v1448_v33 = vperm.slane %v1444_v19, 0  ;;  %v1449_v7 = vperm.slane %v1444_v19, 1  ;;  %v1450_v57 = vperm.slane %v1444_v19, 2  ;;  %v1451_v2 = vperm.slane %v1444_v19, 3 }
 0x133   : > { %v1288_v42 = vld [vmem:[#allocation1] sm:$0xff]  ;;  %v1452_v38 = vperm.slane %v1444_v19, 4  ;;  %v1453_v11 = vperm.slane %v1444_v19, 5  ;;  %v1454_v62 = vperm.slane %v1444_v19, 6  ;;  %v1455_v58 = vperm.slane %v1444_v19, 7 }
 0x134   : > { %1340 = vst [vmem:[#allocation1 + $0x4] ss:$9 sm:$0xff] %v1324_v53  ;;  %1293 = vperm.xlu1 %2121, %v1288_v42   ;;  %v1459_v53 = vperm.slane %v1445_v48, 3  ;;  %v1503_v42 = vpop.xlane.xlu1 %1502 }
 0x135   : > { %1342 = vst [vmem:[#allocation1 + $0x5] ss:$9 sm:$0xff] %v1325_v55  ;;  %v1508_v55 = vmax.f32 %v1506_v26, 0.0 }
 0x136   : > { %1344 = vst [vmem:[#allocation1 + $0x6] ss:$9 sm:$0xff] %v1326_v20 }
 0x137   : > { %1346 = vst [vmem:[#allocation1 + $0x7] ss:$9 sm:$0xff] %v1327_v36  ;;  %v1512_v20 = vperm.slane %v1508_v55, 0  ;;  %v1513_v36 = vperm.slane %v1508_v55, 1  ;;  %v1514_v35 = vperm.slane %v1508_v55, 2  ;;  %v1517_v6 = vperm.slane %v1508_v55, 5 }
 0x138   : > { %1332 = vst [vmem:[#allocation1] ss:$9 sm:$0xff] %v1320_v56  ;;  %v1518_v17 = vperm.slane %v1508_v55, 6  ;;  %v1519_v60 = vperm.slane %v1508_v55, 7 }
 0x139   : > { %1334 = vst [vmem:[#allocation1 + $0x1] ss:$9 sm:$0xff] %v1321_v41  ;;  %v1515_v41 = vperm.slane %v1508_v55, 3 }
 0x13a   : > { %1336 = vst [vmem:[#allocation1 + $0x2] ss:$9 sm:$0xff] %v1322_v18  ;;  %v1505_v18 = vadd.f32 %v1503_v42, %v1503_v42 }
 0x13b   : > { %1338 = vst [vmem:[#allocation1 + $0x3] ss:$9 sm:$0xff] %v1323_v61  ;;  %v1516_v61 = vperm.slane %v1508_v55, 4 }
 0x13c   : > { %v1507_v22 = vadd.f32 %v1505_v18, %v3899_v16 }
 0x13e   : > { %1290 = vperm.xlu0 %2122, %v1283_v52   ;;  %v1456_v52 = vperm.slane %v1445_v48, 0 }
 0x142   : > { %v1347_v47 = vld [vmem:[#allocation1] sm:$0xff] }
 0x143   : > { %1348 = vst [vmem:[#allocation1] ss:$9 sm:$0xff] %v1328_v0  ;;  %1354 = vperm.xlu2 %2123, %v1347_v47   ;;  %v1509_v0 = vmax.f32 %v1507_v22, 0.0  ;;  %v1229_v22 = vlaneseq }
 0x144   : > { %1349 = vst [vmem:[#allocation1 + $0x1] ss:$9 sm:$0xff] %v1329_v45 }
 0x145   : > { %1350 = vst [vmem:[#allocation1 + $0x2] ss:$9 sm:$0xff] %v1330_v13  ;;  %v1521_v47 = vperm.slane %v1509_v0, 1  ;;  %v1522_v37 = vperm.slane %v1509_v0, 2  ;;  %vm1239_vm3 = vcmp.lt.s32.totalorder %v1229_v22, 12  ;;  %vm4130_vm5 = vcmp.ge.s32.totalorder %v1229_v22, 12 }
 0x146   : > { %1351 = vst [vmem:[#allocation1 + $0x3] ss:$9 sm:$0xff] %v1331_v12  ;;  %v1520_v12 = vperm.slane %v1509_v0, 0  ;;  %vm4135_vm6 = vcmp.lt.s32.totalorder %v1229_v22, 24  ;;  %vm4141_vm7 = vcmp.ge.s32.totalorder %v1229_v22, 24  ;;  %vm1367_vm8 = vcmp.lt.s32.totalorder %v1229_v22, 36 }
 0x147   : > { %vm1304_vm10 = vmand %vm4130_vm5, %vm4135_vm6  ;;  %vm1430_vm13 = vcmp.ge.s32.totalorder %v1229_v22, 36  ;;  %vm1431_vm14 = vcmp.lt.s32.totalorder %v1229_v22, 48  ;;  %vm1494_vm1 = vcmp.ge.s32.totalorder %v1229_v22, 48  ;;  %vm1558_vm5 = vcmp.ge.s32.totalorder %v1229_v22, 60 }
 0x148   : > { %vm1368_vm11 = vmand %vm4141_vm7, %vm1367_vm8  ;;  %vm1559_vm6 = vcmp.lt.s32.totalorder %v1229_v22, 72  ;;  %vm1619_vm8 = vcmask 720512  }
 0x149   : > { %vm1432_vm15 = vmand %vm1430_vm13, %vm1431_vm14  ;;  %vm1686_vm13 = vcmp.ge.s32.totalorder %v1229_v22, 84  ;;  %vm1687_vm14 = vcmp.lt.s32.totalorder %v1229_v22, 96 }
 0x14a   : > { %vm1560_vm7 = vmand %vm1558_vm5, %vm1559_vm6  ;;  %vm1815_vm5 = vcmp.lt.s32.totalorder %v1229_v22, 120  ;;  %vm1811_vm6 = vcmask 1015712  }
 0x14d   : > { %v1352_v23 = vld [vmem:[#allocation1] sm:$0xff] }
 0x14e   : > { %1396 = vst [vmem:[#allocation1] ss:$9 sm:$0xff] %v1384_v51  ;;  %1357 = vperm.xlu2 %2123, %v1352_v23   ;;  %v1523_v51 = vperm.slane %v1509_v0, 3 }
 0x14f   : > { %1398 = vst [vmem:[#allocation1 + $0x1] ss:$9 sm:$0xff] %v1385_v21 }
 0x150   : > { %1400 = vst [vmem:[#allocation1 + $0x2] ss:$9 sm:$0xff] %v1386_v50 }
 0x151   : > { %1402 = vst [vmem:[#allocation1 + $0x3] ss:$9 sm:$0xff] %v1387_v5  ;;  %v1567_v5 = vpop.xlane.xlu2 %1566 }
 0x152   : > { %1404 = vst [vmem:[#allocation1 + $0x4] ss:$9 sm:$0xff] %v1388_v54  ;;  %v1569_v54 = vadd.f32 %v1567_v5, %v1567_v5 }
 0x153   : > { %1406 = vst [vmem:[#allocation1 + $0x5] ss:$9 sm:$0xff] %v1389_v15 }
 0x154   : > { %1408 = vst [vmem:[#allocation1 + $0x6] ss:$9 sm:$0xff] %v1390_v59  ;;  %v1571_v28 = vadd.f32 %v1569_v54, %v3899_v16 }
 0x155   : > { %1410 = vst [vmem:[#allocation1 + $0x7] ss:$9 sm:$0xff] %v1391_v49 }
 0x15c   : > { %v1411_v63 = vld [vmem:[#allocation1] sm:$0xff] }
 0x15d   : > { %1412 = vst [vmem:[#allocation1] ss:$9 sm:$0xff] %v1392_v9  ;;  %1418 = vperm.xlu1 %2121, %v1411_v63   ;;  %v1573_v9 = vmax.f32 %v1571_v28, 0.0 }
 0x15e   : > { %1413 = vst [vmem:[#allocation1 + $0x1] ss:$9 sm:$0xff] %v1393_v31 }
 0x15f   : > { %1414 = vst [vmem:[#allocation1 + $0x2] ss:$9 sm:$0xff] %v1394_v25  ;;  %v1631_v25 = vpop.xlane.xlu2 %1630  ;;  %v1585_v8 = vperm.slane %v1573_v9, 1  ;;  %v1586_v19 = vperm.slane %v1573_v9, 2 }
 0x160   : > { %1415 = vst [vmem:[#allocation1 + $0x3] ss:$9 sm:$0xff] %v1395_v10  ;;  %v1584_v10 = vperm.slane %v1573_v9, 0 }
 0x165   : > { %v1564_v45 = vpop.xlane.xlu0 %1563 }
 0x166   : > { %v1568_v13 = vadd.f32 %v1564_v45, %v1564_v45 }
 0x167   : > { %v1416_v4 = vld [vmem:[#allocation1] sm:$0xff] }
 0x168   : > { %1460 = vst [vmem:[#allocation1] ss:$9 sm:$0xff] %v1448_v33  ;;  %1421 = vperm.xlu1 %2121, %v1416_v4   ;;  %v1570_v40 = vadd.f32 %v1568_v13, %v3899_v16  ;;  %v1587_v33 = vperm.slane %v1573_v9, 3  ;;  %v1695_v4 = vpop.xlane.xlu2 %1694 }
 0x169   : > { %1462 = vst [vmem:[#allocation1 + $0x1] ss:$9 sm:$0xff] %v1449_v7  ;;  %v1697_v45 = vadd.f32 %v1695_v4, %v1695_v4 }
 0x16a   : > { %1464 = vst [vmem:[#allocation1 + $0x2] ss:$9 sm:$0xff] %v1450_v57  ;;  %v1572_v21 = vmax.f32 %v1570_v40, 0.0 }
 0x16b   : > { %1466 = vst [vmem:[#allocation1 + $0x3] ss:$9 sm:$0xff] %v1451_v2  ;;  %v1699_v40 = vadd.f32 %v1697_v45, %v3899_v16 }
 0x16c   : > { %1468 = vst [vmem:[#allocation1 + $0x4] ss:$9 sm:$0xff] %v1452_v38  ;;  %v1576_v50 = vperm.slane %v1572_v21, 0  ;;  %v1577_v23 = vperm.slane %v1572_v21, 1  ;;  %v1578_v29 = vperm.slane %v1572_v21, 2  ;;  %v1579_v59 = vperm.slane %v1572_v21, 3 }
 0x16d   : > { %1470 = vst [vmem:[#allocation1 + $0x5] ss:$9 sm:$0xff] %v1453_v11  ;;  %v1580_v49 = vperm.slane %v1572_v21, 4  ;;  %v1581_v14 = vperm.slane %v1572_v21, 5  ;;  %v1582_v39 = vperm.slane %v1572_v21, 6  ;;  %v1583_v27 = vperm.slane %v1572_v21, 7 }
 0x16e   : > { %1472 = vst [vmem:[#allocation1 + $0x6] ss:$9 sm:$0xff] %v1454_v62  ;;  %v1633_v11 = vadd.f32 %v1631_v25, %v1631_v25  ;;  %v1701_v5 = vmax.f32 %v1699_v40, 0.0 }
 0x16f   : > { %1474 = vst [vmem:[#allocation1 + $0x7] ss:$9 sm:$0xff] %v1455_v58 }
 0x170   : > { %v1635_v46 = vadd.f32 %v1633_v11, %v3899_v16  ;;  %v1714_v28 = vperm.slane %v1701_v5, 2 }
 0x176   : > { %v1475_v43 = vld [vmem:[#allocation1] sm:$0xff] }
 0x177   : > { %1476 = vst [vmem:[#allocation1] ss:$9 sm:$0xff] %v1456_v52  ;;  %1482 = vperm.xlu1 %2121, %v1475_v43   ;;  %v4095_v52 = vpop.xlane.xlu2 %1758 }
 0x178   : > { %1477 = vst [vmem:[#allocation1 + $0x1] ss:$9 sm:$0xff] %v1457_v3 }
 0x179   : > { %1478 = vst [vmem:[#allocation1 + $0x2] ss:$9 sm:$0xff] %v1458_v1  ;;  %v1637_v1 = vmax.f32 %v1635_v46, 0.0 }
 0x17a   : > { %1479 = vst [vmem:[#allocation1 + $0x3] ss:$9 sm:$0xff] %v1459_v53  ;;  %v1756_v53 = vpop.xlane.xlu1 %1755 }
 0x17b   : > { %v1648_v55 = vperm.slane %v1637_v1, 0  ;;  %v1650_v42 = vperm.slane %v1637_v1, 2 }
 0x181   : > { %v1480_v56 = vld [vmem:[#allocation1] sm:$0xff] }
 0x182   : > { %1524 = vst [vmem:[#allocation1] ss:$9 sm:$0xff] %v1512_v20  ;;  %1485 = vperm.xlu2 %2123, %v1480_v56   ;;  %v1649_v20 = vperm.slane %v1637_v1, 1 }
 0x183   : > { %1526 = vst [vmem:[#allocation1 + $0x1] ss:$9 sm:$0xff] %v1513_v36  ;;  %v4097_v36 = vpop.xlane.xlu2 %1819 }
 0x184   : > { %1528 = vst [vmem:[#allocation1 + $0x2] ss:$9 sm:$0xff] %v1514_v35  ;;  %v1651_v35 = vperm.slane %v1637_v1, 3 }
 0x185   : > { %1530 = vst [vmem:[#allocation1 + $0x3] ss:$9 sm:$0xff] %v1515_v41 }
 0x186   : > { %1532 = vst [vmem:[#allocation1 + $0x4] ss:$9 sm:$0xff] %v1516_v61  ;;  %v1628_v31 = vpop.xlane.xlu0 %1627  ;;  %v1225_v61 = vpop.permute.xlu1 %1224 }
 0x187   : > { %1534 = vst [vmem:[#allocation1 + $0x5] ss:$9 sm:$0xff] %v1517_v6  ;;  %v1632_v63 = vadd.f32 %v1628_v31, %v1628_v31 }
 0x188   : > { %1536 = vst [vmem:[#allocation1 + $0x6] ss:$9 sm:$0xff] %v1518_v17 }
 0x189   : > { %1538 = vst [vmem:[#allocation1 + $0x7] ss:$9 sm:$0xff] %v1519_v60  ;;  %v1634_v7 = vadd.f32 %v1632_v63, %v3899_v16 }
 0x18b   : > { %v1636_v57 = vmax.f32 %v1634_v7, 0.0 }
 0x18d   : > { %v1640_v2 = vperm.slane %v1636_v57, 0  ;;  %v1641_v30 = vperm.slane %v1636_v57, 1  ;;  %v1642_v38 = vperm.slane %v1636_v57, 2  ;;  %v1643_v58 = vperm.slane %v1636_v57, 3  ;;  %v4100_v17 = vpop.xlane.xlu2 %1822 }
 0x18e   : > { %v1644_v32 = vperm.slane %v1636_v57, 4  ;;  %v1645_v48 = vperm.slane %v1636_v57, 5  ;;  %v1646_v24 = vperm.slane %v1636_v57, 6  ;;  %v1647_v3 = vperm.slane %v1636_v57, 7 }
 0x190   : > { %v1539_v44 = vld [vmem:[#allocation1] sm:$0xff] }
 0x191   : > { %1540 = vst [vmem:[#allocation1] ss:$9 sm:$0xff] %v1520_v12  ;;  %1546 = vperm.xlu0 %2122, %v1539_v44   ;;  %v4103_v44 = vand.u32 127, %v1229_v22 }
 0x192   : > { %1541 = vst [vmem:[#allocation1 + $0x1] ss:$9 sm:$0xff] %v1521_v47 }
 0x193   : > { %1542 = vst [vmem:[#allocation1 + $0x2] ss:$9 sm:$0xff] %v1522_v37  ;;  %v1553_v1 = vadd.s32 4294967228, %v4103_v44 }
 0x194   : > { %1543 = vst [vmem:[#allocation1 + $0x3] ss:$9 sm:$0xff] %v1523_v51 }
 0x195   : > { %v1692_v43 = vpop.xlane.xlu0 %1691 }
 0x196   : > { %v1696_v26 = vadd.f32 %v1692_v43, %v1692_v43 }
 0x198   : > { %v1698_v41 = vadd.f32 %v1696_v26, %v3899_v16 }
 0x19a   : > { %v1700_v18 = vmax.f32 %v1698_v41, 0.0  ;;  %v1824_v41 = vadd.f32 %v4097_v36, %v4097_v36  ;;  %v1825_v36 = vadd.f32 %v4100_v17, %v4100_v17 }
 0x19b   : > { %v1544_v15 = vld [vmem:[#allocation1] sm:$0xff] }
 0x19c   : > { %1588 = vst [vmem:[#allocation1] ss:$9 sm:$0xff] %v1576_v50  ;;  %1549 = vperm.xlu2 %2123, %v1544_v15   ;;  %v1704_v6 = vperm.slane %v1700_v18, 0  ;;  %v1705_v60 = vperm.slane %v1700_v18, 1  ;;  %v1706_v0 = vperm.slane %v1700_v18, 2  ;;  %v1707_v12 = vperm.slane %v1700_v18, 3 }
 0x19d   : > { %1590 = vst [vmem:[#allocation1 + $0x1] ss:$9 sm:$0xff] %v1577_v23  ;;  %v1708_v47 = vperm.slane %v1700_v18, 4  ;;  %v1709_v37 = vperm.slane %v1700_v18, 5  ;;  %v1710_v51 = vperm.slane %v1700_v18, 6  ;;  %v1711_v21 = vperm.slane %v1700_v18, 7  ;;  %v1228_v23 = vpop.permute.xlu1 %1227  ;;  %v4118_v25 = vpop.xlane.xlu0 %1883 }
 0x19e   : > { %1592 = vst [vmem:[#allocation1 + $0x2] ss:$9 sm:$0xff] %v1578_v29  ;;  %v1232_v50 = vadd.s32 4294967288, %v4103_v44  ;;  %v4108_v29 = vpop.xlane.xlu2 %1886  ;;  %v1231_v15 = vperm.slane %v1225_v61, %v4103_v44 }
 0x19f   : > { %1594 = vst [vmem:[#allocation1 + $0x3] ss:$9 sm:$0xff] %v1579_v59  ;;  %v1760_v59 = vadd.f32 %v1756_v53, %v1756_v53 }
 0x1a0   : > { %1596 = vst [vmem:[#allocation1 + $0x4] ss:$9 sm:$0xff] %v1580_v49  ;;  %v1233_v54 = vperm.slane %v1228_v23, %v1232_v50  ;;  %v1712_v49 = vperm.slane %v1701_v5, 0 }
 0x1a1   : > { %1598 = vst [vmem:[#allocation1 + $0x5] ss:$9 sm:$0xff] %v1581_v14  ;;  %v1762_v9 = vadd.f32 %v1760_v59, %v3899_v16 }
 0x1a2   : > { %1600 = vst [vmem:[#allocation1 + $0x6] ss:$9 sm:$0xff] %v1582_v39  ;;  %v1235_v14 = vsel %vm1234_vm2, %v1233_v54, %v1231_v15  ;;  %v1713_v39 = vperm.slane %v1701_v5, 1  ;;  %v1425_v54 = vadd.s32 4294967252, %v4103_v44  ;;  %vm1495_vm2 = vcmp.lt.s32.totalorder %v1229_v22, 60 }
 0x1a3   : > { %1602 = vst [vmem:[#allocation1 + $0x7] ss:$9 sm:$0xff] %v1583_v27  ;;  %v1715_v27 = vperm.slane %v1701_v5, 3  ;;  %v1423_v5 = vadd.s32 4294967260, %v4103_v44 }
 0x1a4   : > { %1241 = vst.msk [vmem:[%s4115_s21] sm:$0x1] %vm1239_vm3, %v1235_v14  ;;  %v1827_v14 = vadd.f32 %v1825_v36, %v3899_v16  ;;  %vm1496_vm3 = vmand %vm1494_vm1, %vm1495_vm2  ;;  %v1681_v36 = vadd.s32 4294967204, %v4103_v44  ;;  %vm1750_vm1 = vcmp.ge.s32.totalorder %v1229_v22, 96  ;;  %vm1751_vm2 = vcmp.lt.s32.totalorder %v1229_v22, 108 }
 0x1a6   : > { %v1355_v63 = vpop.permute.xlu2 %1354  ;;  %v1294_v57 = vpop.permute.xlu1 %1293 }
 0x1aa   : > { %v1603_v34 = vld [vmem:[#allocation1] sm:$0xff] }
 0x1ab   : > { %1604 = vst [vmem:[#allocation1] ss:$9 sm:$0xff] %v1584_v10  ;;  %1610 = vperm.xlu1 %2121, %v1603_v34   ;;  %v1764_v10 = vmax.f32 %v1762_v9, 0.0  ;;  %v1297_v34 = vadd.s32 4294967276, %v4103_v44  ;;  %v1888_v9 = vadd.f32 %v4118_v25, %v4118_v25 }
 0x1ac   : > { %1605 = vst [vmem:[#allocation1 + $0x1] ss:$9 sm:$0xff] %v1585_v8 }
 0x1ad   : > { %1606 = vst [vmem:[#allocation1 + $0x2] ss:$9 sm:$0xff] %v1586_v19  ;;  %v1768_v8 = vperm.slane %v1764_v10, 0  ;;  %v1761_v19 = vadd.f32 %v4095_v52, %v4095_v52  ;;  %v1770_v7 = vperm.slane %v1764_v10, 2  ;;  %v1771_v4 = vperm.slane %v1764_v10, 3 }
 0x1ae   : > { %1607 = vst [vmem:[#allocation1 + $0x3] ss:$9 sm:$0xff] %v1587_v33  ;;  %v1769_v33 = vperm.slane %v1764_v10, 1  ;;  %v1298_v46 = vperm.slane %v1294_v57, %v1297_v34  ;;  %v1359_v52 = vadd.s32 4294967272, %v4103_v44  ;;  %v1775_v43 = vperm.slane %v1764_v10, 7 }
 0x1af   : > { %v1890_v57 = vadd.f32 %v1888_v9, %v3899_v16  ;;  %v1807_v9 = vadd.s32 4294967188, %v4103_v44 }
 0x1b0   : > { %v1291_v11 = vpop.permute.xlu0 %1290 }
 0x1b5   : > { %v1608_v62 = vld [vmem:[#allocation1] sm:$0xff] }
 0x1b6   : > { %1652 = vst [vmem:[#allocation1] ss:$9 sm:$0xff] %v1640_v2  ;;  %1613 = vperm.xlu1 %2121, %v1608_v62   ;;  %v1361_v62 = vadd.s32 4294967264, %v4103_v44 }
 0x1b7   : > { %1654 = vst [vmem:[#allocation1 + $0x1] ss:$9 sm:$0xff] %v1641_v30  ;;  %v4124_v30 = vadd.s32 4294967284, %v4103_v44 }
 0x1b8   : > { %1656 = vst [vmem:[#allocation1 + $0x2] ss:$9 sm:$0xff] %v1642_v38  ;;  %v1772_v38 = vperm.slane %v1764_v10, 4 }
 0x1b9   : > { %1658 = vst [vmem:[#allocation1 + $0x3] ss:$9 sm:$0xff] %v1643_v58  ;;  %v1763_v58 = vadd.f32 %v1761_v19, %v3899_v16  ;;  %v1296_v53 = vperm.slane %v1291_v11, %v4124_v30  ;;  %v1487_v19 = vadd.s32 4294967248, %v4103_v44  ;;  %v1892_v11 = vmax.f32 %v1890_v57, 0.0 }
 0x1ba   : > { %1660 = vst [vmem:[#allocation1 + $0x4] ss:$9 sm:$0xff] %v1644_v32  ;;  %v1773_v32 = vperm.slane %v1764_v10, 5  ;;  %v1871_v57 = vadd.s32 4294967176, %v4103_v44 }
 0x1bb   : > { %1662 = vst [vmem:[#allocation1 + $0x5] ss:$9 sm:$0xff] %v1645_v48  ;;  %v1774_v48 = vperm.slane %v1764_v10, 6  ;;  %v1901_v26 = vperm.slane %v1892_v11, 5 }
 0x1bc   : > { %1664 = vst [vmem:[#allocation1 + $0x6] ss:$9 sm:$0xff] %v1646_v24  ;;  %v1358_v24 = vpop.permute.xlu2 %1357 }
 0x1bd   : > { %1666 = vst [vmem:[#allocation1 + $0x7] ss:$9 sm:$0xff] %v1647_v3 }
 0x1c4   : > { %v1667_v56 = vld [vmem:[#allocation1] sm:$0xff] }
 0x1c5   : > { %1668 = vst [vmem:[#allocation1] ss:$9 sm:$0xff] %v1648_v55  ;;  %1674 = vperm.xlu1 %2121, %v1667_v56   ;;  %v1362_v55 = vperm.slane %v1358_v24, %v1361_v62  ;;  %v1896_v62 = vperm.slane %v1892_v11, 0 }
 0x1c6   : > { %1669 = vst [vmem:[#allocation1 + $0x1] ss:$9 sm:$0xff] %v1649_v20  ;;  %v1300_v20 = vsel %vm1299_vm4, %v1298_v46, %v1296_v53  ;;  %v1889_v46 = vadd.f32 %v4108_v29, %v4108_v29  ;;  %vm1555_vm4 = vcmask 622112  }
 0x1c7   : > { %1670 = vst [vmem:[#allocation1 + $0x2] ss:$9 sm:$0xff] %v1650_v42  ;;  %v1360_v42 = vperm.slane %v1355_v63, %v1359_v52  ;;  %v1899_v52 = vperm.slane %v1892_v11, 3 }
 0x1c8   : > { %1671 = vst [vmem:[#allocation1 + $0x3] ss:$9 sm:$0xff] %v1651_v35  ;;  %v1765_v35 = vmax.f32 %v1763_v58, 0.0  ;;  %v1897_v58 = vperm.slane %v1892_v11, 1 }
 0x1c9   : > { %v1364_v56 = vsel %vm1363_vm9, %v1362_v55, %v1360_v42  ;;  %1305 = vst.msk [vmem:[%s4115_s21] sm:$0x1] %vm1304_vm10, %v1300_v20  ;;  %v1902_v20 = vperm.slane %v1892_v11, 6  ;;  %v1891_v42 = vadd.f32 %v1889_v46, %v3899_v16  ;;  %vm1622_vm9 = vcmp.ge.s32.totalorder %v1229_v22, 72 }
 0x1ca   : > { %1369 = vst.msk [vmem:[%s4115_s21] sm:$0x1] %vm1368_vm11, %v1364_v56  ;;  %v1776_v18 = vperm.slane %v1765_v35, 0  ;;  %v1777_v61 = vperm.slane %v1765_v35, 1  ;;  %vm1623_vm10 = vcmp.lt.s32.totalorder %v1229_v22, 84 }
 0x1cb   : > { %vm1624_vm11 = vmand %vm1622_vm9, %vm1623_vm10  ;;  %vm1879_vm9 = vcmp.lt.s32.totalorder %v1229_v22, 132  ;;  %vm1875_vm10 = vcmask 1040384  }
 0x1cf   : > { %v1672_v13 = vld [vmem:[#allocation1] sm:$0xff] }
 0x1d0   : > { %1716 = vst [vmem:[#allocation1] ss:$9 sm:$0xff] %v1704_v6  ;;  %1677 = vperm.xlu0 %2122, %v1672_v13   ;;  %v1778_v6 = vperm.slane %v1765_v35, 2  ;;  %v1419_v13 = vpop.permute.xlu1 %1418 }
 0x1d1   : > { %1718 = vst [vmem:[#allocation1 + $0x1] ss:$9 sm:$0xff] %v1705_v60  ;;  %v1779_v60 = vperm.slane %v1765_v35, 3  ;;  %v1424_v17 = vperm.slane %v1419_v13, %v1423_v5  ;;  %v1903_v35 = vperm.slane %v1892_v11, 7 }
 0x1d2   : > { %1720 = vst [vmem:[#allocation1 + $0x2] ss:$9 sm:$0xff] %v1706_v0  ;;  %v1826_v0 = vadd.f32 %v1824_v41, %v3899_v16  ;;  %v1893_v41 = vmax.f32 %v1891_v42, 0.0 }
 0x1d3   : > { %1722 = vst [vmem:[#allocation1 + $0x3] ss:$9 sm:$0xff] %v1707_v12 }
 0x1d4   : > { %1724 = vst [vmem:[#allocation1 + $0x4] ss:$9 sm:$0xff] %v1708_v47  ;;  %v1828_v12 = vmax.f32 %v1826_v0, 0.0  ;;  %v1907_v16 = vperm.slane %v1893_v41, 3 }
 0x1d5   : > { %1726 = vst [vmem:[#allocation1 + $0x5] ss:$9 sm:$0xff] %v1709_v37 }
 0x1d6   : > { %1728 = vst [vmem:[#allocation1 + $0x6] ss:$9 sm:$0xff] %v1710_v51  ;;  %v1832_v47 = vperm.slane %v1828_v12, 0  ;;  %v1833_v37 = vperm.slane %v1828_v12, 1  ;;  %v1834_v51 = vperm.slane %v1828_v12, 2  ;;  %v1835_v40 = vperm.slane %v1828_v12, 3 }
 0x1d7   : > { %1730 = vst [vmem:[#allocation1 + $0x7] ss:$9 sm:$0xff] %v1711_v21  ;;  %v1836_v50 = vperm.slane %v1828_v12, 4  ;;  %v1837_v23 = vperm.slane %v1828_v12, 5  ;;  %v1838_v59 = vperm.slane %v1828_v12, 6 }
 0x1da   : > { %v1422_v15 = vpop.permute.xlu1 %1421 }
 0x1dc   : > { %v1486_v10 = vpop.permute.xlu2 %1485 }
 0x1de   : > { %v1731_v31 = vld [vmem:[#allocation1] sm:$0xff] }
 0x1df   : > { %1732 = vst [vmem:[#allocation1] ss:$9 sm:$0xff] %v1712_v49  ;;  %1738 = vperm.xlu2 %2123, %v1731_v31   ;;  %v1839_v49 = vperm.slane %v1828_v12, 7  ;;  %v1489_v31 = vadd.s32 4294967240, %v4103_v44  ;;  %v1615_v12 = vadd.s32 4294967224, %v4103_v44 }
 0x1e0   : > { %1733 = vst [vmem:[#allocation1 + $0x1] ss:$9 sm:$0xff] %v1713_v39  ;;  %v1426_v39 = vperm.slane %v1422_v15, %v1425_v54 }
 0x1e1   : > { %1734 = vst [vmem:[#allocation1 + $0x2] ss:$9 sm:$0xff] %v1714_v28  ;;  %v1829_v28 = vmax.f32 %v1827_v14, 0.0 }
 0x1e2   : > { %1735 = vst [vmem:[#allocation1 + $0x3] ss:$9 sm:$0xff] %v1715_v27  ;;  %v1428_v27 = vsel %vm1427_vm12, %v1426_v39, %v1424_v17  ;;  %vm1683_vm12 = vcmask 818912  }
 0x1e3   : > { %1433 = vst.msk [vmem:[%s4115_s21] sm:$0x1] %vm1432_vm15, %v1428_v27  ;;  %v1840_v63 = vperm.slane %v1829_v28, 0  ;;  %v1842_v34 = vperm.slane %v1829_v28, 2  ;;  %vm1688_vm15 = vmand %vm1686_vm13, %vm1687_vm14  ;;  %vm1942_vm13 = vcmp.lt.s32.totalorder %v1229_v22, 16  ;;  %vm1938_vm14 = vcmask 162912  }
 0x1e9   : > { %v1736_v2 = vld [vmem:[#allocation1] sm:$0xff] }
 0x1ea   : > { %1780 = vst [vmem:[#allocation1] ss:$9 sm:$0xff] %v1768_v8  ;;  %1741 = vperm.xlu1 %2121, %v1736_v2   ;;  %v1841_v8 = vperm.slane %v1829_v28, 1  ;;  %v1490_v2 = vperm.slane %v1486_v10, %v1489_v31  ;;  %v1809_v31 = vadd.s32 4294967180, %v4103_v44 }
 0x1eb   : > { %1782 = vst [vmem:[#allocation1 + $0x1] ss:$9 sm:$0xff] %v1769_v33  ;;  %v1483_v33 = vpop.permute.xlu1 %1482 }
 0x1ec   : > { %1784 = vst [vmem:[#allocation1 + $0x2] ss:$9 sm:$0xff] %v1770_v7  ;;  %v1843_v7 = vperm.slane %v1829_v28, 3 }
 0x1ed   : > { %1786 = vst [vmem:[#allocation1 + $0x3] ss:$9 sm:$0xff] %v1771_v4 }
 0x1ee   : > { %1788 = vst [vmem:[#allocation1 + $0x4] ss:$9 sm:$0xff] %v1772_v38  ;;  %v1488_v38 = vperm.slane %v1483_v33, %v1487_v19 }
 0x1ef   : > { %1790 = vst [vmem:[#allocation1 + $0x5] ss:$9 sm:$0xff] %v1773_v32  ;;  %v1551_v32 = vadd.s32 4294967236, %v4103_v44 }
 0x1f0   : > { %1792 = vst [vmem:[#allocation1 + $0x6] ss:$9 sm:$0xff] %v1774_v48  ;;  %v1492_v25 = vsel %vm1491_vm0, %v1490_v2, %v1488_v38  ;;  %v1898_v48 = vperm.slane %v1892_v11, 2  ;;  %vm1747_vm0 = vcmask 917312  }
 0x1f1   : > { %1794 = vst [vmem:[#allocation1 + $0x7] ss:$9 sm:$0xff] %v1775_v43  ;;  %v1900_v43 = vperm.slane %v1892_v11, 4  ;;  %v1935_v11 = vadd.s32 4294967292, %v4103_v44 }
 0x1f2   : > { %1497 = vst.msk [vmem:[%s4115_s21] sm:$0x1] %vm1496_vm3, %v1492_v25  ;;  %vm1752_vm3 = vmand %vm1750_vm1, %vm1751_vm2 }
 0x1f6   : > { %v1550_v53 = vpop.permute.xlu2 %1549 }
 0x1f7   : > { %v1554_v29 = vperm.slane %v1550_v53, %v1553_v1 }
 0x1f8   : > { %v1795_v45 = vld [vmem:[#allocation1] sm:$0xff] }
 0x1f9   : > { %1802 = vperm.xlu2 %2123, %v1795_v45   ;;  %1796 = vst [vmem:[#allocation1] ss:$9 sm:$0xff] %v1776_v18  ;;  %v1904_v18 = vperm.slane %v1893_v41, 0  ;;  %v1617_v45 = vadd.s32 4294967216, %v4103_v44 }
 0x1fa   : > { %1797 = vst [vmem:[#allocation1 + $0x1] ss:$9 sm:$0xff] %v1777_v61  ;;  %v1905_v61 = vperm.slane %v1893_v41, 1 }
 0x1fb   : > { %1798 = vst [vmem:[#allocation1 + $0x2] ss:$9 sm:$0xff] %v1778_v6 }
 0x1fc   : > { %1799 = vst [vmem:[#allocation1 + $0x3] ss:$9 sm:$0xff] %v1779_v60  ;;  %v1906_v60 = vperm.slane %v1893_v41, 2 }
 0x203   : > { %v1800_v21 = vld [vmem:[#allocation1] sm:$0xff]  ;;  %v1547_v24 = vpop.permute.xlu0 %1546 }
 0x204   : > { %1805 = vperm.xlu0 %2122, %v1800_v21   ;;  %1844 = vst [vmem:[#allocation1] ss:$9 sm:$0xff] %v1832_v47  ;;  %v1552_v55 = vperm.slane %v1547_v24, %v1551_v32 }
 0x205   : > { %1846 = vst [vmem:[#allocation1 + $0x1] ss:$9 sm:$0xff] %v1833_v37 }
 0x206   : > { %1848 = vst [vmem:[#allocation1 + $0x2] ss:$9 sm:$0xff] %v1834_v51  ;;  %v1556_v56 = vsel %vm1555_vm4, %v1554_v29, %v1552_v55  ;;  %vm1814_vm4 = vcmp.ge.s32.totalorder %v1229_v22, 108 }
 0x207   : > { %1850 = vst [vmem:[#allocation1 + $0x3] ss:$9 sm:$0xff] %v1835_v40 }
 0x208   : > { %1852 = vst [vmem:[#allocation1 + $0x4] ss:$9 sm:$0xff] %v1836_v50  ;;  %v1679_v50 = vadd.s32 4294967212, %v4103_v44 }
 0x209   : > { %1854 = vst [vmem:[#allocation1 + $0x5] ss:$9 sm:$0xff] %v1837_v23 }
 0x20a   : > { %1856 = vst [vmem:[#allocation1 + $0x6] ss:$9 sm:$0xff] %v1838_v59  ;;  %v1743_v59 = vadd.s32 4294967200, %v4103_v44 }
 0x20b   : > { %1858 = vst [vmem:[#allocation1 + $0x7] ss:$9 sm:$0xff] %v1839_v49  ;;  %v1745_v49 = vadd.s32 4294967192, %v4103_v44 }
 0x20c   : > { %1561 = vst.msk [vmem:[%s4115_s21] sm:$0x1] %vm1560_vm7, %v1556_v56  ;;  %vm1816_vm7 = vmand %vm1814_vm4, %vm1815_vm5 }
 0x212   : > { %v1859_v4 = vld [vmem:[#allocation1] sm:$0xff] }
 0x213   : > { %1866 = vperm.xlu1 %2121, %v1859_v4   ;;  %1860 = vst [vmem:[#allocation1] ss:$9 sm:$0xff] %v1840_v63 }
 0x214   : > { %1861 = vst [vmem:[#allocation1 + $0x1] ss:$9 sm:$0xff] %v1841_v8 }
 0x215   : > { %1862 = vst [vmem:[#allocation1 + $0x2] ss:$9 sm:$0xff] %v1842_v34 }
 0x216   : > { %1863 = vst [vmem:[#allocation1 + $0x3] ss:$9 sm:$0xff] %v1843_v7 }
 0x21d   : > { %v1864_v3 = vld [vmem:[#allocation1] sm:$0xff]  ;;  %v1611_v6 = vpop.permute.xlu1 %1610 }
 0x21e   : > { %1869 = vperm.xlu2 %2123, %v1864_v3   ;;  %1908 = vst [vmem:[#allocation1] ss:$9 sm:$0xff] %v1896_v62  ;;  %v1616_v51 = vperm.slane %v1611_v6, %v1615_v12 }
 0x21f   : > { %1910 = vst [vmem:[#allocation1 + $0x1] ss:$9 sm:$0xff] %v1897_v58 }
 0x220   : > { %1912 = vst [vmem:[#allocation1 + $0x2] ss:$9 sm:$0xff] %v1898_v48 }
 0x221   : > { %1914 = vst [vmem:[#allocation1 + $0x3] ss:$9 sm:$0xff] %v1899_v52 }
 0x222   : > { %1916 = vst [vmem:[#allocation1 + $0x4] ss:$9 sm:$0xff] %v1900_v43 }
 0x223   : > { %1918 = vst [vmem:[#allocation1 + $0x5] ss:$9 sm:$0xff] %v1901_v26 }
 0x224   : > { %1920 = vst [vmem:[#allocation1 + $0x6] ss:$9 sm:$0xff] %v1902_v20 }
 0x225   : > { %1922 = vst [vmem:[#allocation1 + $0x7] ss:$9 sm:$0xff] %v1903_v35 }
 0x228   : > { %v1614_v13 = vpop.permute.xlu1 %1613 }
 0x229   : > { %v1618_v37 = vperm.slane %v1614_v13, %v1617_v45 }
 0x22b   : > { %v1620_v40 = vsel %vm1619_vm8, %v1618_v37, %v1616_v51  ;;  %vm1878_vm8 = vcmp.ge.s32.totalorder %v1229_v22, 120 }
 0x22c   : > { %v1923_v0 = vld [vmem:[#allocation1] sm:$0xff]  ;;  %1625 = vst.msk [vmem:[%s4115_s21] sm:$0x1] %vm1624_vm11, %v1620_v40  ;;  %vm1880_vm11 = vmand %vm1878_vm8, %vm1879_vm9 }
 0x22d   : > { %1930 = vperm.xlu1 %2121, %v1923_v0   ;;  %1924 = vst [vmem:[#allocation1] ss:$9 sm:$0xff] %v1904_v18 }
 0x22e   : > { %1925 = vst [vmem:[#allocation1 + $0x1] ss:$9 sm:$0xff] %v1905_v61 }
 0x22f   : > { %1926 = vst [vmem:[#allocation1 + $0x2] ss:$9 sm:$0xff] %v1906_v60 }
 0x230   : > { %1927 = vst [vmem:[#allocation1 + $0x3] ss:$9 sm:$0xff] %v1907_v16 }
 0x237   : > { %v1928_v47 = vld [vmem:[#allocation1] sm:$0xff]  ;;  %v1675_v23 = vpop.permute.xlu1 %1674 }
 0x238   : > { %1933 = vperm.xlu2 %2123, %v1928_v47   ;;  %v1680_v54 = vperm.slane %v1675_v23, %v1679_v50 }
 0x239   : > { %v1739_v14 = vpop.permute.xlu2 %1738 }
 0x23a   : > { %v1744_v17 = vperm.slane %v1739_v14, %v1743_v59 }
 0x242   : > { %v1678_v21 = vpop.permute.xlu0 %1677 }
 0x243   : > { %v1682_v5 = vperm.slane %v1678_v21, %v1681_v36 }
 0x245   : > { %v1684_v15 = vsel %vm1683_vm12, %v1682_v5, %v1680_v54  ;;  %vm1941_vm12 = vcmp.ge.s32.totalorder %v1229_v22, 4 }
 0x246   : > { %1689 = vst.msk [vmem:[%s4115_s21] sm:$0x1] %vm1688_vm15, %v1684_v15  ;;  %vm1943_vm15 = vmand %vm1941_vm12, %vm1942_vm13 }
 0x253   : > { %v1803_v63 = vpop.permute.xlu2 %1802 }
 0x254   : > { %v1808_v8 = vperm.slane %v1803_v63, %v1807_v9 }
 0x25c   : > { %v1742_v39 = vpop.permute.xlu1 %1741 }
 0x25d   : > { %v1746_v28 = vperm.slane %v1742_v39, %v1745_v49 }
 0x25f   : > { %v1748_v27 = vsel %vm1747_vm0, %v1746_v28, %v1744_v17 }
 0x260   : > { %1753 = vst.msk [vmem:[%s4115_s21] sm:$0x1] %vm1752_vm3, %v1748_v27 }
 0x276   : > { %v1806_v10 = vpop.permute.xlu0 %1805 }
 0x277   : > { %v1810_v19 = vperm.slane %v1806_v10, %v1809_v31 }
 0x278   : > { %v1870_v34 = vpop.permute.xlu2 %1869 }
 0x279   : > { %v1812_v33 = vsel %vm1811_vm6, %v1810_v19, %v1808_v8  ;;  %v1873_v7 = vperm.slane %v1870_v34, %v4103_v44 }
 0x27a   : > { %1817 = vst.msk [vmem:[%s4115_s21] sm:$0x1] %vm1816_vm7, %v1812_v33 }
 0x27b   : > { %v1874_v2 = vrot.slane %v1873_v7, 7 }
 0x285   : > { %v1867_v4 = vpop.permute.xlu1 %1866 }
 0x286   : > { %v1872_v38 = vperm.slane %v1867_v4, %v1871_v57 }
 0x288   : > { %v1876_v25 = vsel %vm1875_vm10, %v1872_v38, %v1874_v2 }
 0x289   : > { %1881 = vst.msk [vmem:[%s4115_s21] sm:$0x3] %vm1880_vm11, %v1876_v25 }
 0x292   : > { %v1934_v62 = vpop.permute.xlu2 %1933 }
 0x293   : > { %v1937_v32 = vperm.slane %v1934_v62, %v4124_v30 }
 0x29f   : > { %v1931_v58 = vpop.permute.xlu1 %1930 }
 0x2a0   : > { %v1936_v48 = vperm.slane %v1931_v58, %v1935_v11 }
 0x2a2   : > { %v1939_v24 = vsel %vm1938_vm14, %v1937_v32, %v1936_v48 }
 0x2a3   : > { %1944 = vst.msk [vmem:[%s4115_s21 + $0x1] sm:$0x1] %vm1943_vm15, %v1939_v24 }
 0x2a4   : > { %2201 = shalt.err (!%p2198_p3)
}
 0x2a5   : > { %2080 = dma.vmem_to_hbm [thread:$0]  (%p2301_p5), %s1959_s29, 32, %s1961_s30, %s1946_s2  }
 0x2a6 PF: > { %p2086_p4 = scmp.ge.s32.totalorder %s2236_s17, 2  ;;  %s1972_s11 = sand.u32 1, %s2224_s14  }
 0x2a7   : > { %s1973_s12 = scalar_lea.sflag [#allocation5], %s1972_s11 }
 0x2a8   : > { %p2083_p7 = pnand %p2086_p4, %p2305_p6 }
 0x2aa   : > { %p2084_p8 = pneg %p2083_p7 }
 0x2ac   : > { %2219 = dma.done.wait (%p2084_p8), %s1973_s12, 32  }
 0x2ad   : > { %2221 = vsyncadd (%p2084_p8), %s1973_s12, 4294967264  ;;  %p14_p9 = scmp.ge.s32.totalorder %s2288_s19, 4   ;;  %s4735_s14 = smov %s2228_s15 }
 0x2ae   : > { %s4736_s15 = smov %s2232_s16  ;;  %s4737_s16 = smov %s2299_s22 }
 0x2af   : > { %s4738_s17 = smov %s2288_s19  ;;  %16 = sbr.rel (!%p14_p9) target bundleno = 5 (0x5), region = 182 }
 0x2b4   :  { %1979 = vsyncpa [#allocation5], 1 }
 0x2b5   :  { %1981 = vsyncpa [#allocation5 + $0x1], 1 }

</bundles_post_ra>
